<compile_context>
chip_gen: v7x
topology: tpu7x:2x2x1
jax: 0.10.0
libtpu: 0.0.40
codegen_flags: <defaults>
</compile_context>

<pallas_src>
import functools

import jax
import jax.numpy as jnp
from jax import lax
from jax.experimental import pallas as pl
from jax.experimental.pallas import tpu as pltpu


def _fused_maskconv_kernel(*refs, layer_meta, act_min, act_max):
    """Fused N-layer (Conv2d + bias + Hardtanh + length-mask) for one batch elem.

    refs layout:
      refs[0]                 : SMEM (B,) int32 lengths (scalar prefetch)
      refs[1]                 : VMEM (1, C_in, D, T) input tile for batch b
      refs[2 : 2+2L]          : per layer: weight slab (C_out, C_in*KH*KW),
                                            bias (C_out, 1)
      refs[2+2L]              : VMEM (1, C_last, D, T) output tile
      refs[3+2L : 3+4L]       : per layer: padded-halo scratch (C_in, D+2p, T+2p),
                                            im2col patch scratch (C_in*KH*KW, D*T)
    """
    n_layers = len(layer_meta)
    len_ref = refs[0]
    x_ref = refs[1]
    wb = refs[2:2 + 2 * n_layers]
    o_ref = refs[2 + 2 * n_layers]
    scratch = refs[3 + 2 * n_layers:]

    b = pl.program_id(0)
    length = len_ref[b]

    _, _, d, t = x_ref.shape
    n = d * t

    # Hoisted length mask: one lane-dim compare, broadcast inside the where.
    valid = lax.broadcasted_iota(jnp.int32, (1, 1, t), 2) < length

    y = x_ref[0].astype(jnp.float32)                       # (C_in, D, T)
    for li, (kh, kw, ph, pw) in enumerate(layer_meta):
        w_ref = wb[2 * li]                                 # (C_out, C_in*KH*KW)
        b_ref = wb[2 * li + 1]                             # (C_out, 1)
        xp_ref = scratch[2 * li]                           # (C_in, D+2ph, T+2pw)
        patch_ref = scratch[2 * li + 1]                    # (C_in*KH*KW, D*T)
        cc = y.shape[0]
        c_out = w_ref.shape[0]

        # In-kernel "same" zero padding (no host jnp.pad, no extra HBM copy).
        xp_ref[...] = jnp.zeros_like(xp_ref)
        xp_ref[:, ph:ph + d, pw:pw + t] = y

        # im2col: build the shifted copies ONCE into a VMEM scratch ...
        for i in range(kh):
            for j in range(kw):
                r0 = (i * kw + j) * cc
                patch_ref[r0:r0 + cc, :] = (
                    xp_ref[:, i:i + d, j:j + t].reshape(cc, n))

        # ... and contract them with ONE MXU matmul (contraction = C_in*KH*KW).
        acc = jnp.dot(w_ref[...], patch_ref[...],
                      preferred_element_type=jnp.float32)  # (C_out, D*T)
        acc = acc + b_ref[...]                             # bias broadcast
        acc = jnp.clip(acc, act_min, act_max)              # Hardtanh(0, 20)

        y = jnp.where(valid, acc.reshape(c_out, d, t), jnp.float32(0.0))

    o_ref[0] = y.astype(o_ref.dtype)


def mask_conv_fused(x, lengths, layer_params, *, act_min=0.0, act_max=20.0):
    """Single pallas_call running the whole Conv+Hardtanh+mask stack fused."""
    B, C_in, D, T = x.shape

    metas = []
    operands = []
    in_specs = [pl.BlockSpec((1, C_in, D, T), lambda b, lens: (b, 0, 0, 0))]
    scratch_shapes = []

    c_prev = C_in
    for p in layer_params:
        w, bias = p["w"], p["b"]
        C_out, C_in_w, KH, KW = w.shape
        ph, pw = p["padding"]
        assert C_in_w == c_prev
        # Fusion requires stride-1 "same" convs (spatial dims preserved).
        assert KH == 2 * ph + 1 and KW == 2 * pw + 1

        # Packed weight slab: rows (i, j, c) match the im2col patch row order.
        w_slab = jnp.transpose(w, (0, 2, 3, 1)).reshape(C_out, KH * KW * C_in_w)
        b_col = bias.reshape(C_out, 1)

        operands += [w_slab, b_col]
        in_specs += [
            pl.BlockSpec((C_out, KH * KW * C_in_w), lambda b, lens: (0, 0)),
            pl.BlockSpec((C_out, 1), lambda b, lens: (0, 0)),
        ]
        scratch_shapes += [
            pltpu.VMEM((C_in_w, D + 2 * ph, T + 2 * pw), jnp.float32),
            pltpu.VMEM((KH * KW * C_in_w, D * T), jnp.float32),
        ]
        metas.append((KH, KW, ph, pw))
        c_prev = C_out

    C_last = c_prev
    kernel = functools.partial(_fused_maskconv_kernel,
                               layer_meta=tuple(metas),
                               act_min=act_min, act_max=act_max)

    return pl.pallas_call(
        kernel,
        out_shape=jax.ShapeDtypeStruct((B, C_last, D, T), x.dtype),
        grid_spec=pltpu.PrefetchScalarGridSpec(
            num_scalar_prefetch=1,            # lengths -> SMEM
            grid=(B,),
            in_specs=in_specs,
            out_specs=pl.BlockSpec((1, C_last, D, T),
                                   lambda b, lens: (b, 0, 0, 0)),
            scratch_shapes=scratch_shapes,
        ),
        compiler_params=pltpu.CompilerParams(
            dimension_semantics=("parallel",)),
    )(lengths, x, *operands)


class MaskConvPallas:
    """Pallas MaskConv over a fixed [Conv2d -> Hardtanh(0,20)] x N stack."""

    def __init__(self, layer_params):
        self.layer_params = layer_params

    def __call__(self, x, lengths):
        # Stride-1 convs: lengths pass through unchanged (as in the reference).
        return mask_conv_fused(x, lengths, self.layer_params), lengths


def reference(x, lengths, layer_params):
    """Pure-JAX reference replicating the PyTorch forward semantics exactly."""
    for p in layer_params:
        y = lax.conv_general_dilated(
            x, p["w"], window_strides=(1, 1),
            padding=[(p["padding"][0], p["padding"][0]),
                     (p["padding"][1], p["padding"][1])],
            dimension_numbers=("NCHW", "OIHW", "NCHW"))
        y = y + p["b"].reshape(1, -1, 1, 1)
        t = jnp.arange(y.shape[3])
        m = t[None, None, None, :] >= lengths[:, None, None, None]
        y = jnp.where(m, 0.0, y)          # mask after conv module
        y = jnp.clip(y, 0.0, 20.0)        # Hardtanh module
        y = jnp.where(m, 0.0, y)          # mask after activation module
        x = y
    return x, lengths


if __name__ == "__main__":
    key = jax.random.PRNGKey(0)
    B, C, D, T = 2, 4, 16, 16
    C1, C2 = 8, 8
    k1, k2, k3, k4, k5 = jax.random.split(key, 5)

    x = jax.random.normal(k1, (B, C, D, T), dtype=jnp.float32)
    lengths = jnp.array([16, 10], dtype=jnp.int32)

    layer_params = [
        dict(w=0.1 * jax.random.normal(k2, (C1, C, 3, 3), jnp.float32),
             b=0.1 * jax.random.normal(k3, (C1,), jnp.float32),
             padding=(1, 1)),
        dict(w=0.1 * jax.random.normal(k4, (C2, C1, 3, 3), jnp.float32),
             b=0.1 * jax.random.normal(k5, (C2,), jnp.float32),
             padding=(1, 1)),
    ]

    model = MaskConvPallas(layer_params)
    out, out_lengths = model(x, lengths)
    jax.block_until_ready(out)

    ref, _ = reference(x, lengths, layer_params)
    max_err = float(jnp.max(jnp.abs(out - ref)))
    assert out.shape == (B, C2, D, T), out.shape
    assert max_err < 1e-2, f"max abs error {max_err}"
    print("KERNEL_OK")
</pallas_src>

<mosaic_0001>
module attributes {stable_mosaic.version = 11 : i64} {
  func.func @_fused_maskconv_kernel(%arg0: i32, %arg1: memref<2xi32, #tpu.memory_space<smem>>, %arg2: memref<1x4x16x16xf32, #tpu.memory_space<vmem>>, %arg3: memref<8x36xf32, #tpu.memory_space<vmem>>, %arg4: memref<8x1xf32, #tpu.memory_space<vmem>>, %arg5: memref<8x72xf32, #tpu.memory_space<vmem>>, %arg6: memref<8x1xf32, #tpu.memory_space<vmem>>, %arg7: memref<1x8x16x16xf32, #tpu.memory_space<vmem>>, %arg8: memref<4x18x18xf32, #tpu.memory_space<vmem>>, %arg9: memref<36x256xf32, #tpu.memory_space<vmem>>, %arg10: memref<8x18x18xf32, #tpu.memory_space<vmem>>, %arg11: memref<72x256xf32, #tpu.memory_space<vmem>>) attributes {dimension_semantics = [#tpu.dimension_semantics<parallel>], iteration_bounds = array<i64: 2>, scalar_prefetch = 1 : i64, scratch_operands = 4 : i64, tpu.core_type = #tpu.core_type<tc>, window_params = [{transform_indices = @transform_0, window_bounds = array<i64: 1, 4, 16, 16>}, {pipeline_mode = #tpu.pipeline_mode<synchronous>, transform_indices = @transform_1, window_bounds = array<i64: 8, 36>}, {pipeline_mode = #tpu.pipeline_mode<synchronous>, transform_indices = @transform_2, window_bounds = array<i64: 8, 1>}, {pipeline_mode = #tpu.pipeline_mode<synchronous>, transform_indices = @transform_3, window_bounds = array<i64: 8, 72>}, {pipeline_mode = #tpu.pipeline_mode<synchronous>, transform_indices = @transform_4, window_bounds = array<i64: 8, 1>}, {transform_indices = @transform_5, window_bounds = array<i64: 1, 8, 16, 16>}]} {
    %0 = arith.index_cast %arg0 : i32 to index
    %1 = memref.load %arg1[%0] : memref<2xi32, #tpu.memory_space<smem>>
    %2 = tpu.iota {dimensions = array<i32: 2>} : vector<1x1x16xi32>
    %3 = vector.broadcast %1 : i32 to vector<1x1x16xi32>
    %4 = arith.cmpi slt, %2, %3 : vector<1x1x16xi32>
    %c0 = arith.constant 0 : index
    %c0_0 = arith.constant 0 : index
    %c0_1 = arith.constant 0 : index
    %c0_2 = arith.constant 0 : index
    %5 = vector.load %arg2[%c0, %c0_0, %c0_1, %c0_2] : memref<1x4x16x16xf32, #tpu.memory_space<vmem>>, vector<1x4x16x16xf32>
    %6 = vector.shape_cast %5 : vector<1x4x16x16xf32> to vector<4x16x16xf32>
    %cst = arith.constant 0.000000e+00 : f32
    %7 = vector.broadcast %cst : f32 to vector<4x18x18xf32>
    %c0_3 = arith.constant 0 : index
    %c0_4 = arith.constant 0 : index
    %c0_5 = arith.constant 0 : index
    %8 = vector.load %arg8[%c0_3, %c0_4, %c0_5] : memref<4x18x18xf32, #tpu.memory_space<vmem>>, vector<4x18x18xf32>
    tpu.vector_store %arg8[%c0_3, %c0_4, %c0_5], %7 {strides = array<i32>} : memref<4x18x18xf32, #tpu.memory_space<vmem>>, vector<4x18x18xf32>,
    %c0_6 = arith.constant 0 : index
    %c1 = arith.constant 1 : index
    %c1_7 = arith.constant 1 : index
    %9 = vector.load %arg8[%c0_6, %c1, %c1_7] : memref<4x18x18xf32, #tpu.memory_space<vmem>>, vector<4x16x16xf32>
    tpu.vector_store %arg8[%c0_6, %c1, %c1_7], %6 {strides = array<i32>} : memref<4x18x18xf32, #tpu.memory_space<vmem>>, vector<4x16x16xf32>,
    %c0_8 = arith.constant 0 : index
    %c0_9 = arith.constant 0 : index
    %c0_10 = arith.constant 0 : index
    %10 = vector.load %arg8[%c0_8, %c0_9, %c0_10] : memref<4x18x18xf32, #tpu.memory_space<vmem>>, vector<4x16x16xf32>
    %11 = vector.shape_cast %10 : vector<4x16x16xf32> to vector<4x256xf32>
    %c0_11 = arith.constant 0 : index
    %c0_12 = arith.constant 0 : index
    %12 = vector.load %arg9[%c0_11, %c0_12] : memref<36x256xf32, #tpu.memory_space<vmem>>, vector<4x256xf32>
    tpu.vector_store %arg9[%c0_11, %c0_12], %11 {strides = array<i32>} : memref<36x256xf32, #tpu.memory_space<vmem>>, vector<4x256xf32>,
    %c0_13 = arith.constant 0 : index
    %c0_14 = arith.constant 0 : index
    %c1_15 = arith.constant 1 : index
    %13 = vector.load %arg8[%c0_13, %c0_14, %c1_15] : memref<4x18x18xf32, #tpu.memory_space<vmem>>, vector<4x16x16xf32>
    %14 = vector.shape_cast %13 : vector<4x16x16xf32> to vector<4x256xf32>
    %c4 = arith.constant 4 : index
    %c0_16 = arith.constant 0 : index
    %15 = vector.load %arg9[%c4, %c0_16] : memref<36x256xf32, #tpu.memory_space<vmem>>, vector<4x256xf32>
    tpu.vector_store %arg9[%c4, %c0_16], %14 {strides = array<i32>} : memref<36x256xf32, #tpu.memory_space<vmem>>, vector<4x256xf32>,
    %c0_17 = arith.constant 0 : index
    %c0_18 = arith.constant 0 : index
    %c2 = arith.constant 2 : index
    %16 = vector.load %arg8[%c0_17, %c0_18, %c2] : memref<4x18x18xf32, #tpu.memory_space<vmem>>, vector<4x16x16xf32>
    %17 = vector.shape_cast %16 : vector<4x16x16xf32> to vector<4x256xf32>
    %c8 = arith.constant 8 : index
    %c0_19 = arith.constant 0 : index
    %18 = vector.load %arg9[%c8, %c0_19] : memref<36x256xf32, #tpu.memory_space<vmem>>, vector<4x256xf32>
    tpu.vector_store %arg9[%c8, %c0_19], %17 {strides = array<i32>} : memref<36x256xf32, #tpu.memory_space<vmem>>, vector<4x256xf32>,
    %c0_20 = arith.constant 0 : index
    %c1_21 = arith.constant 1 : index
    %c0_22 = arith.constant 0 : index
    %19 = vector.load %arg8[%c0_20, %c1_21, %c0_22] : memref<4x18x18xf32, #tpu.memory_space<vmem>>, vector<4x16x16xf32>
    %20 = vector.shape_cast %19 : vector<4x16x16xf32> to vector<4x256xf32>
    %c12 = arith.constant 12 : index
    %c0_23 = arith.constant 0 : index
    %21 = vector.load %arg9[%c12, %c0_23] : memref<36x256xf32, #tpu.memory_space<vmem>>, vector<4x256xf32>
    tpu.vector_store %arg9[%c12, %c0_23], %20 {strides = array<i32>} : memref<36x256xf32, #tpu.memory_space<vmem>>, vector<4x256xf32>,
    %c0_24 = arith.constant 0 : index
    %c1_25 = arith.constant 1 : index
    %c1_26 = arith.constant 1 : index
    %22 = vector.load %arg8[%c0_24, %c1_25, %c1_26] : memref<4x18x18xf32, #tpu.memory_space<vmem>>, vector<4x16x16xf32>
    %23 = vector.shape_cast %22 : vector<4x16x16xf32> to vector<4x256xf32>
    %c16 = arith.constant 16 : index
    %c0_27 = arith.constant 0 : index
    %24 = vector.load %arg9[%c16, %c0_27] : memref<36x256xf32, #tpu.memory_space<vmem>>, vector<4x256xf32>
    tpu.vector_store %arg9[%c16, %c0_27], %23 {strides = array<i32>} : memref<36x256xf32, #tpu.memory_space<vmem>>, vector<4x256xf32>,
    %c0_28 = arith.constant 0 : index
    %c1_29 = arith.constant 1 : index
    %c2_30 = arith.constant 2 : index
    %25 = vector.load %arg8[%c0_28, %c1_29, %c2_30] : memref<4x18x18xf32, #tpu.memory_space<vmem>>, vector<4x16x16xf32>
    %26 = vector.shape_cast %25 : vector<4x16x16xf32> to vector<4x256xf32>
    %c20 = arith.constant 20 : index
    %c0_31 = arith.constant 0 : index
    %27 = vector.load %arg9[%c20, %c0_31] : memref<36x256xf32, #tpu.memory_space<vmem>>, vector<4x256xf32>
    tpu.vector_store %arg9[%c20, %c0_31], %26 {strides = array<i32>} : memref<36x256xf32, #tpu.memory_space<vmem>>, vector<4x256xf32>,
    %c0_32 = arith.constant 0 : index
    %c2_33 = arith.constant 2 : index
    %c0_34 = arith.constant 0 : index
    %28 = vector.load %arg8[%c0_32, %c2_33, %c0_34] : memref<4x18x18xf32, #tpu.memory_space<vmem>>, vector<4x16x16xf32>
    %29 = vector.shape_cast %28 : vector<4x16x16xf32> to vector<4x256xf32>
    %c24 = arith.constant 24 : index
    %c0_35 = arith.constant 0 : index
    %30 = vector.load %arg9[%c24, %c0_35] : memref<36x256xf32, #tpu.memory_space<vmem>>, vector<4x256xf32>
    tpu.vector_store %arg9[%c24, %c0_35], %29 {strides = array<i32>} : memref<36x256xf32, #tpu.memory_space<vmem>>, vector<4x256xf32>,
    %c0_36 = arith.constant 0 : index
    %c2_37 = arith.constant 2 : index
    %c1_38 = arith.constant 1 : index
    %31 = vector.load %arg8[%c0_36, %c2_37, %c1_38] : memref<4x18x18xf32, #tpu.memory_space<vmem>>, vector<4x16x16xf32>
    %32 = vector.shape_cast %31 : vector<4x16x16xf32> to vector<4x256xf32>
    %c28 = arith.constant 28 : index
    %c0_39 = arith.constant 0 : index
    %33 = vector.load %arg9[%c28, %c0_39] : memref<36x256xf32, #tpu.memory_space<vmem>>, vector<4x256xf32>
    tpu.vector_store %arg9[%c28, %c0_39], %32 {strides = array<i32>} : memref<36x256xf32, #tpu.memory_space<vmem>>, vector<4x256xf32>,
    %c0_40 = arith.constant 0 : index
    %c2_41 = arith.constant 2 : index
    %c2_42 = arith.constant 2 : index
    %34 = vector.load %arg8[%c0_40, %c2_41, %c2_42] : memref<4x18x18xf32, #tpu.memory_space<vmem>>, vector<4x16x16xf32>
    %35 = vector.shape_cast %34 : vector<4x16x16xf32> to vector<4x256xf32>
    %c32 = arith.constant 32 : index
    %c0_43 = arith.constant 0 : index
    %36 = vector.load %arg9[%c32, %c0_43] : memref<36x256xf32, #tpu.memory_space<vmem>>, vector<4x256xf32>
    tpu.vector_store %arg9[%c32, %c0_43], %35 {strides = array<i32>} : memref<36x256xf32, #tpu.memory_space<vmem>>, vector<4x256xf32>,
    %c0_44 = arith.constant 0 : index
    %c0_45 = arith.constant 0 : index
    %37 = vector.load %arg3[%c0_44, %c0_45] : memref<8x36xf32, #tpu.memory_space<vmem>>, vector<8x36xf32>
    %c0_46 = arith.constant 0 : index
    %c0_47 = arith.constant 0 : index
    %38 = vector.load %arg9[%c0_46, %c0_47] : memref<36x256xf32, #tpu.memory_space<vmem>>, vector<36x256xf32>
    %cst_48 = arith.constant dense<0.000000e+00> : vector<8x256xf32>
    %39 = tpu.matmul %37, %38, %cst_48 {dimension_numbers = #tpu.dot_dimension_numbers<[1], [0], [0], [1], [0, 0, 1, 1], [], []>} : vector<8x36xf32>, vector<36x256xf32>, vector<8x256xf32> -> vector<8x256xf32>
    %c0_49 = arith.constant 0 : index
    %c0_50 = arith.constant 0 : index
    %40 = vector.load %arg4[%c0_49, %c0_50] : memref<8x1xf32, #tpu.memory_space<vmem>>, vector<8x1xf32>
    %41 = vector.broadcast %40 : vector<8x1xf32> to vector<8x256xf32>
    %42 = arith.addf %39, %41 : vector<8x256xf32>
    %cst_51 = arith.constant 0.000000e+00 : f32
    %cst_52 = arith.constant 2.000000e+01 : f32
    %43 = vector.broadcast %cst_51 : f32 to vector<8x256xf32>
    %44 = arith.maximumf %43, %42 : vector<8x256xf32>
    %45 = vector.broadcast %cst_52 : f32 to vector<8x256xf32>
    %46 = arith.minimumf %45, %44 : vector<8x256xf32>
    %47 = vector.shape_cast %46 : vector<8x256xf32> to vector<8x16x16xf32>
    %cst_53 = arith.constant 0.000000e+00 : f32
    %48 = vector.shape_cast %4 : vector<1x1x16xi1> to vector<1x1x16xi1>
    %49 = vector.broadcast %48 : vector<1x1x16xi1> to vector<8x16x16xi1>
    %50 = vector.broadcast %cst_53 : f32 to vector<8x16x16xf32>
    %51 = arith.select %49, %47, %50 : vector<8x16x16xi1>, vector<8x16x16xf32>
    %cst_54 = arith.constant 0.000000e+00 : f32
    %52 = vector.broadcast %cst_54 : f32 to vector<8x18x18xf32>
    %c0_55 = arith.constant 0 : index
    %c0_56 = arith.constant 0 : index
    %c0_57 = arith.constant 0 : index
    %53 = vector.load %arg10[%c0_55, %c0_56, %c0_57] : memref<8x18x18xf32, #tpu.memory_space<vmem>>, vector<8x18x18xf32>
    tpu.vector_store %arg10[%c0_55, %c0_56, %c0_57], %52 {strides = array<i32>} : memref<8x18x18xf32, #tpu.memory_space<vmem>>, vector<8x18x18xf32>,
    %c0_58 = arith.constant 0 : index
    %c1_59 = arith.constant 1 : index
    %c1_60 = arith.constant 1 : index
    %54 = vector.load %arg10[%c0_58, %c1_59, %c1_60] : memref<8x18x18xf32, #tpu.memory_space<vmem>>, vector<8x16x16xf32>
    tpu.vector_store %arg10[%c0_58, %c1_59, %c1_60], %51 {strides = array<i32>} : memref<8x18x18xf32, #tpu.memory_space<vmem>>, vector<8x16x16xf32>,
    %c0_61 = arith.constant 0 : index
    %c0_62 = arith.constant 0 : index
    %c0_63 = arith.constant 0 : index
    %55 = vector.load %arg10[%c0_61, %c0_62, %c0_63] : memref<8x18x18xf32, #tpu.memory_space<vmem>>, vector<8x16x16xf32>
    %56 = vector.shape_cast %55 : vector<8x16x16xf32> to vector<8x256xf32>
    %c0_64 = arith.constant 0 : index
    %c0_65 = arith.constant 0 : index
    %57 = vector.load %arg11[%c0_64, %c0_65] : memref<72x256xf32, #tpu.memory_space<vmem>>, vector<8x256xf32>
    tpu.vector_store %arg11[%c0_64, %c0_65], %56 {strides = array<i32>} : memref<72x256xf32, #tpu.memory_space<vmem>>, vector<8x256xf32>,
    %c0_66 = arith.constant 0 : index
    %c0_67 = arith.constant 0 : index
    %c1_68 = arith.constant 1 : index
    %58 = vector.load %arg10[%c0_66, %c0_67, %c1_68] : memref<8x18x18xf32, #tpu.memory_space<vmem>>, vector<8x16x16xf32>
    %59 = vector.shape_cast %58 : vector<8x16x16xf32> to vector<8x256xf32>
    %c8_69 = arith.constant 8 : index
    %c0_70 = arith.constant 0 : index
    %60 = vector.load %arg11[%c8_69, %c0_70] : memref<72x256xf32, #tpu.memory_space<vmem>>, vector<8x256xf32>
    tpu.vector_store %arg11[%c8_69, %c0_70], %59 {strides = array<i32>} : memref<72x256xf32, #tpu.memory_space<vmem>>, vector<8x256xf32>,
    %c0_71 = arith.constant 0 : index
    %c0_72 = arith.constant 0 : index
    %c2_73 = arith.constant 2 : index
    %61 = vector.load %arg10[%c0_71, %c0_72, %c2_73] : memref<8x18x18xf32, #tpu.memory_space<vmem>>, vector<8x16x16xf32>
    %62 = vector.shape_cast %61 : vector<8x16x16xf32> to vector<8x256xf32>
    %c16_74 = arith.constant 16 : index
    %c0_75 = arith.constant 0 : index
    %63 = vector.load %arg11[%c16_74, %c0_75] : memref<72x256xf32, #tpu.memory_space<vmem>>, vector<8x256xf32>
    tpu.vector_store %arg11[%c16_74, %c0_75], %62 {strides = array<i32>} : memref<72x256xf32, #tpu.memory_space<vmem>>, vector<8x256xf32>,
    %c0_76 = arith.constant 0 : index
    %c1_77 = arith.constant 1 : index
    %c0_78 = arith.constant 0 : index
    %64 = vector.load %arg10[%c0_76, %c1_77, %c0_78] : memref<8x18x18xf32, #tpu.memory_space<vmem>>, vector<8x16x16xf32>
    %65 = vector.shape_cast %64 : vector<8x16x16xf32> to vector<8x256xf32>
    %c24_79 = arith.constant 24 : index
    %c0_80 = arith.constant 0 : index
    %66 = vector.load %arg11[%c24_79, %c0_80] : memref<72x256xf32, #tpu.memory_space<vmem>>, vector<8x256xf32>
    tpu.vector_store %arg11[%c24_79, %c0_80], %65 {strides = array<i32>} : memref<72x256xf32, #tpu.memory_space<vmem>>, vector<8x256xf32>,
    %c0_81 = arith.constant 0 : index
    %c1_82 = arith.constant 1 : index
    %c1_83 = arith.constant 1 : index
    %67 = vector.load %arg10[%c0_81, %c1_82, %c1_83] : memref<8x18x18xf32, #tpu.memory_space<vmem>>, vector<8x16x16xf32>
    %68 = vector.shape_cast %67 : vector<8x16x16xf32> to vector<8x256xf32>
    %c32_84 = arith.constant 32 : index
    %c0_85 = arith.constant 0 : index
    %69 = vector.load %arg11[%c32_84, %c0_85] : memref<72x256xf32, #tpu.memory_space<vmem>>, vector<8x256xf32>
    tpu.vector_store %arg11[%c32_84, %c0_85], %68 {strides = array<i32>} : memref<72x256xf32, #tpu.memory_space<vmem>>, vector<8x256xf32>,
    %c0_86 = arith.constant 0 : index
    %c1_87 = arith.constant 1 : index
    %c2_88 = arith.constant 2 : index
    %70 = vector.load %arg10[%c0_86, %c1_87, %c2_88] : memref<8x18x18xf32, #tpu.memory_space<vmem>>, vector<8x16x16xf32>
    %71 = vector.shape_cast %70 : vector<8x16x16xf32> to vector<8x256xf32>
    %c40 = arith.constant 40 : index
    %c0_89 = arith.constant 0 : index
    %72 = vector.load %arg11[%c40, %c0_89] : memref<72x256xf32, #tpu.memory_space<vmem>>, vector<8x256xf32>
    tpu.vector_store %arg11[%c40, %c0_89], %71 {strides = array<i32>} : memref<72x256xf32, #tpu.memory_space<vmem>>, vector<8x256xf32>,
    %c0_90 = arith.constant 0 : index
    %c2_91 = arith.constant 2 : index
    %c0_92 = arith.constant 0 : index
    %73 = vector.load %arg10[%c0_90, %c2_91, %c0_92] : memref<8x18x18xf32, #tpu.memory_space<vmem>>, vector<8x16x16xf32>
    %74 = vector.shape_cast %73 : vector<8x16x16xf32> to vector<8x256xf32>
    %c48 = arith.constant 48 : index
    %c0_93 = arith.constant 0 : index
    %75 = vector.load %arg11[%c48, %c0_93] : memref<72x256xf32, #tpu.memory_space<vmem>>, vector<8x256xf32>
    tpu.vector_store %arg11[%c48, %c0_93], %74 {strides = array<i32>} : memref<72x256xf32, #tpu.memory_space<vmem>>, vector<8x256xf32>,
    %c0_94 = arith.constant 0 : index
    %c2_95 = arith.constant 2 : index
    %c1_96 = arith.constant 1 : index
    %76 = vector.load %arg10[%c0_94, %c2_95, %c1_96] : memref<8x18x18xf32, #tpu.memory_space<vmem>>, vector<8x16x16xf32>
    %77 = vector.shape_cast %76 : vector<8x16x16xf32> to vector<8x256xf32>
    %c56 = arith.constant 56 : index
    %c0_97 = arith.constant 0 : index
    %78 = vector.load %arg11[%c56, %c0_97] : memref<72x256xf32, #tpu.memory_space<vmem>>, vector<8x256xf32>
    tpu.vector_store %arg11[%c56, %c0_97], %77 {strides = array<i32>} : memref<72x256xf32, #tpu.memory_space<vmem>>, vector<8x256xf32>,
    %c0_98 = arith.constant 0 : index
    %c2_99 = arith.constant 2 : index
    %c2_100 = arith.constant 2 : index
    %79 = vector.load %arg10[%c0_98, %c2_99, %c2_100] : memref<8x18x18xf32, #tpu.memory_space<vmem>>, vector<8x16x16xf32>
    %80 = vector.shape_cast %79 : vector<8x16x16xf32> to vector<8x256xf32>
    %c64 = arith.constant 64 : index
    %c0_101 = arith.constant 0 : index
    %81 = vector.load %arg11[%c64, %c0_101] : memref<72x256xf32, #tpu.memory_space<vmem>>, vector<8x256xf32>
    tpu.vector_store %arg11[%c64, %c0_101], %80 {strides = array<i32>} : memref<72x256xf32, #tpu.memory_space<vmem>>, vector<8x256xf32>,
    %c0_102 = arith.constant 0 : index
    %c0_103 = arith.constant 0 : index
    %82 = vector.load %arg5[%c0_102, %c0_103] : memref<8x72xf32, #tpu.memory_space<vmem>>, vector<8x72xf32>
    %c0_104 = arith.constant 0 : index
    %c0_105 = arith.constant 0 : index
    %83 = vector.load %arg11[%c0_104, %c0_105] : memref<72x256xf32, #tpu.memory_space<vmem>>, vector<72x256xf32>
    %cst_106 = arith.constant dense<0.000000e+00> : vector<8x256xf32>
    %84 = tpu.matmul %82, %83, %cst_106 {dimension_numbers = #tpu.dot_dimension_numbers<[1], [0], [0], [1], [0, 0, 1, 1], [], []>} : vector<8x72xf32>, vector<72x256xf32>, vector<8x256xf32> -> vector<8x256xf32>
    %c0_107 = arith.constant 0 : index
    %c0_108 = arith.constant 0 : index
    %85 = vector.load %arg6[%c0_107, %c0_108] : memref<8x1xf32, #tpu.memory_space<vmem>>, vector<8x1xf32>
    %86 = vector.broadcast %85 : vector<8x1xf32> to vector<8x256xf32>
    %87 = arith.addf %84, %86 : vector<8x256xf32>
    %cst_109 = arith.constant 0.000000e+00 : f32
    %cst_110 = arith.constant 2.000000e+01 : f32
    %88 = vector.broadcast %cst_109 : f32 to vector<8x256xf32>
    %89 = arith.maximumf %88, %87 : vector<8x256xf32>
    %90 = vector.broadcast %cst_110 : f32 to vector<8x256xf32>
    %91 = arith.minimumf %90, %89 : vector<8x256xf32>
    %92 = vector.shape_cast %91 : vector<8x256xf32> to vector<8x16x16xf32>
    %cst_111 = arith.constant 0.000000e+00 : f32
    %93 = vector.shape_cast %4 : vector<1x1x16xi1> to vector<1x1x16xi1>
    %94 = vector.broadcast %93 : vector<1x1x16xi1> to vector<8x16x16xi1>
    %95 = vector.broadcast %cst_111 : f32 to vector<8x16x16xf32>
    %96 = arith.select %94, %92, %95 : vector<8x16x16xi1>, vector<8x16x16xf32>
    %c0_112 = arith.constant 0 : index
    %c0_113 = arith.constant 0 : index
    %c0_114 = arith.constant 0 : index
    %c0_115 = arith.constant 0 : index
    %97 = vector.load %arg7[%c0_112, %c0_113, %c0_114, %c0_115] : memref<1x8x16x16xf32, #tpu.memory_space<vmem>>, vector<1x8x16x16xf32>
    %98 = vector.shape_cast %97 : vector<1x8x16x16xf32> to vector<8x16x16xf32>
    %99 = vector.shape_cast %96 : vector<8x16x16xf32> to vector<1x8x16x16xf32>
    tpu.vector_store %arg7[%c0_112, %c0_113, %c0_114, %c0_115], %99 {strides = array<i32>} : memref<1x8x16x16xf32, #tpu.memory_space<vmem>>, vector<1x8x16x16xf32>,
    return
  }
  func.func @transform_0(%arg0: i32, %arg1: memref<2xi32, #tpu.memory_space<smem>>) -> (i32, i32, i32, i32) {
    %c0_i32 = arith.constant 0 : i32
    %c0_i32_0 = arith.constant 0 : i32
    %c0_i32_1 = arith.constant 0 : i32
    %c0_i32_2 = arith.constant 0 : i32
    return %arg0, %c0_i32, %c0_i32_0, %c0_i32_1 : i32, i32, i32, i32
  }
  func.func @transform_1(%arg0: i32, %arg1: memref<2xi32, #tpu.memory_space<smem>>) -> (i32, i32) {
    %c0_i32 = arith.constant 0 : i32
    %c0_i32_0 = arith.constant 0 : i32
    %c0_i32_1 = arith.constant 0 : i32
    return %c0_i32, %c0_i32_0 : i32, i32
  }
  func.func @transform_2(%arg0: i32, %arg1: memref<2xi32, #tpu.memory_space<smem>>) -> (i32, i32) {
    %c0_i32 = arith.constant 0 : i32
    %c0_i32_0 = arith.constant 0 : i32
    %c0_i32_1 = arith.constant 0 : i32
    return %c0_i32, %c0_i32_0 : i32, i32
  }
  func.func @transform_3(%arg0: i32, %arg1: memref<2xi32, #tpu.memory_space<smem>>) -> (i32, i32) {
    %c0_i32 = arith.constant 0 : i32
    %c0_i32_0 = arith.constant 0 : i32
    %c0_i32_1 = arith.constant 0 : i32
    return %c0_i32, %c0_i32_0 : i32, i32
  }
  func.func @transform_4(%arg0: i32, %arg1: memref<2xi32, #tpu.memory_space<smem>>) -> (i32, i32) {
    %c0_i32 = arith.constant 0 : i32
    %c0_i32_0 = arith.constant 0 : i32
    %c0_i32_1 = arith.constant 0 : i32
    return %c0_i32, %c0_i32_0 : i32, i32
  }
  func.func @transform_5(%arg0: i32, %arg1: memref<2xi32, #tpu.memory_space<smem>>) -> (i32, i32, i32, i32) {
    %c0_i32 = arith.constant 0 : i32
    %c0_i32_0 = arith.constant 0 : i32
    %c0_i32_1 = arith.constant 0 : i32
    %c0_i32_2 = arith.constant 0 : i32
    return %arg0, %c0_i32, %c0_i32_0, %c0_i32_1 : i32, i32, i32, i32
  }
}

</mosaic_0001>

<bundles_post_ra>
// kernel: tpu_custom_call.1
= control target key start
LH: loop header
LB: loop body
LE: loop exit
PB: predicated region body
PF: predicated region fallthrough
CT: control target
= control target key end

     0   :  { %s11858_s0 = inlined_call_operand.vmem [shape: s32[2], index: 0, kind: input, shape index: {}]   ;;  %s11859_s1 = inlined_call_operand.hbm [shape: f32[2,4,16,16], index: 1, kind: input, shape index: {}]   ;;  %s11860_s2 = inlined_call_operand.vmem [shape: f32[8,36], index: 2, kind: input, shape index: {}]   ;;  %s11861_s3 = inlined_call_operand.vmem [shape: f32[8,1], index: 3, kind: input, shape index: {}]   ;;  %s11862_s4 = inlined_call_operand.vmem [shape: f32[8,72], index: 4, kind: input, shape index: {}]   ;;  %s11863_s5 = inlined_call_operand.vmem [shape: f32[8,1], index: 5, kind: input, shape index: {}]   ;;  %s11864_s6 = inlined_call_operand.hbm [shape: f32[2,8,16,16], index: 6, kind: output, shape index: {}]  }
   0x1   :  { %s11_s23 = sshll.u32 %s11858_s0, 4  ;;  %s12_s23 = int_to_ptr.vmem [resolvable:$true] %s11_s23 }
   0x2   :  { %s7659_s24 = scalar_lea.vmem %s12_s23, 16  ;;  %p7664_p1 = scmp.lt.s32.totalorder %s12_s23, %s12_s23 }
   0x3   :  { %p7660_p0 = scmp.ne.s32.totalorder %s12_s23, %s7659_s24  ;;  %p7665_p2 = scmp.lt.s32.totalorder %s7659_s24, %s7659_s24 }
   0x5   :  { %p7666_p3 = por %p7665_p2, %p7664_p1 }
   0x7   :  { %p7667_p4 = pnand %p7666_p3, %p7660_p0 }
   0x9   :  { %7670 = shalt.err (!%p7667_p4)  }
   0xa   :  { %s7771_s25 = smov [#allocation7]  }
   0xb   :  { %14 = dma.vmem_to_smem %s12_s23, 16, %s7771_s25, [#allocation6] }
   0xc   :  { %7745 = dma.done.wait [#allocation6], 16 }
   0xd   :  { %7746 = vsyncadd [#allocation6], 4294967280 }
   0xe   :  { %16 = sfence }
   0xf   :  { %17 = vsyncpa [#allocation9], 0 }
  0x10   :  { %19 = vsyncpa [#allocation9 + $0x1], 0 }
  0x11   :  { %20 = vsyncpa [#allocation10], 0 }
  0x12   :  { %22 = vsyncpa [#allocation10 + $0x1], 0  ;;  %s7830_s26 = smov 0   ;;  %s7832_s0 = smov 0  }
  0x13   :  { %s7834_s27 = smov 0   ;;  %s7836_s28 = smov 0  }
  0x14 LB: > { %s7851_s29 = sadd.s32 4294967295, %s7769_s28   ;;  %s7189_s30 = sadd.s32 4294967294, %s7769_s28   ;;  %s7769_s28 = sphi %s7836_s28, %s12261_s28   ;;  %s7765_s27 = sphi %s7834_s27, %s12260_s27   ;;  %s7761_s0 = sphi %s7832_s0, %s12259_s0   ;;  %s7757_s26 = sphi %s7830_s26, %s12258_s26  }
  0x15   : > { %s7855_s7 = sadd.s32 1, %s7769_s28   ;;  %s35_s8 = sadd.s32 1, %s7765_s27 }
  0x16   : > { %s32_s9 = ssub.s32 %s7769_s28, %s7855_s7  ;;  %p42_p5 = scmp.ne.s32.totalorder %s7765_s27, %s7761_s0 }
  0x17   : > { %p33_p6 = scmp.eq.s32.totalorder %s32_s9, 0  ;;  %p43_p7 = scmp.eq.s32.totalorder %s7769_s28, 0 }
  0x18   : > { %p48_p8 = scmp.ne.s32.totalorder %s7761_s0, %s7757_s26  ;;  %p49_p9 = scmp.eq.s32.totalorder %s7851_s29, 0 }
  0x19   : > { %s7867_s10 = scalar_select %p33_p6, %s7765_s27, %s35_s8  }
  0x1a   : > { %p7869_p10 = por %p43_p7, %p42_p5  ;;  %p7873_p11 = por %p49_p9, %p48_p8 }
  0x1b   : > { %p156_p12 = scmp.eq.s32.totalorder %s7851_s29, 1  ;;  %p162_p13 = scmp.eq.s32.totalorder %s7189_s30, 1 }
  0x1c   : > { %p7245_p1 = scmp.lt.s32.totalorder %s7769_s28, 2  ;;  %s194_s15 = sand.u32 1, %s7765_s27  }
  0x1d   : > { %p7880_p2 = por %p156_p12, %p42_p5  ;;  %p7884_p3 = por %p162_p13, %p48_p8 }
  0x1e   : > { %s7207_s16 = sshll.u32 %s7769_s28, 10  ;;  %s7192_s17 = sshll.u32 %s194_s15, 6 }
  0x1f   : > { %s11994_s13 = scalar_select %p7880_p2, 1, 0 }
  0x20   : > { %s11995_s14 = scalar_select %p7884_p3, 1, 0 }
  0x21   : > { %s7893_s20 = scalar_lea.hbm %s11859_s1, %s7207_s16  ;;  %s198_s21 = scalar_lea.vmem [#allocation8], %s7192_s17 }
  0x22   : > { %s205_s22 = sshll.u32 %s198_s21, 4  ;;  %p7897_p4 = pnand %p7245_p1, %p7869_p10  ;;  %s7901_s22 = int_to_ptr.vmem [resolvable:$true] %s205_s22 }
  0x23   : > { %s7903_s24 = scalar_lea.sflag [#allocation9], %s194_s15  ;;  %s7671_s25 = scalar_lea.hbm %s7893_s20, 1024 }
  0x24   : > { %p7672_p5 = scmp.ne.s32.totalorder %s7893_s20, %s7671_s25  ;;  %p7673_p6 = pneg %p7897_p4 }
  0x25   : > { %s7676_s9 = scalar_lea.hbm %s11859_s1, 2048  ;;  %p7677_p9 = scmp.lt.u32.totalorder %s7893_s20, %s11859_s1 }
  0x26   : > { %p7674_p7 = pnand %p7673_p6, %p7672_p5  ;;  %p7678_p10 = scmp.lt.u32.totalorder %s7676_s9, %s7671_s25 }
  0x27   : > { %p7680_p13 = scmp.lt.u32.totalorder %s7671_s25, %s7893_s20 }
  0x28   : > { %p7675_p8 = pneg %p7674_p7  ;;  %p7679_p12 = por %p7678_p10, %p7677_p9 }
  0x2a   : > { %p7681_p1 = por %p7680_p13, %p7679_p12 }
  0x2c   : > { %p7682_p0 = pnand %p7681_p1, %p7675_p8 }
  0x2e   : > { %7685 = shalt.err (!%p7682_p0)
}
  0x2f   : > { %s7686_s15 = scalar_lea.vmem %s7901_s22, 1024  ;;  %s7772_s17 = smov [#allocation8]  }
  0x30   : > { %p7687_p5 = scmp.ne.s32.totalorder %s7901_s22, %s7686_s15  ;;  %s7691_s18 = sshll.u32 %s7772_s17, 4  ;;  %s7692_s18 = int_to_ptr.vmem [resolvable:$false] %s7691_s18 }
  0x31   : > { %s7693_s19 = scalar_lea.vmem %s7692_s18, 2048  ;;  %p7694_p2 = scmp.lt.s32.totalorder %s7901_s22, %s7692_s18 }
  0x32   : > { %p7689_p7 = pnand %p7687_p5, %p7673_p6  ;;  %p7695_p9 = scmp.lt.s32.totalorder %s7693_s19, %s7686_s15 }
  0x34   : > { %p7690_p3 = pneg %p7689_p7  ;;  %p7696_p10 = por %p7695_p9, %p7694_p2 }
  0x36   : > { %p7697_p12 = pnand %p7696_p10, %p7690_p3 }
  0x38   : > { %7700 = shalt.err (!%p7697_p12)
}
  0x39   : > { %s7773_s21 = smov 128   ;;  %s7774_s25 = smov 8  }
  0x3a   : > { %7240 = dma.hbm_to_vmem [thread:$0]  (!%p7897_p4), %s7893_s20, 1024, %s7901_s22, %s7903_s24, %s7773_s21, %s7773_s21, %s7774_s25  }
  0x3b   : > { %p7195_p0 = scmp.ge.s32.totalorder %s7769_s28, 1  ;;  %p213_p6 = scmp.lt.s32.totalorder %s7769_s28, 3 }
  0x3d   : > { %p214_p8 = pnand %p7195_p0, %p213_p6 }
  0x3f   : > { %217 = sbr.rel (%p214_p8) target bundleno = 2032 (0x7f0), region = 40 }
  0x46   : > { %s7934_s30 = sand.u32 1, %s7761_s0  }
  0x47   : > { %s7196_s8 = sshll.u32 %s7934_s30, 6  ;;  %s220_s9 = scalar_lea.sflag [#allocation9], %s7934_s30 }
  0x48   : > { %s7938_s11 = scalar_lea.vmem [#allocation8], %s7196_s8 }
  0x49   : > { %7748 = dma.done.wait (%p7873_p11), %s220_s9, 1024  }
  0x4a   : > { %7750 = vsyncadd (%p7873_p11), %s220_s9, 4294966272  ;;  %vm263_vm0 = vcmask 146432   ;;  %vm266_vm1 = vcmask 140288   ;;  %v11867_v0 = vmov 0.0   ;;  %v257_v1 = vld [vmem:[%s7938_s11 + $0x10] sm:$0xff]  ;;  %v255_v2 = vld [vmem:[%s7938_s11] sm:$0xff]  ;;  %v11866_v15 = vlaneseq }
  0x4b   : > { %268 = vst.msk [vmem:[#allocation2 + $0x18] sm:$0xff] %vm263_vm0, %v11867_v0  ;;  %269 = vst.msk [vmem:[#allocation2 + $0x20] sm:$0xff] %vm263_vm0, %v11867_v0  ;;  %2577 = vmatprep.mubr.f32.mxu0 %v11867_v0  ;;  %6743 = vmatprep.mubr.f32.mxu1 %v11867_v0  ;;  %s7776_s12 = smov 1   ;;  %v258_v3 = vld [vmem:[%s7938_s11 + $0x18] sm:$0xff]  ;;  %v256_v4 = vld [vmem:[%s7938_s11 + $0x8] sm:$0xff]  ;;  %vm309_vm2 = vcmask 138248  }
  0x4c   : > { %264 = vst.msk [vmem:[#allocation2] sm:$0xff] %vm263_vm0, %v11867_v0  ;;  %265 = vst.msk [vmem:[#allocation2 + $0x8] sm:$0xff] %vm263_vm0, %v11867_v0  ;;  %289 = vrot.lane.b32.xlu1 %v257_v1, %s7776_s12  ;;  %285 = vrot.lane.b32.xlu0 %v255_v2, %s7776_s12  ;;  %v260_v5 = vld [vmem:[%s7938_s11 + $0x28] sm:$0xff]  ;;  %v259_v6 = vld [vmem:[%s7938_s11 + $0x20] sm:$0xff]  ;;  %v7777_v16 = vmov 1983009808  }
  0x4d   : > { %271 = vst.msk [vmem:[#allocation2 + $0x30] sm:$0xff] %vm263_vm0, %v11867_v0  ;;  %272 = vst.msk [vmem:[#allocation2 + $0x38] sm:$0xff] %vm263_vm0, %v11867_v0  ;;  %v262_v7 = vld [vmem:[%s7938_s11 + $0x38] sm:$0xff]  ;;  %v261_v8 = vld [vmem:[%s7938_s11 + $0x30] sm:$0xff]  ;;  %v329_v17 = vunpack.c.l.s4 %v7777_v16  ;;  %s7778_s20 = smov 127   ;;  %v8045_v23 = vshrl.u32 %v11866_v15, 7 }
  0x4e   : > { %274 = vst.msk [vmem:[#allocation2 + $0x48] sm:$0xff] %vm263_vm0, %v11867_v0  ;;  %275 = vst.msk [vmem:[#allocation2 + $0x50] sm:$0xff] %vm263_vm0, %v11867_v0  ;;  %s7779_s22 = smov 126   ;;  %s7781_s23 = smov 32   ;;  %vm518_vm3 = vcmask 130048   ;;  %vm522_vm4 = vcmask 392192  }
  0x4f   : > { %2922 = vst.msk [vmem:[#allocation4] sm:$0xff] %vm263_vm0, %v11867_v0  ;;  %2923 = vst.msk [vmem:[#allocation4 + $0x8] sm:$0xff] %vm263_vm0, %v11867_v0  ;;  %v330_v22 = vunpack.c.0.s8 %v329_v17  ;;  %s7782_s24 = smov 64   ;;  %s7783_s16 = smov 16   ;;  %vm520_vm5 = vcmask 261120   ;;  %vm524_vm6 = vcmask 523264  }
  0x50   : > { %2925 = vst.msk [vmem:[#allocation4 + $0x18] sm:$0xff] %vm263_vm0, %v11867_v0  ;;  %2926 = vst.msk [vmem:[#allocation4 + $0x20] sm:$0xff] %vm263_vm0, %v11867_v0  ;;  %291 = vrot.lane.b32.xlu1 %v258_v3, %s7776_s12  ;;  %287 = vrot.lane.b32.xlu0 %v256_v4, %s7776_s12  ;;  %s7784_s15 = smov 48   ;;  %s7785_s17 = smov 80   ;;  %vm526_vm7 = vcmask 654336   ;;  %vm528_vm8 = vcmask 785408  }
  0x51   : > { %2928 = vst.msk [vmem:[#allocation4 + $0x30] sm:$0xff] %vm263_vm0, %v11867_v0  ;;  %2929 = vst.msk [vmem:[#allocation4 + $0x38] sm:$0xff] %vm263_vm0, %v11867_v0  ;;  %v8058_v32 = vsub.s32 %v330_v22, %v8045_v23  ;;  %s7786_s18 = smov 96   ;;  %s7787_s19 = smov 112   ;;  %vm530_vm9 = vcmask 916480   ;;  %vm2506_vm10 = vcmask 1043456  }
  0x52   : > { %2931 = vst.msk [vmem:[#allocation4 + $0x48] sm:$0xff] %vm263_vm0, %v11867_v0  ;;  %2932 = vst.msk [vmem:[#allocation4 + $0x50] sm:$0xff] %vm263_vm0, %v11867_v0  ;;  %vm2502_vm11 = vcmask 293888   ;;  %s250_s11 = sld [smem:[#allocation7 + %s7851_s29]]  ;;  %vm6675_vm13 = vcmask 588800   ;;  %p12255_p2 = scmp.ne.s32.totalorder %s11994_s13, 0 }
  0x53   : > { %2934 = vst.msk [vmem:[#allocation4 + $0x60] sm:$0xff] %vm263_vm0, %v11867_v0  ;;  %2935 = vst.msk [vmem:[#allocation4 + $0x68] sm:$0xff] %vm263_vm0, %v11867_v0  ;;  %s7789_s8 = smov [#allocation11]  }
  0x54   : > { %2937 = vst.msk [vmem:[#allocation4 + $0x78] sm:$0xff] %vm263_vm0, %v11867_v0  ;;  %2938 = vst.msk [vmem:[#allocation4 + $0x80] sm:$0xff] %vm263_vm0, %v11867_v0  ;;  %295 = vrot.lane.b32.xlu1 %v260_v5, %s7776_s12  ;;  %293 = vrot.lane.b32.xlu0 %v259_v6, %s7776_s12  ;;  %s7705_s9 = sshll.u32 %s7789_s8, 4  ;;  %s7706_s9 = int_to_ptr.vmem [resolvable:$false] %s7705_s9 }
  0x55   : > { %2940 = vst.msk [vmem:[#allocation4 + $0x90] sm:$0xff] %vm263_vm0, %v11867_v0  ;;  %2941 = vst.msk [vmem:[#allocation4 + $0x98] sm:$0xff] %vm263_vm0, %v11867_v0 }
  0x56   : > { %2943 = vst.msk [vmem:[#allocation4 + $0xa8] sm:$0xff] %vm263_vm0, %v11867_v0  ;;  %2944 = vst.msk [vmem:[#allocation4 + $0xb0] sm:$0xff] %vm263_vm0, %v11867_v0 }
  0x57   : > { %270 = vst.msk [vmem:[#allocation2 + $0x28] sm:$0x3] %vm266_vm1, %v11867_v0  ;;  %267 = vst.msk [vmem:[#allocation2 + $0x10] sm:$0x3] %vm266_vm1, %v11867_v0 }
  0x58   : > { %273 = vst.msk [vmem:[#allocation2 + $0x40] sm:$0x3] %vm266_vm1, %v11867_v0  ;;  %276 = vst.msk [vmem:[#allocation2 + $0x58] sm:$0x3] %vm266_vm1, %v11867_v0  ;;  %299 = vrot.lane.b32.xlu1 %v262_v7, %s7776_s12  ;;  %297 = vrot.lane.b32.xlu0 %v261_v8, %s7776_s12 }
  0x59   : > { %2924 = vst.msk [vmem:[#allocation4 + $0x10] sm:$0x3] %vm266_vm1, %v11867_v0  ;;  %2927 = vst.msk [vmem:[#allocation4 + $0x28] sm:$0x3] %vm266_vm1, %v11867_v0 }
  0x5a   : > { %2930 = vst.msk [vmem:[#allocation4 + $0x40] sm:$0x3] %vm266_vm1, %v11867_v0  ;;  %2933 = vst.msk [vmem:[#allocation4 + $0x58] sm:$0x3] %vm266_vm1, %v11867_v0 }
  0x5b   : > { %2936 = vst.msk [vmem:[#allocation4 + $0x70] sm:$0x3] %vm266_vm1, %v11867_v0  ;;  %2939 = vst.msk [vmem:[#allocation4 + $0x88] sm:$0x3] %vm266_vm1, %v11867_v0 }
  0x5c   : > { %2942 = vst.msk [vmem:[#allocation4 + $0xa0] sm:$0x3] %vm266_vm1, %v11867_v0  ;;  %2945 = vst.msk [vmem:[#allocation4 + $0xb8] sm:$0x3] %vm266_vm1, %v11867_v0 }
  0xbe   : > { %v290_v9 = vpop.permute.xlu1 %289  ;;  %v286_v10 = vpop.permute.xlu0 %285 }
  0xbf   : > { %312 = vst.msk [vmem:[#allocation2 + $0x19] sm:$0xff] %vm309_vm2, %v290_v9  ;;  %310 = vst.msk [vmem:[#allocation2 + $0x1] sm:$0xff] %vm309_vm2, %v286_v10 }
  0xc2   : > { %v292_v11 = vpop.permute.xlu1 %291  ;;  %v288_v12 = vpop.permute.xlu0 %287 }
  0xc3   : > { %313 = vst.msk [vmem:[#allocation2 + $0x21] sm:$0xff] %vm309_vm2, %v292_v11  ;;  %311 = vst.msk [vmem:[#allocation2 + $0x9] sm:$0xff] %vm309_vm2, %v288_v12 }
  0xc6   : > { %v296_v13 = vpop.permute.xlu1 %295  ;;  %v294_v14 = vpop.permute.xlu0 %293  ;;  %v541_v24 = vld [vmem:[#allocation2] sm:$0xff]  ;;  %v543_v35 = vld [vmem:[#allocation2 + $0x18] sm:$0xff] }
  0xc7   : > { %315 = vst.msk [vmem:[#allocation2 + $0x39] sm:$0xff] %vm309_vm2, %v296_v13  ;;  %314 = vst.msk [vmem:[#allocation2 + $0x31] sm:$0xff] %vm309_vm2, %v294_v14 }
  0xca   : > { %v300_v18 = vpop.permute.xlu1 %299  ;;  %v298_v19 = vpop.permute.xlu0 %297  ;;  %v544_v20 = vld [vmem:[#allocation2 + $0x20] sm:$0xff]  ;;  %v542_v21 = vld [vmem:[#allocation2 + $0x8] sm:$0xff] }
  0xcb   : > { %317 = vst.msk [vmem:[#allocation2 + $0x51] sm:$0xff] %vm309_vm2, %v300_v18  ;;  %316 = vst.msk [vmem:[#allocation2 + $0x49] sm:$0xff] %vm309_vm2, %v298_v19  ;;  %563 = vrot.lane.b32.xlu1 %v544_v20, %s7778_s20  ;;  %559 = vrot.lane.b32.xlu0 %v542_v21, %s7778_s20  ;;  %v8047_v25 = vld [vmem:[#allocation2 + $0x9] sm:$0xff]  ;;  %v8065_v39 = vld [vmem:[#allocation2 + $0x21] sm:$0xff] }
  0xcc   : > { %v1984_v3 = vld [vmem:[#allocation2 + $0xa] sm:$0xff]  ;;  %v1986_v4 = vld [vmem:[#allocation2 + $0x22] sm:$0xff]  ;;  %v8130_v6 = vld [vmem:[#allocation2 + $0x1a] sm:$0xff] }
  0xcd   : > { %v8128_v5 = vld [vmem:[#allocation2 + $0x2] sm:$0xff] }
  0xce   : > { %v546_v26 = vld [vmem:[#allocation2 + $0x38] sm:$0xff]  ;;  %v8049_v27 = vld [vmem:[#allocation2 + $0x30] sm:$0xff] }
  0xcf   : > { %v8051_v28 = vld [vmem:[#allocation2 + $0x39] sm:$0xff]  ;;  %567 = vrot.lane.b32.xlu0 %v546_v26, %s7778_s20  ;;  %v326_v29 = vcombine.low %v541_v24, %v8049_v27  ;;  %v394_v30 = vcombine.low %v542_v21, %v546_v26  ;;  %v395_v33 = vcombine.high %v542_v21, %v546_v26  ;;  %v327_v34 = vcombine.high %v541_v24, %v8049_v27 }
  0xd0   : > { %v1120_v31 = vcombine.high %v8047_v25, %v8051_v28  ;;  %v8110_v59 = vld [vmem:[#allocation2 + $0x3a] sm:$0xff]  ;;  %v8114_v61 = vld [vmem:[#allocation2 + $0x32] sm:$0xff] }
  0xd1   : > { %v8068_v42 = vrot.slane %v326_v29, %v8058_v32  ;;  %v8076_v46 = vrot.slane %v394_v30, %v8058_v32  ;;  %v8098_v54 = vrot.slane %v395_v33, %v8058_v32  ;;  %v8123_v1 = vrot.slane %v327_v34, %v8058_v32  ;;  %v1517_v33 = vld [vmem:[#allocation2 + $0x31] sm:$0xff]  ;;  %v1515_v34 = vld [vmem:[#allocation2 + $0x19] sm:$0xff] }
  0xd2   : > { %v548_v36 = vld [vmem:[#allocation2 + $0x50] sm:$0xff]  ;;  %v547_v37 = vld [vmem:[#allocation2 + $0x48] sm:$0xff]  ;;  %v8082_v49 = vrot.slane %v1120_v31, %v8058_v32  ;;  %v1843_v8 = vcombine.low %v1984_v3, %v8110_v59  ;;  %v1775_v10 = vcombine.low %v8128_v5, %v8114_v61  ;;  %v1844_v22 = vcombine.high %v1984_v3, %v8110_v59 }
  0xd3   : > { %v8061_v38 = vld [vmem:[#allocation2 + $0x51] sm:$0xff]  ;;  %557 = vrot.lane.b32.xlu0 %v541_v24, %s7778_s20  ;;  %571 = vrot.lane.b32.xlu1 %v548_v36, %s7778_s20  ;;  %v342_v40 = vcombine.low %v543_v35, %v547_v37  ;;  %v410_v41 = vcombine.low %v544_v20, %v548_v36  ;;  %v411_v44 = vcombine.high %v544_v20, %v548_v36  ;;  %v1513_v31 = vld [vmem:[#allocation2 + $0x1] sm:$0xff] }
  0xd4   : > { %v1136_v43 = vcombine.high %v8065_v39, %v8061_v38  ;;  %v343_v48 = vcombine.high %v543_v35, %v547_v37  ;;  %v8112_v60 = vld [vmem:[#allocation2 + $0x52] sm:$0xff]  ;;  %v8120_v63 = vld [vmem:[#allocation2 + $0x4a] sm:$0xff]  ;;  %v8143_v12 = vrot.slane %v1843_v8, %v8058_v32  ;;  %v8149_v14 = vrot.slane %v1775_v10, %v8058_v32 }
  0xd5   : > { %v8073_v45 = vrot.slane %v342_v40, %v8058_v32  ;;  %v8079_v47 = vrot.slane %v410_v41, %v8058_v32  ;;  %v8088_v51 = vrot.slane %v411_v44, %v8058_v32  ;;  %v1859_v9 = vcombine.low %v1986_v4, %v8112_v60 }
  0xd6   : > { %v8085_v50 = vrot.slane %v1136_v43, %v8058_v32  ;;  %v8126_v2 = vrot.slane %v343_v48, %v8058_v32  ;;  %v1791_v11 = vcombine.low %v8130_v6, %v8120_v63  ;;  %11997 = vst [vmem:[#allocation15_spill] sm:$0xff] %v8149_v14  ;;  %v1051_v41 = vcombine.low %v1513_v31, %v1517_v33 }
  0xd7   : > { %565 = vrot.lane.b32.xlu0 %v8049_v27, %s7778_s20  ;;  %561 = vrot.lane.b32.xlu1 %v543_v35, %s7778_s20  ;;  %v359_v52 = vcombine.high %v8068_v42, %v8073_v45  ;;  %v427_v53 = vcombine.high %v8076_v46, %v8079_v47  ;;  %v442_v56 = vcombine.low %v8098_v54, %v8088_v51 }
  0xd8   : > { %v1167_v55 = vcombine.low %v8082_v49, %v8085_v50  ;;  %v426_v57 = vcombine.low %v8076_v46, %v8079_v47  ;;  %v358_v58 = vcombine.low %v8068_v42, %v8073_v45  ;;  %v1168_v62 = vcombine.high %v8082_v49, %v8085_v50 }
  0xd9   : > { %v374_v7 = vcombine.low %v8123_v1, %v8126_v2  ;;  %v8146_v13 = vrot.slane %v1859_v9, %v8058_v32  ;;  %v8152_v16 = vrot.slane %v1791_v11, %v8058_v32  ;;  %v443_v17 = vcombine.high %v8098_v54, %v8088_v51 }
  0xda   : > { %v375_v19 = vcombine.high %v8123_v1, %v8126_v2  ;;  %v1135_v48 = vcombine.low %v8065_v39, %v8061_v38 }
  0xdb   : > { %813 = vrot.lane.b32.xlu0 %v542_v21, %s7779_s22  ;;  %569 = vrot.lane.b32.xlu1 %v547_v37, %s7778_s20  ;;  %11998 = vst [vmem:[#allocation16_spill] sm:$0xff] %v8152_v16  ;;  %v1875_v18 = vcombine.low %v8143_v12, %v8146_v13 }
  0xdc   : > { %v1143_v9 = vrot.slane %v1135_v48, %v8058_v32 }
  0xdf   : > { %821 = vrot.lane.b32.xlu0 %v546_v26, %s7779_s22  ;;  %817 = vrot.lane.b32.xlu1 %v544_v20, %s7779_s22  ;;  %v1876_v20 = vcombine.high %v8143_v12, %v8146_v13  ;;  %v8173_v26 = vrot.slane %v1844_v22, %v8058_v32 }
  0xe1   : > { %11999 = vst [vmem:[#allocation17_spill] sm:$0xff] %v8173_v26 }
  0xe3   : > { %811 = vrot.lane.b32.xlu0 %v541_v24, %s7779_s22  ;;  %825 = vrot.lane.b32.xlu1 %v548_v36, %s7779_s22  ;;  %v1860_v24 = vcombine.high %v1986_v4, %v8112_v60  ;;  %v7780_v36 = vmov 1934713408  }
  0xe5   : > { %v8176_v29 = vrot.slane %v1860_v24, %v8058_v32 }
  0xe7   : > { %819 = vrot.lane.b32.xlu0 %v8049_v27, %s7779_s22  ;;  %815 = vrot.lane.b32.xlu1 %v543_v35, %s7779_s22  ;;  %12000 = vst [vmem:[#allocation18_spill] sm:$0xff] %v8176_v29  ;;  %v1519_v35 = vld [vmem:[#allocation2 + $0x49] sm:$0xff] }
  0xe8   : > { %v1067_v40 = vcombine.low %v1515_v34, %v1519_v35  ;;  %v1068_v10 = vcombine.high %v1515_v34, %v1519_v35 }
  0xea   : > { %v1075_v44 = vrot.slane %v1067_v40, %v8058_v32 }
  0xeb   : > { %1531 = vrot.lane.b32.xlu0 %v8047_v25, %s7779_s22  ;;  %823 = vrot.lane.b32.xlu1 %v547_v37, %s7779_s22  ;;  %v361_v37 = vunpack.c.l.s4 %v7780_v36 }
  0xed   : > { %v362_v43 = vunpack.c.0.s8 %v361_v37 }
  0xef   : > { %1539 = vrot.lane.b32.xlu0 %v8051_v28, %s7779_s22  ;;  %1535 = vrot.lane.b32.xlu1 %v8065_v39, %s7779_s22 }
  0xf3   : > { %2001 = vrot.lane.b32.xlu0 %v1984_v3, %s7778_s20  ;;  %1543 = vrot.lane.b32.xlu1 %v8061_v38, %s7779_s22 }
  0xf7   : > { %2009 = vrot.lane.b32.xlu0 %v8110_v59, %s7778_s20  ;;  %2005 = vrot.lane.b32.xlu1 %v1986_v4, %s7778_s20 }
  0xfb   : > { %1529 = vrot.lane.b32.xlu0 %v1513_v31, %s7779_s22  ;;  %2013 = vrot.lane.b32.xlu1 %v8112_v60, %s7778_s20 }
  0xff   : > { %1537 = vrot.lane.b32.xlu0 %v1517_v33, %s7779_s22  ;;  %1533 = vrot.lane.b32.xlu1 %v1515_v34, %s7779_s22 }
 0x103   : > { %1999 = vrot.lane.b32.xlu0 %v8128_v5, %s7778_s20  ;;  %1541 = vrot.lane.b32.xlu1 %v1519_v35, %s7779_s22 }
 0x107   : > { %2007 = vrot.lane.b32.xlu0 %v8114_v61, %s7778_s20  ;;  %2003 = vrot.lane.b32.xlu1 %v8130_v6, %s7778_s20 }
 0x10b   : > { %1283 = vrot.lane.b32.xlu0 %v8047_v25, %s7778_s20  ;;  %2011 = vrot.lane.b32.xlu1 %v8120_v63, %s7778_s20 }
 0x10f   : > { %1291 = vrot.lane.b32.xlu0 %v8051_v28, %s7778_s20  ;;  %1287 = vrot.lane.b32.xlu1 %v8065_v39, %s7778_s20  ;;  %v1052_v39 = vcombine.high %v1513_v31, %v1517_v33 }
 0x113   : > { %1281 = vrot.lane.b32.xlu0 %v1513_v31, %s7778_s20  ;;  %1295 = vrot.lane.b32.xlu1 %v8061_v38, %s7778_s20 }
 0x117   : > { %1289 = vrot.lane.b32.xlu0 %v1517_v33, %s7778_s20  ;;  %1285 = vrot.lane.b32.xlu1 %v1515_v34, %s7778_s20 }
 0x11b   : > { %2255 = vrot.lane.b32.xlu0 %v1984_v3, %s7779_s22  ;;  %1293 = vrot.lane.b32.xlu1 %v1519_v35, %s7778_s20  ;;  %v1059_v3 = vrot.slane %v1051_v41, %v8058_v32 }
 0x11d   : > { %v1084_v8 = vcombine.high %v1059_v3, %v1075_v44  ;;  %v1083_v11 = vcombine.low %v1059_v3, %v1075_v44 }
 0x11f   : > { %2263 = vrot.lane.b32.xlu0 %v8110_v59, %s7779_s22  ;;  %2259 = vrot.lane.b32.xlu1 %v1986_v4, %s7779_s22  ;;  %v1119_v59 = vcombine.low %v8047_v25, %v8051_v28  ;;  %v8233_v4 = vsub.s32 %v362_v43, %v8045_v23  ;;  %v8243_v25 = vrot.slane %v1068_v10, %v8058_v32 }
 0x120   : > { %v8249_v23 = vrot.slane %v1052_v39, %v8058_v32 }
 0x121   : > { %v1127_v38 = vrot.slane %v1119_v59, %v8058_v32  ;;  %v8266_v24 = vrot.slane %v1083_v11, %v8233_v4  ;;  %v8297_v46 = vrot.slane %v358_v58, %v8233_v4  ;;  %v1182_v10 = vrot.slane %v1168_v62, %v8233_v4 }
 0x122   : > { %v1100_v39 = vcombine.high %v8249_v23, %v8243_v25  ;;  %v1807_v62 = vcombine.low %v8149_v14, %v8152_v16 }
 0x123   : > { %2253 = vrot.lane.b32.xlu0 %v8128_v5, %s7779_s22  ;;  %2267 = vrot.lane.b32.xlu1 %v8112_v60, %s7779_s22  ;;  %v1098_v60 = vrot.slane %v1084_v8, %v8233_v4  ;;  %v1152_v5 = vcombine.high %v1127_v38, %v1143_v9  ;;  %v1115_v31 = vcombine.high %v8266_v24, %v11867_v0 }
 0x124   : > { %v1151_v33 = vcombine.low %v1127_v38, %v1143_v9  ;;  %12002 = vst [vmem:[#allocation20_spill] sm:$0xff] %v8297_v46  ;;  %v382_v38 = vrot.slane %v374_v7, %v8233_v4  ;;  %v1114_v50 = vrot.slane %v1100_v39, %v8233_v4  ;;  %v1186_v7 = vcombine.high %v1182_v10, %v11867_v0 }
 0x125   : > { %v1166_v28 = vrot.slane %v1152_v5, %v8233_v4  ;;  %v1116_v58 = vcombine.high %v1098_v60, %v11867_v0  ;;  %v8372_v11 = vrot.slane %v1807_v62, %v8233_v4 }
 0x126   : > { %v8291_v35 = vrot.slane %v1151_v33, %v8233_v4 }
 0x127   : > { %2261 = vrot.lane.b32.xlu0 %v8114_v61, %s7779_s22  ;;  %2257 = vrot.lane.b32.xlu1 %v8130_v6, %s7779_s22  ;;  %v373_v61 = vrot.slane %v359_v52, %v8233_v4  ;;  %v1099_v6 = vcombine.low %v8249_v23, %v8243_v25  ;;  %v1175_v52 = vrot.slane %v1167_v55, %v8233_v4 }
 0x128   : > { %v450_v55 = vrot.slane %v442_v56, %v8233_v4  ;;  %v1183_v56 = vcombine.high %v8291_v35, %v11867_v0  ;;  %v1184_v45 = vcombine.high %v1166_v28, %v11867_v0  ;;  %12004 = vst [vmem:[#allocation22_spill] sm:$0xff] %v8372_v11 }
 0x129   : > { %v1107_v22 = vrot.slane %v1099_v6, %v8233_v4  ;;  %v391_v43 = vcombine.high %v373_v61, %v11867_v0  ;;  %v1185_v3 = vcombine.high %v1175_v52, %v11867_v0  ;;  %v8369_v6 = vrot.slane %v1875_v18, %v8233_v4 }
 0x12a   : > { %v460_v49 = vcombine.high %v450_v55, %v11867_v0  ;;  %v1839_v18 = vcombine.high %v8372_v11, %v11867_v0 }
 0x12b   : > { %1192 = vrot.lane.b32.xlu0 %v1098_v60, %s7781_s23  ;;  %2265 = vrot.lane.b32.xlu1 %v8120_v63, %s7779_s22  ;;  %v441_v63 = vrot.slane %v427_v53, %v8233_v4  ;;  %v8280_v53 = vrot.slane %v426_v57, %v8233_v4  ;;  %v390_v57 = vcombine.high %v8297_v46, %v11867_v0 }
 0x12c   : > { %v1117_v59 = vcombine.high %v1107_v22, %v11867_v0  ;;  %12003 = vst [vmem:[#allocation21_spill] sm:$0xff] %v8369_v6  ;;  %v1907_v33 = vcombine.high %v8369_v6, %v11867_v0 }
 0x12d   : > { %12001 = vst [vmem:[#allocation19_spill] sm:$0xff] %v8280_v53  ;;  %v458_v34 = vcombine.high %v8280_v53, %v11867_v0  ;;  %v459_v41 = vcombine.high %v441_v63, %v11867_v0 }
 0x12f   : > { %1220 = vrot.lane.b32.xlu1 %v1166_v28, %s7781_s23  ;;  %467 = vrot.lane.b32.xlu0 %v373_v61, %s7781_s23  ;;  %v392_v61 = vcombine.high %v382_v38, %v11867_v0 }
 0x133   : > { %495 = vrot.lane.b32.xlu1 %v441_v63, %s7781_s23  ;;  %1200 = vrot.lane.b32.xlu0 %v1107_v22, %s7782_s24 }
 0x137   : > { %1228 = vrot.lane.b32.xlu1 %v1175_v52, %s7782_s24  ;;  %1188 = vrot.lane.b32.xlu0 %v1115_v31, %s7783_s16 }
 0x13b   : > { %503 = vrot.lane.b32.xlu1 %v450_v55, %s7782_s24  ;;  %491 = vrot.lane.b32.xlu0 %v458_v34, %s7783_s16 }
 0x13d   : > { %v8301_v47 = vpop.permute.xlu0 %559  ;;  %v8309_v36 = vpop.permute.xlu1 %563 }
 0x13f   : > { %1216 = vrot.lane.b32.xlu1 %v1183_v56, %s7783_s16  ;;  %463 = vrot.lane.b32.xlu0 %v390_v57, %s7783_s16 }
 0x141   : > { %v8311_v42 = vpop.permute.xlu0 %567 }
 0x143   : > { %1224 = vrot.lane.b32.xlu1 %v1184_v45, %s7784_s15  ;;  %1196 = vrot.lane.b32.xlu0 %v1116_v58, %s7784_s15  ;;  %v457_v45 = vrot.slane %v443_v17, %v8233_v4  ;;  %v8396_v58 = vrot.slane %v375_v19, %v8233_v4  ;;  %v1118_v17 = vcombine.high %v1114_v50, %v11867_v0 }
 0x145   : > { %v8317_v37 = vpop.permute.xlu1 %571  ;;  %v8319_v40 = vpop.permute.xlu0 %557  ;;  %12005 = vst [vmem:[#allocation23_spill] sm:$0xff] %v8396_v58 }
 0x146   : > { %v665_v51 = vcombine.low %v8309_v36, %v8317_v37 }
 0x147   : > { %499 = vrot.lane.b32.xlu1 %v459_v41, %s7784_s15  ;;  %471 = vrot.lane.b32.xlu0 %v391_v43, %s7784_s15 }
 0x149   : > { %v8325_v44 = vpop.permute.xlu1 %561  ;;  %v8327_v48 = vpop.permute.xlu0 %565 }
 0x14a   : > { %v582_v63 = vcombine.high %v8319_v40, %v8327_v48 }
 0x14b   : > { %1232 = vrot.lane.b32.xlu1 %v1185_v3, %s7785_s17  ;;  %1204 = vrot.lane.b32.xlu0 %v1117_v59, %s7785_s17 }
 0x14c   : > { %v596_v55 = vrot.slane %v582_v63, %v8058_v32 }
 0x14d   : > { %v8333_v8 = vpop.permute.xlu1 %569  ;;  %v8335_v9 = vpop.permute.xlu0 %813 }
 0x14e   : > { %v598_v25 = vcombine.high %v8325_v44, %v8333_v8 }
 0x14f   : > { %1236 = vrot.lane.b32.xlu1 %v1182_v10, %s7786_s18  ;;  %475 = vrot.lane.b32.xlu0 %v382_v38, %s7782_s24  ;;  %v649_v38 = vcombine.low %v8301_v47, %v8311_v42 }
 0x150   : > { %v612_v22 = vrot.slane %v598_v25, %v8058_v32  ;;  %v597_v25 = vcombine.low %v8325_v44, %v8333_v8  ;;  %v666_v44 = vcombine.high %v8309_v36, %v8317_v37 }
 0x151   : > { %v8349_v60 = vpop.permute.xlu1 %817  ;;  %v8351_v5 = vpop.permute.xlu0 %821  ;;  %v8450_v13 = vrot.slane %v649_v38, %v8058_v32 }
 0x152   : > { %v629_v41 = vcombine.low %v596_v55, %v612_v22 }
 0x153   : > { %507 = vrot.lane.b32.xlu1 %v460_v49, %s7785_s17  ;;  %1208 = vrot.lane.b32.xlu0 %v1114_v50, %s7786_s18  ;;  %v8430_v50 = vrot.slane %v1876_v20, %v8233_v4  ;;  %v581_v20 = vcombine.low %v8319_v40, %v8327_v48  ;;  %v461_v40 = vcombine.high %v457_v45, %v11867_v0 }
 0x154   : > { %v8415_v19 = vrot.slane %v629_v41, %v8233_v4  ;;  %v8471_v48 = vrot.slane %v597_v25, %v8058_v32  ;;  %v680_v41 = vrot.slane %v666_v44, %v8058_v32 }
 0x155   : > { %v8362_v23 = vpop.permute.xlu1 %825  ;;  %v812_v28 = vpop.permute.xlu0 %811 }
 0x157   : > { %1240 = vrot.lane.b32.xlu1 %v1186_v7, %s7787_s19  ;;  %479 = vrot.lane.b32.xlu0 %v392_v61, %s7785_s17  ;;  %v8436_v7 = vrot.slane %v665_v51, %v8058_v32  ;;  %v919_v51 = vcombine.low %v8349_v60, %v8362_v23 }
 0x159   : > { %v816_v52 = vpop.permute.xlu1 %815  ;;  %v820_v31 = vpop.permute.xlu0 %819  ;;  %v682_v36 = vcombine.high %v8450_v13, %v8436_v7 }
 0x15a   : > { %v835_v34 = vcombine.low %v812_v28, %v820_v31  ;;  %v836_v39 = vcombine.high %v812_v28, %v820_v31 }
 0x15b   : > { %1940 = vrot.lane.b32.xlu1 %v1907_v33, %s7783_s16  ;;  %1912 = vrot.lane.b32.xlu0 %v1839_v18, %s7783_s16 }
 0x15c   : > { %v8402_v3 = vrot.slane %v835_v34, %v8058_v32  ;;  %v8455_v31 = vrot.slane %v836_v39, %v8058_v32 }
 0x15d   : > { %v824_v56 = vpop.permute.xlu1 %823  ;;  %v8386_v57 = vpop.permute.xlu0 %1531 }
 0x15e   : > { %v851_v43 = vcombine.low %v816_v52, %v824_v56  ;;  %v852_v54 = vcombine.high %v816_v52, %v824_v56  ;;  %v630_v52 = vcombine.high %v596_v55, %v612_v22  ;;  %v650_v56 = vcombine.high %v8301_v47, %v8311_v42 }
 0x15f   : > { %511 = vrot.lane.b32.xlu1 %v457_v45, %s7786_s18  ;;  %483 = vrot.lane.b32.xlu0 %v8396_v58, %s7786_s18  ;;  %v8489_v45 = vrot.slane %v581_v20, %v8058_v32  ;;  %v8502_v47 = vrot.slane %v682_v36, %v8233_v4 }
 0x160   : > { %v8405_v59 = vrot.slane %v851_v43, %v8058_v32  ;;  %v8441_v28 = vrot.slane %v852_v54, %v8058_v32  ;;  %v8478_v55 = vrot.slane %v630_v52, %v8233_v4  ;;  %v664_v39 = vrot.slane %v650_v56, %v8058_v32 }
 0x161   : > { %v8409_v1 = vpop.permute.xlu1 %1535  ;;  %v8411_v2 = vpop.permute.xlu0 %1539 }
 0x162   : > { %v868_v10 = vcombine.high %v8402_v3, %v8405_v59  ;;  %v1622_v49 = vcombine.high %v8386_v57, %v8411_v2  ;;  %v883_v37 = vcombine.low %v8455_v31, %v8441_v28  ;;  %v697_v36 = vcombine.low %v664_v39, %v680_v41 }
 0x163   : > { %1212 = vrot.lane.b32.xlu1 %v1118_v17, %s7787_s19  ;;  %730 = vrot.lane.b32.xlu0 %v8415_v19, %s7782_s24  ;;  %v698_v27 = vcombine.high %v664_v39, %v680_v41  ;;  %v884_v53 = vcombine.high %v8455_v31, %v8441_v28 }
 0x164   : > { %v8433_v62 = vrot.slane %v868_v10, %v8233_v4  ;;  %v8464_v8 = vrot.slane %v1622_v49, %v8058_v32  ;;  %v8505_v42 = vrot.slane %v883_v37, %v8233_v4  ;;  %v614_v10 = vcombine.high %v8489_v45, %v8471_v48 }
 0x165   : > { %v8443_v61 = vpop.permute.xlu1 %1543  ;;  %v8445_v63 = vpop.permute.xlu0 %2001  ;;  %v903_v49 = vcombine.low %v8335_v9, %v8351_v5  ;;  %v8581_v39 = vrot.slane %v698_v27, %v8233_v4  ;;  %v8685_v31 = vrot.slane %v884_v53, %v8233_v4 }
 0x166   : > { %v1638_v12 = vcombine.high %v8409_v1, %v8443_v61 }
 0x167   : > { %1944 = vrot.lane.b32.xlu1 %v8430_v50, %s7781_s23  ;;  %976 = vrot.lane.b32.xlu0 %v8433_v62, %s7781_s23  ;;  %v8536_v56 = vrot.slane %v903_v49, %v8058_v32  ;;  %v904_v49 = vcombine.high %v8335_v9, %v8351_v5  ;;  %v1621_v9 = vcombine.low %v8386_v57, %v8411_v2 }
 0x168   : > { %v8467_v22 = vrot.slane %v1638_v12, %v8058_v32  ;;  %v8524_v12 = vrot.slane %v919_v51, %v8058_v32 }
 0x169   : > { %v8473_v33 = vpop.permute.xlu1 %2005  ;;  %v8475_v18 = vpop.permute.xlu0 %2009  ;;  %v918_v34 = vrot.slane %v904_v49, %v8058_v32  ;;  %v8586_v2 = vrot.slane %v1621_v9, %v8058_v32 }
 0x16a   : > { %12006 = vst [vmem:[#allocation24_spill] sm:$0xff] %v8467_v22  ;;  %v2092_v43 = vcombine.high %v8445_v63, %v8475_v18  ;;  %v936_v15 = vcombine.high %v8536_v56, %v8524_v12  ;;  %v2091_v49 = vcombine.low %v8445_v63, %v8475_v18 }
 0x16b   : > { %515 = vrot.lane.b32.xlu1 %v461_v40, %s7787_s19  ;;  %738 = vrot.lane.b32.xlu0 %v8478_v55, %s7786_s18  ;;  %v8531_v40 = vrot.slane %v614_v10, %v8233_v4  ;;  %v8547_v10 = vrot.slane %v697_v36, %v8233_v4 }
 0x16c   : > { %v8518_v25 = vrot.slane %v2092_v43, %v8058_v32  ;;  %v920_v43 = vcombine.high %v8349_v60, %v8362_v23  ;;  %v1637_v60 = vcombine.low %v8409_v1, %v8443_v61  ;;  %v8563_v36 = vrot.slane %v936_v15, %v8233_v4 }
 0x16d   : > { %v2014_v54 = vpop.permute.xlu1 %2013  ;;  %v8499_v17 = vpop.permute.xlu0 %1529 }
 0x16e   : > { %v2108_v38 = vcombine.high %v8473_v33, %v2014_v54  ;;  %v934_v30 = vrot.slane %v920_v43, %v8058_v32  ;;  %v8571_v43 = vrot.slane %v1637_v60, %v8058_v32  ;;  %v2107_v1 = vcombine.low %v8473_v33, %v2014_v54 }
 0x16f   : > { %750 = vrot.lane.b32.xlu1 %v8502_v47, %s7781_s23  ;;  %984 = vrot.lane.b32.xlu0 %v8505_v42, %s7782_s24 }
 0x170   : > { %v8521_v52 = vrot.slane %v2108_v38, %v8058_v32  ;;  %v951_v5 = vcombine.low %v918_v34, %v934_v30  ;;  %v1654_v27 = vcombine.high %v8586_v2, %v8571_v43  ;;  %v8601_v60 = vrot.slane %v2107_v1, %v8058_v32 }
 0x171   : > { %v8526_v20 = vpop.permute.xlu1 %1533  ;;  %v8528_v44 = vpop.permute.xlu0 %1537  ;;  %v952_v0 = vcombine.high %v918_v34, %v934_v30 }
 0x172   : > { %v8596_v54 = vrot.slane %v951_v5, %v8233_v4  ;;  %v1553_v5 = vcombine.low %v8499_v17, %v8528_v44  ;;  %v8634_v58 = vrot.slane %v1654_v27, %v8233_v4 }
 0x173   : > { %722 = vrot.lane.b32.xlu1 %v8531_v40, %s7781_s23  ;;  %v8650_v27 = vrot.slane %v952_v0, %v8233_v4 }
 0x174   : > { %v8639_v30 = vrot.slane %v1553_v5, %v8058_v32 }
 0x175   : > { %v8542_v51 = vpop.permute.xlu1 %1541  ;;  %v8544_v38 = vpop.permute.xlu0 %1999 }
 0x176   : > { %12007 = vst [vmem:[#allocation25_spill] sm:$0xff] %v8544_v38  ;;  %v1569_v9 = vcombine.low %v8526_v20, %v8542_v51 }
 0x177   : > { %758 = vrot.lane.b32.xlu1 %v8547_v10, %s7782_s24 }
 0x178   : > { %v8624_v11 = vrot.slane %v1569_v9, %v8058_v32  ;;  %v681_v9 = vcombine.low %v8450_v13, %v8436_v7 }
 0x179   : > { %v8558_v23 = vpop.permute.xlu1 %2003  ;;  %v8560_v37 = vpop.permute.xlu0 %2007 }
 0x17a   : > { %v2023_v61 = vcombine.low %v8544_v38, %v8560_v37  ;;  %v8674_v0 = vrot.slane %v681_v9, %v8233_v4 }
 0x17b   : > { %1004 = vrot.lane.b32.xlu1 %v8563_v36, %s7781_s23 }
 0x17c   : > { %v8606_v63 = vrot.slane %v2023_v61, %v8058_v32  ;;  %12008 = vst [vmem:[#allocation26_spill] sm:$0xff] %v8674_v0 }
 0x17d   : > { %v8576_v15 = vpop.permute.xlu1 %2011  ;;  %v8578_v41 = vpop.permute.xlu0 %1283 }
 0x17e   : > { %v2039_v57 = vcombine.low %v8558_v23, %v8576_v15 }
 0x17f   : > { %766 = vrot.lane.b32.xlu1 %v8581_v39, %s7786_s18 }
 0x180   : > { %v8593_v33 = vrot.slane %v2039_v57, %v8058_v32  ;;  %v8613_v57 = vrot.slane %v2091_v49, %v8058_v32 }
 0x181   : > { %v8608_v18 = vpop.permute.xlu1 %1287  ;;  %v8610_v21 = vpop.permute.xlu0 %1291 }
 0x182   : > { %v2056_v1 = vcombine.high %v8606_v63, %v8593_v33  ;;  %v2124_v61 = vcombine.high %v8613_v57, %v8601_v60  ;;  %v1373_v34 = vcombine.low %v8578_v41, %v8610_v21 }
 0x183   : > { %1012 = vrot.lane.b32.xlu1 %v8596_v54, %s7782_s24 }
 0x184   : > { %v8631_v46 = vrot.slane %v2056_v1, %v8233_v4  ;;  %v1586_v1 = vcombine.high %v8639_v30, %v8624_v11  ;;  %v8662_v14 = vrot.slane %v2124_v61, %v8233_v4  ;;  %v8667_v7 = vrot.slane %v1373_v34, %v8058_v32 }
 0x185   : > { %v8626_v6 = vpop.permute.xlu1 %1295  ;;  %v8628_v49 = vpop.permute.xlu0 %1281 }
 0x186   : > { %v1389_v29 = vcombine.low %v8608_v18, %v8626_v6  ;;  %2164 = vrot.lane.b32.xlu0 %v8631_v46, %s7781_s23  ;;  %v8688_v34 = vrot.slane %v1586_v1, %v8233_v4 }
 0x187   : > { %1722 = vrot.lane.b32.xlu1 %v8634_v58, %s7781_s23 }
 0x188   : > { %v8655_v5 = vrot.slane %v1389_v29, %v8058_v32  ;;  %v613_v29 = vcombine.low %v8489_v45, %v8471_v48  ;;  %v1669_v48 = vcombine.low %v8464_v8, %v8467_v22  ;;  %v935_v22 = vcombine.low %v8536_v56, %v8524_v12 }
 0x189   : > { %v8657_v26 = vpop.permute.xlu1 %1285  ;;  %v8659_v16 = vpop.permute.xlu0 %1289  ;;  %v867_v12 = vcombine.low %v8402_v3, %v8405_v59  ;;  %v1653_v3 = vcombine.low %v8586_v2, %v8571_v43  ;;  %v2123_v43 = vcombine.low %v8613_v57, %v8601_v60 }
 0x18a   : > { %1020 = vrot.lane.b32.xlu0 %v8650_v27, %s7786_s18  ;;  %v1406_v13 = vcombine.high %v8667_v7, %v8655_v5  ;;  %v8706_v1 = vrot.slane %v613_v29, %v8233_v4  ;;  %v8722_v29 = vrot.slane %v1669_v48, %v8233_v4  ;;  %v8739_v48 = vrot.slane %v935_v22, %v8233_v4 }
 0x18b   : > { %2192 = vrot.lane.b32.xlu1 %v8662_v14, %s7781_s23  ;;  %v8755_v22 = vrot.slane %v867_v12, %v8233_v4  ;;  %v8770_v12 = vrot.slane %v1653_v3, %v8233_v4 }
 0x18c   : > { %v8703_v38 = vrot.slane %v1406_v13, %v8233_v4  ;;  %12013 = vst [vmem:[#allocation30_spill] sm:$0xff] %v8706_v1  ;;  %12015 = vst [vmem:[#allocation32_spill] sm:$0xff] %v8739_v48 }
 0x18d   : > { %v8680_v61 = vpop.permute.xlu1 %1293  ;;  %v8682_v28 = vpop.permute.xlu0 %2255  ;;  %12016 = vst [vmem:[#allocation33_spill] sm:$0xff] %v8770_v12 }
 0x18e   : > { %12009 = vst [vmem:[#allocation27_spill] sm:$0xff] %v8682_v28  ;;  %992 = vrot.lane.b32.xlu0 %v8685_v31, %s7786_s18  ;;  %v12012_v28 = vmov 0.0  }
 0x18f   : > { %1694 = vrot.lane.b32.xlu1 %v8688_v34, %s7781_s23  ;;  %v713_v53 = vcombine.high %v8674_v0, %v12012_v28  ;;  %v645_v13 = vcombine.high %v8706_v1, %v12012_v28  ;;  %v714_v56 = vcombine.high %v8502_v47, %v12012_v28  ;;  %v646_v59 = vcombine.high %v8531_v40, %v12012_v28 }
 0x190   : > { %v715_v40 = vcombine.high %v8547_v10, %v12012_v28  ;;  %v968_v60 = vcombine.high %v8563_v36, %v12012_v28  ;;  %v1585_v36 = vcombine.low %v8639_v30, %v8624_v11  ;;  %v716_v11 = vcombine.high %v8581_v39, %v12012_v28 }
 0x191   : > { %v8696_v45 = vpop.permute.xlu1 %2259  ;;  %v8698_v9 = vpop.permute.xlu0 %2263 }
 0x192   : > { %12010 = vst [vmem:[#allocation28_spill] sm:$0xff] %v8696_v45  ;;  %12011 = vst [vmem:[#allocation29_spill] sm:$0xff] %v8698_v9  ;;  %746 = vrot.lane.b32.xlu0 %v713_v53, %s7783_s16  ;;  %v2139_v9 = vcombine.low %v8518_v25, %v8521_v52 }
 0x193   : > { %1474 = vrot.lane.b32.xlu1 %v8703_v38, %s7781_s23 }
 0x194   : > { %v8736_v1 = vrot.slane %v2139_v9, %v8233_v4  ;;  %v967_v9 = vcombine.high %v8739_v48, %v12012_v28  ;;  %v899_v48 = vcombine.high %v8755_v22, %v12012_v28 }
 0x195   : > { %v8715_v45 = vpop.permute.xlu1 %2267  ;;  %v8717_v0 = vpop.permute.xlu0 %2253 }
 0x196   : > { %12014 = vst [vmem:[#allocation31_spill] sm:$0xff] %v8715_v45  ;;  %718 = vrot.lane.b32.xlu0 %v645_v13, %s7783_s16 }
 0x197   : > { %1730 = vrot.lane.b32.xlu1 %v8722_v29, %s7782_s24 }
 0x199   : > { %v8731_v53 = vpop.permute.xlu1 %2257  ;;  %v8733_v45 = vpop.permute.xlu0 %2261 }
 0x19a   : > { %754 = vrot.lane.b32.xlu0 %v714_v56, %s7784_s15 }
 0x19b   : > { %2200 = vrot.lane.b32.xlu1 %v8736_v1, %s7782_s24 }
 0x19d   : > { %v8748_v47 = vpop.permute.xlu1 %2265  ;;  %v8750_v13 = vpop.permute.xlu0 %1192 }
 0x19e   : > { %726 = vrot.lane.b32.xlu0 %v646_v59, %s7784_s15  ;;  %v1685_v59 = vcombine.high %v8770_v12, %v12012_v28 }
 0x19f   : > { %1000 = vrot.lane.b32.xlu1 %v967_v9, %s7783_s16  ;;  %v8783_v9 = vrot.slane %v2123_v43, %v8233_v4  ;;  %v900_v43 = vcombine.high %v8433_v62, %v12012_v28  ;;  %v1405_v62 = vcombine.low %v8667_v7, %v8655_v5 }
 0x1a1   : > { %v8763_v2 = vpop.permute.xlu1 %1220  ;;  %v8765_v56 = vpop.permute.xlu0 %467  ;;  %12017 = vst [vmem:[#allocation34_spill] sm:$0xff] %v8783_v9  ;;  %v2155_v12 = vcombine.high %v8783_v9, %v12012_v28 }
 0x1a2   : > { %972 = vrot.lane.b32.xlu0 %v899_v48, %s7783_s16  ;;  %v647_v48 = vcombine.high %v8415_v19, %v12012_v28  ;;  %v2055_v19 = vcombine.low %v8606_v63, %v8593_v33  ;;  %v969_v33 = vcombine.high %v8596_v54, %v12012_v28  ;;  %v8836_v54 = vrot.slane %v1405_v62, %v8233_v4 }
 0x1a3   : > { %762 = vrot.lane.b32.xlu1 %v715_v40, %s7785_s17 }
 0x1a4   : > { %v8823_v63 = vrot.slane %v2055_v19, %v8233_v4  ;;  %v1305_v19 = vcombine.low %v8628_v49, %v8659_v16 }
 0x1a5   : > { %v8776_v57 = vpop.permute.xlu1 %495  ;;  %v8778_v10 = vpop.permute.xlu0 %1200 }
 0x1a6   : > { %1718 = vrot.lane.b32.xlu0 %v1685_v59, %s7783_s16  ;;  %v8810_v59 = vrot.slane %v1585_v36, %v8233_v4  ;;  %12019 = vst [vmem:[#allocation36_spill] sm:$0xff] %v8823_v63  ;;  %v1321_v36 = vcombine.low %v8657_v26, %v8680_v61  ;;  %v8854_v62 = vrot.slane %v1305_v19, %v8058_v32 }
 0x1a7   : > { %1008 = vrot.lane.b32.xlu1 %v968_v60, %s7784_s15 }
 0x1a8   : > { %12018 = vst [vmem:[#allocation35_spill] sm:$0xff] %v8810_v59  ;;  %v1617_v39 = vcombine.high %v8810_v59, %v12012_v28 }
 0x1a9   : > { %v8791_v3 = vpop.permute.xlu1 %1228  ;;  %v8793_v40 = vpop.permute.xlu0 %1188 }
 0x1aa   : > { %734 = vrot.lane.b32.xlu0 %v647_v48, %s7785_s17 }
 0x1ab   : > { %2188 = vrot.lane.b32.xlu1 %v2155_v12, %s7783_s16 }
 0x1ad   : > { %v8805_v30 = vpop.permute.xlu1 %503  ;;  %v8807_v60 = vpop.permute.xlu0 %491 }
 0x1ae   : > { %980 = vrot.lane.b32.xlu0 %v900_v43, %s7784_s15  ;;  %v2087_v43 = vcombine.high %v8823_v63, %v12012_v28 }
 0x1af   : > { %770 = vrot.lane.b32.xlu1 %v716_v11, %s7787_s19  ;;  %v2156_v11 = vcombine.high %v8662_v14, %v12012_v28  ;;  %v1437_v14 = vcombine.high %v8836_v54, %v12012_v28 }
 0x1b1   : > { %v1217_v12 = vpop.permute.xlu1 %1216  ;;  %v8816_v48 = vpop.permute.xlu0 %463 }
 0x1b2   : > { %1690 = vrot.lane.b32.xlu0 %v1617_v39, %s7783_s16  ;;  %v901_v39 = vcombine.high %v8505_v42, %v12012_v28  ;;  %v970_v42 = vcombine.high %v8650_v27, %v12012_v28  ;;  %v1250_v19 = vsel %vm518_vm3, %v8291_v35, %v1217_v12  ;;  %v648_v27 = vcombine.high %v8478_v55, %v12012_v28 }
 0x1b3   : > { %1016 = vrot.lane.b32.xlu1 %v969_v33, %s7785_s17  ;;  %v8845_v33 = vrot.slane %v1321_v36, %v8058_v32 }
 0x1b5   : > { %v1225_v5 = vpop.permute.xlu1 %1224  ;;  %v8829_v7 = vpop.permute.xlu0 %1196  ;;  %v1337_v36 = vcombine.low %v8854_v62, %v8845_v33 }
 0x1b6   : > { %2160 = vrot.lane.b32.xlu0 %v2087_v43, %s7783_s16 }
 0x1b7   : > { %2196 = vrot.lane.b32.xlu1 %v2156_v11, %s7784_s15  ;;  %v1686_v11 = vcombine.high %v8634_v58, %v12012_v28  ;;  %v8875_v58 = vrot.slane %v1337_v36, %v8233_v4 }
 0x1b9   : > { %v8847_v59 = vpop.permute.xlu1 %499  ;;  %v8849_v63 = vpop.permute.xlu0 %471 }
 0x1ba   : > { %1470 = vrot.lane.b32.xlu0 %v1437_v14, %s7783_s16  ;;  %v1438_v14 = vcombine.high %v8703_v38, %v12012_v28  ;;  %v1369_v38 = vcombine.high %v8875_v58, %v12012_v28 }
 0x1bb   : > { %988 = vrot.lane.b32.xlu1 %v901_v39, %s7785_s17 }
 0x1bd   : > { %v1233_v43 = vpop.permute.xlu1 %1232  ;;  %v8864_v9 = vpop.permute.xlu0 %1204 }
 0x1be   : > { %1726 = vrot.lane.b32.xlu0 %v1686_v11, %s7784_s15  ;;  %v1251_v11 = vsel %vm520_vm5, %v1250_v19, %v8763_v2  ;;  %v1570_v19 = vcombine.high %v8526_v20, %v8542_v51  ;;  %v2157_v20 = vcombine.high %v8736_v1, %v12012_v28 }
 0x1bf   : > { %1024 = vrot.lane.b32.xlu1 %v970_v42, %s7787_s19  ;;  %v1252_v35 = vsel %vm522_vm4, %v1251_v11, %v1225_v5  ;;  %v1687_v42 = vcombine.high %v8722_v29, %v12012_v28  ;;  %v1908_v5 = vcombine.high %v8430_v50, %v12012_v28  ;;  %v1390_v29 = vcombine.high %v8608_v18, %v8626_v6 }
 0x1c0   : > { %v1253_v2 = vsel %vm524_vm6, %v1252_v35, %v8791_v3  ;;  %v1618_v3 = vcombine.high %v8688_v34, %v12012_v28  ;;  %v1554_v35 = vcombine.high %v8499_v17, %v8528_v44  ;;  %v1374_v50 = vcombine.high %v8578_v41, %v8610_v21 }
 0x1c1   : > { %v1237_v39 = vpop.permute.xlu1 %1236  ;;  %v8882_v55 = vpop.permute.xlu0 %475  ;;  %v1254_v36 = vsel %vm526_vm7, %v1253_v2, %v1233_v43  ;;  %v1243_v6 = vsel %vm518_vm3, %v8266_v24, %v8793_v40  ;;  %v8917_v51 = vrot.slane %v1570_v19, %v8058_v32  ;;  %v8920_v17 = vrot.slane %v1390_v29, %v8058_v32  ;;  %v12020_v2 = vld [vmem:[#allocation25_spill] sm:$0xff] }
 0x1c2   : > { %742 = vrot.lane.b32.xlu0 %v648_v27, %s7787_s19  ;;  %v1255_v27 = vsel %vm528_vm8, %v1254_v36, %v1237_v39  ;;  %v2088_v21 = vcombine.high %v8631_v46, %v12012_v28  ;;  %v1338_v44 = vcombine.high %v8854_v62, %v8845_v33  ;;  %v8929_v24 = vrot.slane %v1554_v35, %v8058_v32 }
 0x1c3   : > { %1478 = vrot.lane.b32.xlu1 %v1438_v14, %s7784_s15  ;;  %v8932_v18 = vrot.slane %v1374_v50, %v8058_v32  ;;  %v1244_v34 = vsel %vm520_vm5, %v1243_v6, %v8750_v13  ;;  %v902_v46 = vcombine.high %v8685_v31, %v12012_v28  ;;  %v2040_v33 = vcombine.high %v8558_v23, %v8576_v15  ;;  %v12021_v23 = vld [vmem:[#allocation19_spill] sm:$0xff] }
 0x1c4   : > { %v1245_v1 = vsel %vm522_vm4, %v1244_v34, %v8829_v7  ;;  %v1601_v40 = vcombine.low %v8929_v24, %v8917_v51  ;;  %v2024_v31 = vcombine.high %v12020_v2, %v8560_v37  ;;  %v532_v15 = vsel %vm518_vm3, %v12021_v23, %v8807_v60 }
 0x1c5   : > { %v8884_v12 = vpop.permute.xlu1 %507  ;;  %v1209_v43 = vpop.permute.xlu0 %1208  ;;  %v1421_v62 = vcombine.low %v8932_v18, %v8920_v17  ;;  %v1246_v7 = vsel %vm524_vm6, %v1245_v1, %v8778_v10  ;;  %v8963_v36 = vrot.slane %v2040_v33, %v8058_v32  ;;  %v533_v60 = vsel %vm520_vm5, %v532_v15, %v8776_v57 }
 0x1c6   : > { %1442 = vrot.lane.b32.xlu0 %v1369_v38, %s7783_s16  ;;  %v1609_v29 = vrot.slane %v1601_v40, %v8233_v4  ;;  %v12031_v23 = vcombine.high %v8518_v25, %v8521_v52  ;;  %v1322_v52 = vcombine.high %v8657_v26, %v8680_v61 }
 0x1c7   : > { %1734 = vrot.lane.b32.xlu1 %v1687_v42, %s7785_s17  ;;  %v1352_v42 = vrot.slane %v1338_v44, %v8233_v4  ;;  %v1429_v10 = vrot.slane %v1421_v62, %v8233_v4  ;;  %v12028_v62 = vld [vmem:[#allocation18_spill] sm:$0xff] }
 0x1c8   : > { %v2154_v15 = vrot.slane %v12031_v23, %v8233_v4  ;;  %v1336_v61 = vrot.slane %v1322_v52, %v8058_v32 }
 0x1c9   : > { %v1241_v14 = vpop.permute.xlu1 %1240  ;;  %v8948_v13 = vpop.permute.xlu0 %479 }
 0x1ca   : > { %v1256_v11 = vsel %vm530_vm9, %v1255_v27, %v1241_v14  ;;  %1698 = vrot.lane.b32.xlu0 %v1618_v3, %s7784_s15  ;;  %v8970_v14 = vrot.slane %v2024_v31, %v8058_v32 }
 0x1cb   : > { %v1260_v38 = vrot.slane %v1256_v11, 4  ;;  %1948 = vrot.lane.b32.xlu1 %v1908_v5, %s7784_s15  ;;  %v1247_v5 = vsel %vm526_vm7, %v1246_v7, %v8864_v9  ;;  %v534_v11 = vsel %vm522_vm4, %v533_v60, %v8847_v59  ;;  %v7655_v60 = vld [vmem:[#allocation2 + $0x4a] sm:$0xff] }
 0x1cc   : > { %v1248_v19 = vsel %vm528_vm8, %v1247_v5, %v1209_v43  ;;  %v2071_v35 = vcombine.low %v8970_v14, %v8963_v36  ;;  %v12022_v43 = vld [vmem:[#allocation15_spill] sm:$0xff]  ;;  %v535_v34 = vsel %vm524_vm6, %v534_v11, %v8805_v30 }
 0x1cd   : > { %1264 = vst [vmem:[#allocation3 + $0x18] sm:$0xf0] %v1260_v38  ;;  %v8926_v41 = vpop.permute.xlu1 %1940  ;;  %v8974_v3 = vpop.permute.xlu0 %1912  ;;  %v12023_v38 = vld [vmem:[#allocation16_spill] sm:$0xff]  ;;  %v536_v59 = vsel %vm526_vm7, %v535_v34, %v8884_v12  ;;  %v12030_v12 = vld [vmem:[#allocation23_spill] sm:$0xff] }
 0x1ce   : > { %2168 = vrot.lane.b32.xlu0 %v2088_v21, %s7784_s15  ;;  %v12024_v57 = vcombine.high %v12022_v43, %v12023_v38  ;;  %v2079_v33 = vrot.slane %v2071_v35, %v8233_v4  ;;  %v1619_v43 = vcombine.high %v1609_v29, %v12012_v28  ;;  %v7657_v38 = vld [vmem:[#allocation2 + $0x32] sm:$0xff] }
 0x1cf   : > { %2204 = vrot.lane.b32.xlu1 %v2157_v20, %s7785_s17  ;;  %v12025_v20 = vld [vmem:[#allocation24_spill] sm:$0xff] }
 0x1d0   : > { %v1822_v6 = vrot.slane %v12024_v57, %v8233_v4  ;;  %v12026_v21 = vcombine.high %v8464_v8, %v12025_v20  ;;  %v12027_v8 = vld [vmem:[#allocation17_spill] sm:$0xff]  ;;  %v1306_v20 = vcombine.high %v8628_v49, %v8659_v16 }
 0x1d1   : > { %v512_v39 = vpop.permute.xlu1 %511  ;;  %v8999_v1 = vpop.permute.xlu0 %483  ;;  %v12029_v2 = vcombine.low %v12027_v8, %v12028_v62 }
 0x1d2   : > { %1446 = vrot.lane.b32.xlu0 %v1352_v42, %s7781_s23  ;;  %v1684_v44 = vrot.slane %v12026_v21, %v8233_v4  ;;  %v1320_v16 = vrot.slane %v1306_v20, %v8058_v32 }
 0x1d3   : > { %996 = vrot.lane.b32.xlu1 %v902_v46, %s7787_s19  ;;  %v537_v46 = vsel %vm528_vm8, %v536_v59, %v512_v39  ;;  %v1899_v31 = vrot.slane %v12029_v2, %v8233_v4  ;;  %v393_v39 = vcombine.high %v12030_v12, %v12012_v28  ;;  %v2089_v2 = vcombine.high %v2079_v33, %v12012_v28 }
 0x1d4   : > { %v1602_v12 = vcombine.high %v8929_v24, %v8917_v51  ;;  %v1354_v52 = vcombine.high %v1320_v16, %v1336_v61 }
 0x1d5   : > { %v1213_v37 = vpop.permute.xlu1 %1212  ;;  %v9017_v5 = vpop.permute.xlu0 %730 }
 0x1d6   : > { %v1249_v27 = vsel %vm530_vm9, %v1248_v19, %v1213_v37  ;;  %1702 = vrot.lane.b32.xlu0 %v1609_v29, %s7782_s24  ;;  %v1370_v37 = vcombine.high %v1352_v42, %v12012_v28  ;;  %v1688_v42 = vcombine.high %v1684_v44, %v12012_v28  ;;  %v1840_v29 = vcombine.high %v1822_v6, %v12012_v28 }
 0x1d7   : > { %v1259_v9 = vrot.slane %v1249_v27, 4  ;;  %1482 = vrot.lane.b32.xlu1 %v1429_v10, %s7782_s24  ;;  %v1439_v27 = vcombine.high %v1429_v10, %v12012_v28  ;;  %v7658_v10 = vld [vmem:[#allocation2 + $0x2] sm:$0xff]  ;;  %v1616_v51 = vrot.slane %v1602_v12, %v8233_v4 }
 0x1d8   : > { %v1776_v57 = vcombine.high %v7658_v10, %v7657_v38 }
 0x1d9   : > { %1263 = vst [vmem:[#allocation3 + $0x10] sm:$0xf0] %v1259_v9  ;;  %v8982_v50 = vpop.permute.xlu1 %1944  ;;  %v7656_v9 = vld [vmem:[#allocation2 + $0x1a] sm:$0xff]  ;;  %v9029_v11 = vpop.permute.xlu0 %976  ;;  %v1620_v12 = vcombine.high %v1616_v51, %v12012_v28 }
 0x1da   : > { %1916 = vrot.lane.b32.xlu0 %v1822_v6, %s7781_s23  ;;  %v1792_v25 = vcombine.high %v7656_v9, %v7655_v60  ;;  %v9048_v34 = vrot.slane %v1776_v57, %v8058_v32  ;;  %v1353_v6 = vcombine.low %v1320_v16, %v1336_v61  ;;  %v12032_v57 = vcombine.high %v12027_v8, %v12028_v62  ;;  %v12033_v8 = vld [vmem:[#allocation31_spill] sm:$0xff]  ;;  %v12034_v62 = vld [vmem:[#allocation28_spill] sm:$0xff] }
 0x1db   : > { %1738 = vrot.lane.b32.xlu1 %v1684_v44, %s7786_s18  ;;  %v1909_v44 = vcombine.high %v1899_v31, %v12012_v28 }
 0x1dc   : > { %v9040_v26 = vrot.slane %v1792_v25, %v8058_v32  ;;  %v2277_v25 = vcombine.low %v8717_v0, %v8733_v45  ;;  %v1906_v20 = vrot.slane %v12032_v57, %v8233_v4 }
 0x1dd   : > { %v516_v40 = vpop.permute.xlu1 %515  ;;  %v9051_v49 = vpop.permute.xlu0 %738 }
 0x1de   : > { %v538_v30 = vsel %vm530_vm9, %v537_v46, %v516_v40  ;;  %2172 = vrot.lane.b32.xlu0 %v2079_v33, %s7782_s24  ;;  %v1823_v59 = vcombine.low %v9048_v34, %v9040_v26  ;;  %v1422_v46 = vcombine.high %v8932_v18, %v8920_v17  ;;  %v1361_v33 = vrot.slane %v1353_v6, %v8233_v4 }
 0x1df   : > { %540 = vst [vmem:[#allocation3 + $0x8] sm:$0xf] %v538_v30  ;;  %1952 = vrot.lane.b32.xlu1 %v1899_v31, %s7782_s24  ;;  %v2158_v31 = vcombine.high %v2154_v15, %v12012_v28  ;;  %v1368_v6 = vrot.slane %v1354_v52, %v8233_v4 }
 0x1e0   : > { %v1831_v30 = vrot.slane %v1823_v59, %v8233_v4  ;;  %v1436_v23 = vrot.slane %v1422_v46, %v8233_v4  ;;  %v1371_v59 = vcombine.high %v1361_v33, %v12012_v28  ;;  %v1910_v46 = vcombine.high %v1906_v20, %v12012_v28 }
 0x1e1   : > { %v9011_v7 = vpop.permute.xlu1 %750  ;;  %v9070_v17 = vpop.permute.xlu0 %984 }
 0x1e2   : > { %487 = vrot.lane.b32.xlu0 %v393_v39, %s7787_s19  ;;  %v2072_v39 = vcombine.high %v8970_v14, %v8963_v36  ;;  %v1841_v24 = vcombine.high %v1831_v30, %v12012_v28  ;;  %v2293_v14 = vcombine.low %v8731_v53, %v8748_v47  ;;  %v1440_v10 = vcombine.high %v1436_v23, %v12012_v28 }
 0x1e3   : > { %2208 = vrot.lane.b32.xlu1 %v2154_v15, %s7786_s18 }
 0x1e4   : > { %v2086_v36 = vrot.slane %v2072_v39, %v8233_v4  ;;  %v1372_v39 = vcombine.high %v1368_v6, %v12012_v28 }
 0x1e5   : > { %v9021_v19 = vpop.permute.xlu1 %722 }
 0x1e6   : > { %1450 = vrot.lane.b32.xlu0 %v1370_v37, %s7784_s15  ;;  %v2090_v9 = vcombine.high %v2086_v36, %v12012_v28 }
 0x1e7   : > { %1486 = vrot.lane.b32.xlu1 %v1439_v27, %s7785_s17 }
 0x1e9   : > { %v9031_v35 = vpop.permute.xlu1 %758 }
 0x1ea   : > { %1706 = vrot.lane.b32.xlu0 %v1619_v43, %s7785_s17  ;;  %v2301_v43 = vrot.slane %v2293_v14, %v8058_v32 }
 0x1eb   : > { %1742 = vrot.lane.b32.xlu1 %v1688_v42, %s7787_s19 }
 0x1ed   : > { %v9043_v21 = vpop.permute.xlu1 %1004 }
 0x1ee   : > { %1920 = vrot.lane.b32.xlu0 %v1840_v29, %s7784_s15  ;;  %v2285_v29 = vrot.slane %v2277_v25, %v8058_v32 }
 0x1ef   : > { %1956 = vrot.lane.b32.xlu1 %v1909_v44, %s7785_s17 }
 0x1f0   : > { %v2309_v61 = vcombine.low %v2285_v29, %v2301_v43  ;;  %v2310_v25 = vcombine.high %v2285_v29, %v2301_v43  ;;  %v1824_v29 = vcombine.high %v9048_v34, %v9040_v26 }
 0x1f1   : > { %v9059_v40 = vpop.permute.xlu1 %766 }
 0x1f2   : > { %2176 = vrot.lane.b32.xlu0 %v2089_v2, %s7785_s17  ;;  %v2361_v2 = vcombine.low %v12034_v62, %v12033_v8  ;;  %v2324_v43 = vrot.slane %v2310_v25, %v8233_v4 }
 0x1f3   : > { %2212 = vrot.lane.b32.xlu1 %v2158_v31, %s7787_s19 }
 0x1f4   : > { %v2369_v14 = vrot.slane %v2361_v2, %v8058_v32 }
 0x1f5   : > { %v9072_v18 = vpop.permute.xlu1 %1012 }
 0x1f6   : > { %1454 = vrot.lane.b32.xlu0 %v1361_v33, %s7782_s24  ;;  %v9127_v33 = vrot.slane %v2309_v61, %v8233_v4  ;;  %v2278_v61 = vcombine.high %v8717_v0, %v8733_v45 }
 0x1f7   : > { %1490 = vrot.lane.b32.xlu1 %v1436_v23, %s7786_s18  ;;  %v12035_v23 = vld [vmem:[#allocation29_spill] sm:$0xff] }
 0x1f8   : > { %v9078_v15 = vpop.permute.xlu0 %2164  ;;  %v2292_v2 = vrot.slane %v2278_v61, %v8058_v32 }
 0x1f9   : > { %v9080_v37 = vpop.permute.xlu1 %1722 }
 0x1fa   : > { %1710 = vrot.lane.b32.xlu0 %v1616_v51, %s7786_s18 }
 0x1fb   : > { %1928 = vrot.lane.b32.xlu1 %v1841_v24, %s7785_s17  ;;  %v12036_v24 = vld [vmem:[#allocation27_spill] sm:$0xff] }
 0x1fc   : > { %v9089_v27 = vpop.permute.xlu0 %1020 }
 0x1fd   : > { %v9091_v60 = vpop.permute.xlu1 %2192 }
 0x1fe   : > { %1924 = vrot.lane.b32.xlu0 %v1831_v30, %s7782_s24 }
 0x1ff   : > { %2184 = vrot.lane.b32.xlu1 %v2090_v9, %s7787_s19  ;;  %v2294_v9 = vcombine.high %v8731_v53, %v8748_v47 }
 0x200   : > { %v9099_v42 = vpop.permute.xlu0 %992 }
 0x201   : > { %v9101_v38 = vpop.permute.xlu1 %1694 }
 0x202   : > { %2180 = vrot.lane.b32.xlu0 %v2086_v36, %s7786_s18  ;;  %v2345_v36 = vcombine.low %v12036_v24, %v12035_v23 }
 0x203   : > { %1494 = vrot.lane.b32.xlu1 %v1440_v10, %s7787_s19  ;;  %v2341_v10 = vcombine.high %v9127_v33, %v12012_v28 }
 0x204   : > { %v747_v44 = vpop.permute.xlu0 %746  ;;  %v2353_v57 = vrot.slane %v2345_v36, %v8058_v32 }
 0x205   : > { %v9111_v16 = vpop.permute.xlu1 %1474 }
 0x206   : > { %1458 = vrot.lane.b32.xlu0 %v1371_v59, %s7785_s17  ;;  %v2377_v59 = vcombine.low %v2353_v57, %v2369_v14 }
 0x207   : > { %1964 = vrot.lane.b32.xlu1 %v1910_v46, %s7787_s19  ;;  %v2308_v46 = vrot.slane %v2294_v9, %v8058_v32  ;;  %v12037_v9 = vld [vmem:[#allocation26_spill] sm:$0xff] }
 0x208   : > { %v9120_v31 = vpop.permute.xlu0 %718  ;;  %v9159_v36 = vrot.slane %v2377_v59, %v8233_v4  ;;  %v780_v26 = vsel %vm518_vm3, %v12037_v9, %v747_v44  ;;  %v2362_v44 = vcombine.high %v12034_v62, %v12033_v8 }
 0x209   : > { %v9122_v30 = vpop.permute.xlu1 %1730  ;;  %v2325_v0 = vcombine.low %v2292_v2, %v2308_v46  ;;  %v781_v34 = vsel %vm520_vm5, %v780_v26, %v9011_v7  ;;  %v2378_v7 = vcombine.high %v2353_v57, %v2369_v14 }
 0x20a   : > { %1714 = vrot.lane.b32.xlu0 %v1620_v12, %s7787_s19  ;;  %v1838_v12 = vrot.slane %v1824_v29, %v8233_v4  ;;  %v2326_v29 = vcombine.high %v2292_v2, %v2308_v46  ;;  %v2376_v8 = vrot.slane %v2362_v44, %v8058_v32 }
 0x20b   : > { %1466 = vrot.lane.b32.xlu1 %v1372_v39, %s7787_s19  ;;  %v2342_v39 = vcombine.high %v2324_v43, %v12012_v28  ;;  %v2333_v61 = vrot.slane %v2325_v0, %v8233_v4  ;;  %v2392_v57 = vrot.slane %v2378_v7, %v8233_v4 }
 0x20c   : > { %v755_v52 = vpop.permute.xlu0 %754  ;;  %v2340_v46 = vrot.slane %v2326_v29, %v8233_v4 }
 0x20d   : > { %v9136_v51 = vpop.permute.xlu1 %2200  ;;  %v782_v59 = vsel %vm522_vm4, %v781_v34, %v755_v52  ;;  %v2343_v0 = vcombine.high %v2333_v61, %v12012_v28  ;;  %v2346_v34 = vcombine.high %v12036_v24, %v12035_v23 }
 0x20e   : > { %1960 = vrot.lane.b32.xlu0 %v1906_v20, %s7786_s18 }
 0x20f   : > { %2414 = vrot.lane.b32.xlu1 %v2341_v10, %s7783_s16  ;;  %v2409_v10 = vcombine.high %v9159_v36, %v12012_v28  ;;  %v2360_v23 = vrot.slane %v2346_v34, %v8058_v32 }
 0x210   : > { %v9146_v53 = vpop.permute.xlu0 %726 }
 0x211   : > { %v1001_v47 = vpop.permute.xlu1 %1000 }
 0x212   : > { %1462 = vrot.lane.b32.xlu0 %v1368_v6, %s7786_s18 }
 0x213   : > { %2418 = vrot.lane.b32.xlu1 %v2324_v43, %s7781_s23  ;;  %v1842_v43 = vcombine.high %v1838_v12, %v12012_v28 }
 0x214   : > { %v9154_v45 = vpop.permute.xlu0 %972 }
 0x215   : > { %v763_v20 = vpop.permute.xlu1 %762 }
 0x216   : > { %1932 = vrot.lane.b32.xlu0 %v1838_v12, %s7786_s18 }
 0x217   : > { %2422 = vrot.lane.b32.xlu1 %v2342_v39, %s7784_s15  ;;  %v783_v39 = vsel %vm524_vm6, %v782_v59, %v9031_v35  ;;  %v12038_v59 = vld [vmem:[#allocation32_spill] sm:$0xff] }
 0x218   : > { %v9167_v6 = vpop.permute.xlu0 %1718  ;;  %v784_v52 = vsel %vm526_vm7, %v783_v39, %v763_v20  ;;  %v2393_v20 = vcombine.low %v2360_v23, %v2376_v8  ;;  %v1034_v44 = vsel %vm518_vm3, %v12038_v59, %v1001_v47  ;;  %v2394_v47 = vcombine.high %v2360_v23, %v2376_v8 }
 0x219   : > { %v1009_v25 = vpop.permute.xlu1 %1008  ;;  %v785_v35 = vsel %vm528_vm8, %v784_v52, %v9059_v40  ;;  %v2410_v40 = vcombine.high %v2392_v57, %v12012_v28 }
 0x21a   : > { %2442 = vrot.lane.b32.xlu0 %v2409_v10, %s7783_s16  ;;  %v2401_v39 = vrot.slane %v2393_v20, %v8233_v4  ;;  %v2408_v23 = vrot.slane %v2394_v47, %v8233_v4 }
 0x21b   : > { %2426 = vrot.lane.b32.xlu1 %v2333_v61, %s7782_s24  ;;  %v2344_v61 = vcombine.high %v2340_v46, %v12012_v28 }
 0x21c   : > { %v735_v9 = vpop.permute.xlu0 %734 }
 0x21d   : > { %v9180_v26 = vpop.permute.xlu1 %2188 }
 0x21e   : > { %1936 = vrot.lane.b32.xlu0 %v1842_v43, %s7787_s19  ;;  %v1035_v43 = vsel %vm520_vm5, %v1034_v44, %v9043_v21 }
 0x21f   : > { %2430 = vrot.lane.b32.xlu1 %v2343_v0, %s7785_s17  ;;  %v12039_v0 = vld [vmem:[#allocation30_spill] sm:$0xff]  ;;  %v1036_v34 = vsel %vm522_vm4, %v1035_v43, %v1009_v25  ;;  %v1027_v43 = vsel %vm518_vm3, %v8755_v22, %v9154_v45 }
 0x220   : > { %v9189_v62 = vpop.permute.xlu0 %980  ;;  %v773_v52 = vsel %vm518_vm3, %v12039_v0, %v9120_v31  ;;  %v1037_v21 = vsel %vm524_vm6, %v1036_v34, %v9072_v18 }
 0x221   : > { %v771_v14 = vpop.permute.xlu1 %770 }
 0x222   : > { %v786_v2 = vsel %vm530_vm9, %v785_v35, %v771_v14  ;;  %2446 = vrot.lane.b32.xlu0 %v2392_v57, %s7781_s23  ;;  %v774_v14 = vsel %vm520_vm5, %v773_v52, %v9021_v19  ;;  %v1028_v52 = vsel %vm520_vm5, %v1027_v43, %v9029_v11 }
 0x223   : > { %v790_v24 = vrot.slane %v786_v2, 4  ;;  %2434 = vrot.lane.b32.xlu1 %v2340_v46, %s7786_s18  ;;  %v2411_v46 = vcombine.high %v2401_v39, %v12012_v28  ;;  %v775_v2 = vsel %vm522_vm4, %v774_v14, %v9146_v53  ;;  %v1029_v14 = vsel %vm522_vm4, %v1028_v52, %v9189_v62 }
 0x224   : > { %v9199_v12 = vpop.permute.xlu0 %1690  ;;  %v776_v25 = vsel %vm524_vm6, %v775_v2, %v9017_v5  ;;  %v2412_v5 = vcombine.high %v2408_v23, %v12012_v28 }
 0x225   : > { %794 = vst [vmem:[#allocation3 + $0x8] sm:$0xf0] %v790_v24  ;;  %v1017_v10 = vpop.permute.xlu1 %1016  ;;  %v777_v24 = vsel %vm526_vm7, %v776_v25, %v735_v9  ;;  %v2496_v9 = vld [vmem:[%s11861_s3] sm:$0xff] }
 0x226   : > { %2450 = vrot.lane.b32.xlu0 %v2410_v40, %s7784_s15  ;;  %v1038_v31 = vsel %vm526_vm7, %v1037_v21, %v1017_v10  ;;  %v778_v53 = vsel %vm528_vm8, %v777_v24, %v9051_v49  ;;  %v1030_v21 = vsel %vm524_vm6, %v1029_v14, %v9070_v17 }
 0x227   : > { %2438 = vrot.lane.b32.xlu1 %v2344_v61, %s7787_s19  ;;  %v1039_v18 = vsel %vm528_vm8, %v1038_v31, %v9089_v27  ;;  %v7788_v27 = vmov 0  }
 0x228   : > { %v9209_v7 = vpop.permute.xlu0 %2160  ;;  %7298 = vset.pattern.permute.xlu0 %v7788_v27 }
 0x229   : > { %v9211_v29 = vpop.permute.xlu1 %2196 }
 0x22a   : > { %2454 = vrot.lane.b32.xlu0 %v2401_v39, %s7782_s24 }
 0x22c   : > { %v9223_v35 = vpop.permute.xlu0 %1470  ;;  %v2487_v28 = vld [vmem:[#allocation3 + $0x8] sm:$0xff] }
 0x22d   : > { %v989_v57 = vpop.permute.xlu1 %988 }
 0x22e   : > { %2458 = vrot.lane.b32.xlu0 %v2411_v46, %s7785_s17  ;;  %v1031_v45 = vsel %vm526_vm7, %v1030_v21, %v989_v57 }
 0x22f   : > { %v1032_v11 = vsel %vm528_vm8, %v1031_v45, %v9099_v42 }
 0x230   : > { %v1727_v8 = vpop.permute.xlu0 %1726 }
 0x231   : > { %v1025_v19 = vpop.permute.xlu1 %1024 }
 0x232   : > { %v1040_v20 = vsel %vm530_vm9, %v1039_v18, %v1025_v19  ;;  %2462 = vrot.lane.b32.xlu0 %v2408_v23, %s7786_s18  ;;  %v12040_v23 = vld [vmem:[#allocation20_spill] sm:$0xff] }
 0x233   : > { %1042 = vst [vmem:[#allocation3 + $0x18] sm:$0xf] %v1040_v20  ;;  %v519_v24 = vsel %vm518_vm3, %v12040_v23, %v8816_v48 }
 0x234   : > { %v743_v10 = vpop.permute.xlu0 %742  ;;  %v521_v57 = vsel %vm520_vm5, %v519_v24, %v8765_v56 }
 0x235   : > { %v9240_v40 = vpop.permute.xlu1 %1478  ;;  %v779_v61 = vsel %vm530_vm9, %v778_v53, %v743_v10  ;;  %v523_v42 = vsel %vm522_vm4, %v521_v57, %v8849_v63 }
 0x236   : > { %v789_v59 = vrot.slane %v779_v61, 4  ;;  %2466 = vrot.lane.b32.xlu0 %v2412_v5, %s7787_s19  ;;  %v525_v10 = vsel %vm524_vm6, %v523_v42, %v8882_v55  ;;  %v12041_v61 = vld [vmem:[#allocation33_spill] sm:$0xff] }
 0x237   : > { %v527_v5 = vsel %vm526_vm7, %v525_v10, %v8948_v13  ;;  %v1752_v27 = vsel %vm518_vm3, %v12041_v61, %v9167_v6  ;;  %v12042_v6 = vld [vmem:[#allocation34_spill] sm:$0xff] }
 0x238   : > { %793 = vst [vmem:[#allocation3] sm:$0xf0] %v789_v59  ;;  %v9248_v44 = vpop.permute.xlu0 %1442  ;;  %v529_v48 = vsel %vm528_vm8, %v527_v5, %v8999_v1  ;;  %v1753_v63 = vsel %vm520_vm5, %v1752_v27, %v9080_v37  ;;  %v2222_v1 = vsel %vm518_vm3, %v12042_v6, %v9180_v26  ;;  %v1504_v27 = vsel %vm518_vm3, %v8836_v54, %v9223_v35 }
 0x239   : > { %v1735_v49 = vpop.permute.xlu1 %1734  ;;  %v1754_v55 = vsel %vm522_vm4, %v1753_v63, %v1727_v8  ;;  %v2223_v45 = vsel %vm520_vm5, %v2222_v1, %v9091_v60 }
 0x23a   : > { %v2489_v39 = vld [vmem:[#allocation3 + $0x18] sm:$0xff]  ;;  %2499 = vperm.xlu0 %7298, %v2496_v9  }
 0x23b   : > { %v7209_v0 = vpack.c.bf16 %v2489_v39, %v2487_v28  ;;  %v1755_v28 = vsel %vm524_vm6, %v1754_v55, %v9122_v30  ;;  %v2224_v30 = vsel %vm522_vm4, %v2223_v45, %v9211_v29 }
 0x23c   : > { %v9255_v34 = vpop.permute.xlu0 %1698  ;;  %v1756_v39 = vsel %vm526_vm7, %v1755_v28, %v1735_v49 }
 0x23d   : > { %v9257_v47 = vpop.permute.xlu1 %1948  ;;  %7210 = vmatprep.subr.bf16.mxu0 %v7209_v0 }
 0x240   : > { %v9263_v46 = vpop.permute.xlu0 %2168 }
 0x241   : > { %v2205_v22 = vpop.permute.xlu1 %2204 }
 0x244   : > { %v9266_v2 = vpop.permute.xlu0 %1446 }
 0x245   : > { %v997_v31 = vpop.permute.xlu1 %996 }
 0x246   : > { %v1033_v25 = vsel %vm530_vm9, %v1032_v11, %v997_v31 }
 0x247   : > { %1041 = vst [vmem:[#allocation3 + $0x10] sm:$0xf] %v1033_v25  ;;  %v2225_v25 = vsel %vm524_vm6, %v2224_v30, %v9136_v51  ;;  %v12043_v51 = vld [vmem:[#allocation36_spill] sm:$0xff] }
 0x248   : > { %v9271_v19 = vpop.permute.xlu0 %1702 }
 0x249   : > { %v1483_v62 = vpop.permute.xlu1 %1482 }
 0x24c   : > { %v9273_v18 = vpop.permute.xlu0 %1916 }
 0x24d   : > { %v1739_v17 = vpop.permute.xlu1 %1738 }
 0x24e   : > { %v1757_v0 = vsel %vm528_vm8, %v1756_v39, %v1739_v17  ;;  %v2488_v8 = vld [vmem:[#allocation3 + $0x10] sm:$0xff]  ;;  %v2226_v17 = vsel %vm526_vm7, %v2225_v25, %v2205_v22  ;;  %v2215_v22 = vsel %vm518_vm3, %v12043_v51, %v9209_v7 }
 0x24f   : > { %v2216_v63 = vsel %vm520_vm5, %v2215_v22, %v9078_v15 }
 0x250   : > { %v2173_v20 = vpop.permute.xlu0 %2172  ;;  %v2217_v55 = vsel %vm522_vm4, %v2216_v63, %v9263_v46 }
 0x251   : > { %v9280_v53 = vpop.permute.xlu1 %1952  ;;  %v2218_v35 = vsel %vm524_vm6, %v2217_v55, %v2173_v20 }
 0x254   : > { %v488_v56 = vpop.permute.xlu0 %487 }
 0x255   : > { %v2209_v59 = vpop.permute.xlu1 %2208  ;;  %v531_v9 = vsel %vm530_vm9, %v529_v48, %v488_v56  ;;  %v1505_v48 = vsel %vm520_vm5, %v1504_v27, %v9111_v16  ;;  %v12046_v27 = vld [vmem:[#allocation22_spill] sm:$0xff] }
 0x256   : > { %539 = vst [vmem:[#allocation3] sm:$0xf] %v531_v9  ;;  %v2227_v23 = vsel %vm528_vm8, %v2226_v17, %v2209_v59  ;;  %v1506_v9 = vsel %vm522_vm4, %v1505_v48, %v9240_v40  ;;  %v12044_v40 = vld [vmem:[#allocation35_spill] sm:$0xff] }
 0x257   : > { %v1507_v54 = vsel %vm524_vm6, %v1506_v9, %v1483_v62  ;;  %v1745_v39 = vsel %vm518_vm3, %v12044_v40, %v9199_v12 }
 0x258   : > { %v9297_v43 = vpop.permute.xlu0 %1450 }
 0x259   : > { %v1487_v13 = vpop.permute.xlu1 %1486 }
 0x25a   : > { %v1508_v7 = vsel %vm526_vm7, %v1507_v54, %v1487_v13  ;;  %v1746_v13 = vsel %vm520_vm5, %v1745_v39, %v9101_v38 }
 0x25c   : > { %v1707_v52 = vpop.permute.xlu0 %1706 }
 0x25d   : > { %v1743_v14 = vpop.permute.xlu1 %1742  ;;  %v2486_v21 = vld [vmem:[#allocation3] sm:$0xff] }
 0x25e   : > { %v1758_v37 = vsel %vm530_vm9, %v1757_v0, %v1743_v14  ;;  %v7211_v11 = vpack.c.bf16 %v2488_v8, %v2486_v21  ;;  %v12045_v8 = vld [vmem:[#allocation21_spill] sm:$0xff] }
 0x25f   : > { %v1762_v31 = vrot.slane %v1758_v37, 4  ;;  %v1747_v37 = vsel %vm522_vm4, %v1746_v13, %v9255_v34  ;;  %v1974_v45 = vsel %vm518_vm3, %v12045_v8, %v8926_v41  ;;  %v1497_v41 = vsel %vm518_vm3, %v8875_v58, %v9248_v44 }
 0x260   : > { %7212 = vmatpush1.bf16.msra.mxu0 %v7211_v11  ;;  %v9311_v26 = vpop.permute.xlu0 %1920  ;;  %v1748_v12 = vsel %vm524_vm6, %v1747_v37, %v9271_v19  ;;  %v1975_v38 = vsel %vm520_vm5, %v1974_v45, %v8982_v50  ;;  %v1498_v50 = vsel %vm520_vm5, %v1497_v41, %v9266_v2 }
 0x261   : > { %1766 = vst [vmem:[#allocation3 + $0x28] sm:$0xf0] %v1762_v31  ;;  %v1957_v49 = vpop.permute.xlu1 %1956  ;;  %v1749_v21 = vsel %vm526_vm7, %v1748_v12, %v1707_v52  ;;  %v1976_v34 = vsel %vm522_vm4, %v1975_v38, %v9257_v47  ;;  %v1499_v47 = vsel %vm522_vm4, %v1498_v50, %v9297_v43  ;;  %v1967_v43 = vsel %vm518_vm3, %v12046_v27, %v8974_v3 }
 0x262   : > { %v1977_v19 = vsel %vm524_vm6, %v1976_v34, %v9280_v53  ;;  %v1968_v51 = vsel %vm520_vm5, %v1967_v43, %v9273_v18 }
 0x263   : > { %v1978_v52 = vsel %vm526_vm7, %v1977_v19, %v1957_v49  ;;  %v1969_v48 = vsel %vm522_vm4, %v1968_v51, %v9311_v26 }
 0x264   : > { %v2177_v24 = vpop.permute.xlu0 %2176 }
 0x265   : > { %v2213_v57 = vpop.permute.xlu1 %2212  ;;  %v2219_v28 = vsel %vm526_vm7, %v2218_v35, %v2177_v24 }
 0x266   : > { %v2228_v60 = vsel %vm530_vm9, %v2227_v23, %v2213_v57 }
 0x267   : > { %v2232_v42 = vrot.slane %v2228_v60, 4 }
 0x268   : > { %v1455_v10 = vpop.permute.xlu0 %1454 }
 0x269   : > { %2236 = vst [vmem:[#allocation3 + $0x38] sm:$0xf0] %v2232_v42  ;;  %v1491_v29 = vpop.permute.xlu1 %1490  ;;  %v1500_v53 = vsel %vm524_vm6, %v1499_v47, %v1455_v10 }
 0x26a   : > { %v1509_v16 = vsel %vm528_vm8, %v1508_v7, %v1491_v29 }
 0x26c   : > { %v1711_v5 = vpop.permute.xlu0 %1710 }
 0x26d   : > { %v9318_v61 = vpop.permute.xlu1 %1928  ;;  %v1750_v31 = vsel %vm528_vm8, %v1749_v21, %v1711_v5 }
 0x270   : > { %v1925_v56 = vpop.permute.xlu0 %1924 }
 0x271   : > { %v2185_v59 = vpop.permute.xlu1 %2184  ;;  %v1970_v9 = vsel %vm524_vm6, %v1969_v48, %v1925_v56 }
 0x272   : > { %v1971_v54 = vsel %vm526_vm7, %v1970_v9, %v9318_v61 }
 0x274   : > { %v2181_v6 = vpop.permute.xlu0 %2180 }
 0x275   : > { %v1495_v1 = vpop.permute.xlu1 %1494  ;;  %v2220_v15 = vsel %vm528_vm8, %v2219_v28, %v2181_v6 }
 0x276   : > { %v1510_v46 = vsel %vm530_vm9, %v1509_v16, %v1495_v1  ;;  %v2221_v62 = vsel %vm530_vm9, %v2220_v15, %v2185_v59 }
 0x277   : > { %1512 = vst [vmem:[#allocation3 + $0x28] sm:$0xf] %v1510_v46  ;;  %v2231_v20 = vrot.slane %v2221_v62, 4 }
 0x278   : > { %v1459_v0 = vpop.permute.xlu0 %1458 }
 0x279   : > { %v1965_v14 = vpop.permute.xlu1 %1964  ;;  %2235 = vst [vmem:[#allocation3 + $0x30] sm:$0xf0] %v2231_v20  ;;  %v1501_v58 = vsel %vm526_vm7, %v1500_v53, %v1459_v0 }
 0x27c   : > { %v1715_v11 = vpop.permute.xlu0 %1714 }
 0x27d   : > { %v1467_v30 = vpop.permute.xlu1 %1466  ;;  %v1751_v25 = vsel %vm530_vm9, %v1750_v31, %v1715_v11 }
 0x27e   : > { %v1761_v17 = vrot.slane %v1751_v25, 4  ;;  %v2491_v10 = vld [vmem:[#allocation3 + $0x28] sm:$0xff] }
 0x280   : > { %1765 = vst [vmem:[#allocation3 + $0x20] sm:$0xf0] %v1761_v17  ;;  %v1961_v23 = vpop.permute.xlu0 %1960 }
 0x281   : > { %v2415_v24 = vpop.permute.xlu1 %2414  ;;  %v1979_v57 = vsel %vm528_vm8, %v1978_v52, %v1961_v23 }
 0x282   : > { %v1980_v60 = vsel %vm530_vm9, %v1979_v57, %v1965_v14  ;;  %v2469_v28 = vsel %vm518_vm3, %v9127_v33, %v2415_v24 }
 0x283   : > { %1982 = vst [vmem:[#allocation3 + $0x38] sm:$0xf] %v1980_v60 }
 0x284   : > { %v1463_v44 = vpop.permute.xlu0 %1462 }
 0x285   : > { %v2419_v49 = vpop.permute.xlu1 %2418  ;;  %v1502_v42 = vsel %vm528_vm8, %v1501_v58, %v1463_v44 }
 0x286   : > { %v1503_v29 = vsel %vm530_vm9, %v1502_v42, %v1467_v30  ;;  %v2470_v26 = vsel %vm520_vm5, %v2469_v28, %v2419_v49 }
 0x287   : > { %1511 = vst [vmem:[#allocation3 + $0x20] sm:$0xf] %v1503_v29 }
 0x288   : > { %v1933_v2 = vpop.permute.xlu0 %1932 }
 0x289   : > { %v2423_v5 = vpop.permute.xlu1 %2422  ;;  %v1972_v35 = vsel %vm528_vm8, %v1971_v54, %v1933_v2 }
 0x28a   : > { %v2493_v22 = vld [vmem:[#allocation3 + $0x38] sm:$0xff]  ;;  %v2471_v6 = vsel %vm522_vm4, %v2470_v26, %v2423_v5 }
 0x28b   : > { %v7213_v59 = vpack.c.bf16 %v2493_v22, %v2491_v10 }
 0x28c   : > { %v2443_v63 = vpop.permute.xlu0 %2442 }
 0x28d   : > { %v2427_v55 = vpop.permute.xlu1 %2426  ;;  %7214 = vmatprep.subr.bf16.mxu0 %v7213_v59  ;;  %v2476_v14 = vsel %vm518_vm3, %v9159_v36, %v2443_v63  ;;  %v2485_v36 = vld [vmem:[%s11860_s2] sm:$0xff] }
 0x28e   : > { %v2472_v1 = vsel %vm524_vm6, %v2471_v6, %v2427_v55  ;;  %v2490_v62 = vld [vmem:[#allocation3 + $0x20] sm:$0xff]  ;;  %v12047_v55 = vlaneseq }
 0x290   : > { %v1937_v3 = vpop.permute.xlu0 %1936  ;;  %v252_v54 = vand.u32 127, %v12047_v55 }
 0x291   : > { %v2431_v7 = vpop.permute.xlu1 %2430  ;;  %v1973_v18 = vsel %vm530_vm9, %v1972_v35, %v1937_v3  ;;  %v253_v3 = vstv %s250_s11  ;;  %s7707_s11 = scalar_lea.vmem %s7706_s9, 4096 }
 0x292   : > { %1981 = vst [vmem:[#allocation3 + $0x30] sm:$0xf] %v1973_v18  ;;  %v2473_v61 = vsel %vm526_vm7, %v2472_v1, %v2431_v7  ;;  %vm9447_vm12 = vcmp.lt.s32.totalorder %v252_v54, %v253_v3 }
 0x294   : > { %v2447_v16 = vpop.permute.xlu0 %2446 }
 0x295   : > { %v2435_v56 = vpop.permute.xlu1 %2434  ;;  %v2477_v37 = vsel %vm520_vm5, %v2476_v14, %v2447_v16 }
 0x296   : > { %v2474_v40 = vsel %vm528_vm8, %v2473_v61, %v2435_v56  ;;  %v12048_v56 = vmov 0 }
 0x297   : > { %v12049_v56 = vsel %vm9447_vm12, 4294967295, %v12048_v56 }
 0x298   : > { %v2451_v39 = vpop.permute.xlu0 %2450  ;;  %12050 = vst [vmem:[#allocation25_spill] sm:$0xff] %v12049_v56 }
 0x299   : > { %v2439_v15 = vpop.permute.xlu1 %2438  ;;  %v2492_v20 = vld [vmem:[#allocation3 + $0x30] sm:$0xff]  ;;  %v2478_v21 = vsel %vm522_vm4, %v2477_v37, %v2451_v39 }
 0x29a   : > { %v2475_v46 = vsel %vm530_vm9, %v2474_v40, %v2439_v15  ;;  %v7215_v33 = vpack.c.bf16 %v2492_v20, %v2490_v62 }
 0x29b   : > { %2483 = vst [vmem:[#allocation3 + $0x40] sm:$0xf] %v2475_v46 }
 0x29c   : > { %7216 = vmatpush1.bf16.msra.mxu0 %v7215_v33  ;;  %v2455_v13 = vpop.permute.xlu0 %2454 }
 0x29d   : > { %v2479_v8 = vsel %vm524_vm6, %v2478_v21, %v2455_v13 }
 0x2a0   : > { %v2459_v0 = vpop.permute.xlu0 %2458 }
 0x2a1   : > { %v2480_v45 = vsel %vm526_vm7, %v2479_v8, %v2459_v0 }
 0x2a2   : > { %v2494_v25 = vld [vmem:[#allocation3 + $0x40] sm:$0xf] }
 0x2a4   : > { %v2463_v12 = vpop.permute.xlu0 %2462 }
 0x2a5   : > { %v2481_v31 = vsel %vm528_vm8, %v2480_v45, %v2463_v12 }
 0x2a8   : > { %v2467_v11 = vpop.permute.xlu0 %2466 }
 0x2a9   : > { %v2482_v30 = vsel %vm530_vm9, %v2481_v31, %v2467_v11 }
 0x2aa   : > { %2484 = vst [vmem:[#allocation3 + $0x48] sm:$0xf] %v2482_v30 }
 0x2b1   : > { %v2495_v38 = vld [vmem:[#allocation3 + $0x48] sm:$0xf] }
 0x2b2   : > { %7198 = vmatprep.subr.msk.mxu0 %vm2506_vm10, %v2495_v38 }
 0x2b3   : > { %7199 = vmatpush1.msk.msra.mxu0 %vm2506_vm10, %v2494_v25 }
 0x2b4   : > { %7200 = vmatmul.mubr.msk.f32.vlgmr.msra.gmra.mrb[0].mxu0 %vm2502_vm11, %v2485_v36 }
 0x2b9   : > { %v2500_v34 = vpop.permute.xlu0 %2499 }
 0x387   : > { %v2579_v17 = vpop.f32.mrb[0].mxu0 }
 0x388   : > { %v2580_v19 = vadd.f32 %v2579_v17, %v2500_v34  ;;  %v2581_v41 = vpop.f32.mrb[1].mxu0 }
 0x389   : > { %v2582_v24 = vadd.f32 %v2581_v41, %v2500_v34 }
 0x38a   : > { %v2584_v52 = vmax.f32 %v2580_v19, 0.0 }
 0x38b   : > { %v2585_v50 = vmax.f32 %v2582_v24, 0.0 }
 0x38c   : > { %v2586_v23 = vmin.f32 %v2584_v52, 20.0 }
 0x38d   : > { %v9414_v57 = vmin.f32 %v2585_v50, 20.0 }
 0x38e   : > { %2595 = vrot.lane.b32.xlu0 %v2586_v23, %s7785_s17  ;;  %2589 = vrot.lane.b32.xlu1 %v2586_v23, %s7787_s19 }
 0x392   : > { %2601 = vrot.lane.b32.xlu0 %v2586_v23, %s7784_s15  ;;  %2592 = vrot.lane.b32.xlu1 %v2586_v23, %s7786_s18 }
 0x396   : > { %2607 = vrot.lane.b32.xlu0 %v2586_v23, %s7783_s16  ;;  %2598 = vrot.lane.b32.xlu1 %v2586_v23, %s7782_s24 }
 0x39a   : > { %2614 = vrot.lane.b32.xlu0 %v9414_v57, %s7786_s18  ;;  %2604 = vrot.lane.b32.xlu1 %v2586_v23, %s7781_s23 }
 0x39e   : > { %2620 = vrot.lane.b32.xlu0 %v9414_v57, %s7782_s24  ;;  %2611 = vrot.lane.b32.xlu1 %v9414_v57, %s7787_s19 }
 0x3a2   : > { %2626 = vrot.lane.b32.xlu0 %v9414_v57, %s7781_s23  ;;  %2617 = vrot.lane.b32.xlu1 %v9414_v57, %s7785_s17 }
 0x3a6   : > { %2623 = vrot.lane.b32.xlu1 %v9414_v57, %s7784_s15 }
 0x3aa   : > { %2629 = vrot.lane.b32.xlu1 %v9414_v57, %s7783_s16 }
 0x400   : > { %v2596_v47 = vpop.permute.xlu0 %2595  ;;  %v2590_v60 = vpop.permute.xlu1 %2589 }
 0x401   : > { %v2648_v29 = vcombine.low %v2590_v60, %v2596_v47  ;;  %v2649_v39 = vcombine.high %v2590_v60, %v2596_v47 }
 0x403   : > { %v2656_v10 = vrot.slane %v2648_v29, %v8058_v32  ;;  %v2663_v31 = vrot.slane %v2649_v39, %v8058_v32 }
 0x404   : > { %v2602_v53 = vpop.permute.xlu0 %2601  ;;  %v2593_v58 = vpop.permute.xlu1 %2592 }
 0x405   : > { %v2632_v44 = vcombine.low %v2586_v23, %v2593_v58  ;;  %v2633_v6 = vcombine.high %v2586_v23, %v2593_v58 }
 0x407   : > { %v2640_v5 = vrot.slane %v2632_v44, %v8058_v32  ;;  %v2647_v37 = vrot.slane %v2633_v6, %v8058_v32 }
 0x408   : > { %v2608_v49 = vpop.permute.xlu0 %2607  ;;  %v2599_v42 = vpop.permute.xlu1 %2598 }
 0x409   : > { %v2680_v2 = vcombine.low %v2602_v53, %v2608_v49  ;;  %v2696_v59 = vcombine.low %v2640_v5, %v2656_v10  ;;  %v2697_v1 = vcombine.high %v2640_v5, %v2656_v10  ;;  %v2681_v61 = vcombine.high %v2602_v53, %v2608_v49 }
 0x40a   : > { %v2712_v17 = vcombine.low %v2647_v37, %v2663_v31 }
 0x40b   : > { %v2688_v22 = vrot.slane %v2680_v2, %v8058_v32  ;;  %v2704_v16 = vrot.slane %v2696_v59, %v8233_v4  ;;  %v2695_v12 = vrot.slane %v2681_v61, %v8058_v32  ;;  %v2711_v21 = vrot.slane %v2697_v1, %v8233_v4 }
 0x40c   : > { %v9433_v27 = vpop.permute.xlu0 %2614  ;;  %v2605_v43 = vpop.permute.xlu1 %2604  ;;  %v2720_v60 = vrot.slane %v2712_v17, %v8233_v4 }
 0x40d   : > { %v2664_v51 = vcombine.low %v2599_v42, %v2605_v43  ;;  %v2665_v18 = vcombine.high %v2599_v42, %v2605_v43  ;;  %v2768_v14 = vcombine.low %v9414_v57, %v9433_v27 }
 0x40f   : > { %v2672_v48 = vrot.slane %v2664_v51, %v8058_v32  ;;  %v2679_v46 = vrot.slane %v2665_v18, %v8058_v32  ;;  %v2776_v25 = vrot.slane %v2768_v14, %v8058_v32 }
 0x410   : > { %v9438_v9 = vpop.permute.xlu1 %2611  ;;  %v9441_v35 = vpop.permute.xlu0 %2620 }
 0x411   : > { %v2728_v63 = vcombine.low %v2672_v48, %v2688_v22  ;;  %v2729_v28 = vcombine.high %v2672_v48, %v2688_v22  ;;  %v2744_v11 = vcombine.low %v2679_v46, %v2695_v12  ;;  %v2745_v42 = vcombine.high %v2679_v46, %v2695_v12 }
 0x412   : > { %v2713_v22 = vcombine.high %v2647_v37, %v2663_v31  ;;  %v2769_v48 = vcombine.high %v9414_v57, %v9433_v27 }
 0x413   : > { %v2736_v7 = vrot.slane %v2728_v63, %v8233_v4  ;;  %v2743_v0 = vrot.slane %v2729_v28, %v8233_v4  ;;  %v2752_v50 = vrot.slane %v2744_v11, %v8233_v4  ;;  %v2759_v3 = vrot.slane %v2745_v42, %v8233_v4 }
 0x414   : > { %v9444_v26 = vpop.permute.xlu1 %2617  ;;  %v2627_v62 = vpop.permute.xlu0 %2626  ;;  %v2727_v18 = vrot.slane %v2713_v22, %v8233_v4  ;;  %v2783_v28 = vrot.slane %v2769_v48, %v8058_v32 }
 0x415   : > { %v2760_v40 = vcombine.low %v2704_v16, %v2736_v7  ;;  %v2784_v15 = vcombine.low %v9438_v9, %v9444_v26  ;;  %v2761_v13 = vcombine.high %v2704_v16, %v2736_v7  ;;  %v2800_v8 = vcombine.low %v9441_v35, %v2627_v62 }
 0x416   : > { %v2762_v36 = vcombine.low %v2711_v21, %v2743_v0  ;;  %v2763_v24 = vcombine.high %v2711_v21, %v2743_v0  ;;  %v2764_v2 = vcombine.low %v2720_v60, %v2752_v50  ;;  %v2801_v5 = vcombine.high %v9441_v35, %v2627_v62 }
 0x417   : > { %v2906_v33 = vsel %vm9447_vm12, %v2760_v40, 0.0  ;;  %v2792_v45 = vrot.slane %v2784_v15, %v8058_v32  ;;  %v2908_v38 = vsel %vm9447_vm12, %v2761_v13, 0.0  ;;  %v2808_v19 = vrot.slane %v2800_v8, %v8058_v32 }
 0x418   : > { %v2624_v20 = vpop.permute.xlu1 %2623  ;;  %2962 = vrot.lane.b32.xlu0 %v2906_v33, %s7776_s12  ;;  %v2910_v23 = vsel %vm9447_vm12, %v2762_v36, 0.0  ;;  %v2912_v29 = vsel %vm9447_vm12, %v2763_v24, 0.0  ;;  %v2785_v43 = vcombine.high %v9438_v9, %v9444_v26  ;;  %v2914_v9 = vsel %vm9447_vm12, %v2764_v2, 0.0 }
 0x419   : > { %v2832_v41 = vcombine.low %v2776_v25, %v2792_v45  ;;  %v2833_v51 = vcombine.high %v2776_v25, %v2792_v45  ;;  %v2765_v35 = vcombine.high %v2720_v60, %v2752_v50  ;;  %v2815_v7 = vrot.slane %v2801_v5, %v8058_v32 }
 0x41a   : > { %v2799_v57 = vrot.slane %v2785_v43, %v8058_v32  ;;  %v2766_v61 = vcombine.low %v2727_v18, %v2759_v3 }
 0x41b   : > { %v2840_v44 = vrot.slane %v2832_v41, %v8233_v4  ;;  %v2847_v27 = vrot.slane %v2833_v51, %v8233_v4  ;;  %v2916_v1 = vsel %vm9447_vm12, %v2765_v35, 0.0 }
 0x41c   : > { %v2630_v30 = vpop.permute.xlu1 %2629  ;;  %2966 = vrot.lane.b32.xlu0 %v2908_v38, %s7776_s12  ;;  %v2848_v40 = vcombine.low %v2783_v28, %v2799_v57  ;;  %v2918_v62 = vsel %vm9447_vm12, %v2766_v61, 0.0  ;;  %v2849_v12 = vcombine.high %v2783_v28, %v2799_v57 }
 0x41d   : > { %v2816_v34 = vcombine.low %v2624_v20, %v2630_v30  ;;  %v2817_v53 = vcombine.high %v2624_v20, %v2630_v30  ;;  %v2767_v20 = vcombine.high %v2727_v18, %v2759_v3 }
 0x41e   : > { %v2856_v33 = vrot.slane %v2848_v40, %v8233_v4  ;;  %v2863_v31 = vrot.slane %v2849_v12, %v8233_v4 }
 0x41f   : > { %v2824_v52 = vrot.slane %v2816_v34, %v8058_v32  ;;  %v2831_v59 = vrot.slane %v2817_v53, %v8058_v32  ;;  %v2920_v37 = vsel %vm9447_vm12, %v2767_v20, 0.0 }
 0x420   : > { %2970 = vrot.lane.b32.xlu0 %v2910_v23, %s7776_s12 }
 0x421   : > { %v2864_v47 = vcombine.low %v2808_v19, %v2824_v52  ;;  %v2865_v58 = vcombine.high %v2808_v19, %v2824_v52  ;;  %v2880_v26 = vcombine.low %v2815_v7, %v2831_v59  ;;  %v2881_v13 = vcombine.high %v2815_v7, %v2831_v59 }
 0x423   : > { %v2872_v49 = vrot.slane %v2864_v47, %v8233_v4  ;;  %v2879_v54 = vrot.slane %v2865_v58, %v8233_v4  ;;  %v2888_v46 = vrot.slane %v2880_v26, %v8233_v4  ;;  %v2895_v45 = vrot.slane %v2881_v13, %v8233_v4 }
 0x424   : > { %2974 = vrot.lane.b32.xlu0 %v2912_v29, %s7776_s12 }
 0x425   : > { %v2896_v10 = vcombine.low %v2840_v44, %v2872_v49  ;;  %v2897_v55 = vcombine.high %v2840_v44, %v2872_v49  ;;  %v2898_v6 = vcombine.low %v2847_v27, %v2879_v54  ;;  %v2899_v15 = vcombine.high %v2847_v27, %v2879_v54 }
 0x426   : > { %v2900_v14 = vcombine.low %v2856_v33, %v2888_v46  ;;  %v2901_v8 = vcombine.high %v2856_v33, %v2888_v46  ;;  %v2902_v30 = vcombine.low %v2863_v31, %v2895_v45  ;;  %v2903_v36 = vcombine.high %v2863_v31, %v2895_v45 }
 0x427   : > { %v2907_v63 = vsel %vm9447_vm12, %v2896_v10, 0.0  ;;  %v2909_v16 = vsel %vm9447_vm12, %v2897_v55, 0.0  ;;  %v2911_v39 = vsel %vm9447_vm12, %v2898_v6, 0.0  ;;  %v2913_v0 = vsel %vm9447_vm12, %v2899_v15, 0.0 }
 0x428   : > { %2964 = vrot.lane.b32.xlu1 %v2907_v63, %s7776_s12  ;;  %2978 = vrot.lane.b32.xlu0 %v2914_v9, %s7776_s12  ;;  %v2915_v21 = vsel %vm9447_vm12, %v2900_v14, 0.0  ;;  %v2917_v11 = vsel %vm9447_vm12, %v2901_v8, 0.0  ;;  %v2919_v38 = vsel %vm9447_vm12, %v2902_v30, 0.0  ;;  %v2921_v25 = vsel %vm9447_vm12, %v2903_v36, 0.0 }
 0x42c   : > { %2968 = vrot.lane.b32.xlu1 %v2909_v16, %s7776_s12  ;;  %2982 = vrot.lane.b32.xlu0 %v2916_v1, %s7776_s12 }
 0x430   : > { %2972 = vrot.lane.b32.xlu1 %v2911_v39, %s7776_s12  ;;  %2986 = vrot.lane.b32.xlu0 %v2918_v62, %s7776_s12 }
 0x434   : > { %2976 = vrot.lane.b32.xlu1 %v2913_v0, %s7776_s12  ;;  %2990 = vrot.lane.b32.xlu0 %v2920_v37, %s7776_s12 }
 0x438   : > { %2980 = vrot.lane.b32.xlu1 %v2915_v21, %s7776_s12 }
 0x43c   : > { %2984 = vrot.lane.b32.xlu1 %v2917_v11, %s7776_s12 }
 0x440   : > { %2988 = vrot.lane.b32.xlu1 %v2919_v38, %s7776_s12 }
 0x444   : > { %2992 = vrot.lane.b32.xlu1 %v2921_v25, %s7776_s12 }
 0x48a   : > { %v2963_v34 = vpop.permute.xlu0 %2962 }
 0x48b   : > { %3010 = vst.msk [vmem:[#allocation4 + $0x1] sm:$0xff] %vm309_vm2, %v2963_v34 }
 0x48e   : > { %v2967_v17 = vpop.permute.xlu0 %2966 }
 0x48f   : > { %3012 = vst.msk [vmem:[#allocation4 + $0x19] sm:$0xff] %vm309_vm2, %v2967_v17 }
 0x492   : > { %v2971_v19 = vpop.permute.xlu0 %2970  ;;  %v9537_v41 = vld [vmem:[#allocation4] sm:$0xff] }
 0x493   : > { %3014 = vst.msk [vmem:[#allocation4 + $0x31] sm:$0xff] %vm309_vm2, %v2971_v19  ;;  %3418 = vrot.lane.b32.xlu1 %v9537_v41, %s7778_s20  ;;  %v9550_v60 = vld [vmem:[#allocation4 + $0x1] sm:$0xff] }
 0x496   : > { %v2975_v52 = vpop.permute.xlu0 %2974  ;;  %v9542_v23 = vld [vmem:[#allocation4 + $0x18] sm:$0xff] }
 0x497   : > { %3016 = vst.msk [vmem:[#allocation4 + $0x49] sm:$0xff] %vm309_vm2, %v2975_v52  ;;  %3422 = vrot.lane.b32.xlu1 %v9542_v23, %s7778_s20  ;;  %v9568_v43 = vld [vmem:[#allocation4 + $0x19] sm:$0xff] }
 0x49a   : > { %v2965_v24 = vpop.permute.xlu1 %2964  ;;  %v2979_v50 = vpop.permute.xlu0 %2978  ;;  %v9548_v47 = vld [vmem:[#allocation4 + $0x30] sm:$0xff] }
 0x49b   : > { %3011 = vst.msk [vmem:[#allocation4 + $0x9] sm:$0xff] %vm309_vm2, %v2965_v24  ;;  %v9552_v53 = vld [vmem:[#allocation4 + $0x31] sm:$0xff]  ;;  %3018 = vst.msk [vmem:[#allocation4 + $0x61] sm:$0xff] %vm309_vm2, %v2979_v50  ;;  %3426 = vrot.lane.b32.xlu1 %v9548_v47, %s7778_s20  ;;  %v3042_v58 = vcombine.low %v9537_v41, %v9548_v47  ;;  %v3043_v44 = vcombine.high %v9537_v41, %v9548_v47 }
 0x49c   : > { %v4250_v49 = vcombine.low %v9550_v60, %v9552_v53  ;;  %v4251_v42 = vcombine.high %v9550_v60, %v9552_v53 }
 0x49d   : > { %v3050_v63 = vrot.slane %v3042_v58, %v8058_v32  ;;  %v3057_v55 = vrot.slane %v3043_v44, %v8058_v32 }
 0x49e   : > { %v2969_v29 = vpop.permute.xlu1 %2968  ;;  %v2983_v2 = vpop.permute.xlu0 %2982  ;;  %v9566_v5 = vld [vmem:[#allocation4 + $0x48] sm:$0xff]  ;;  %v4258_v18 = vrot.slane %v4250_v49, %v8058_v32  ;;  %v4265_v28 = vrot.slane %v4251_v42, %v8058_v32 }
 0x49f   : > { %3013 = vst.msk [vmem:[#allocation4 + $0x21] sm:$0xff] %vm309_vm2, %v2969_v29  ;;  %v9570_v51 = vld [vmem:[#allocation4 + $0x49] sm:$0xff]  ;;  %3020 = vst.msk [vmem:[#allocation4 + $0x79] sm:$0xff] %vm309_vm2, %v2983_v2  ;;  %3430 = vrot.lane.b32.xlu0 %v9566_v5, %s7778_s20  ;;  %v3058_v10 = vcombine.low %v9542_v23, %v9566_v5  ;;  %v3059_v22 = vcombine.high %v9542_v23, %v9566_v5 }
 0x4a0   : > { %v4266_v48 = vcombine.low %v9568_v43, %v9570_v51  ;;  %v4267_v59 = vcombine.high %v9568_v43, %v9570_v51 }
 0x4a1   : > { %v3066_v9 = vrot.slane %v3058_v10, %v8058_v32  ;;  %v3073_v35 = vrot.slane %v3059_v22, %v8058_v32 }
 0x4a2   : > { %v2973_v54 = vpop.permute.xlu1 %2972  ;;  %v4274_v3 = vrot.slane %v4266_v48, %v8058_v32  ;;  %v9589_v7 = vrot.slane %v4267_v59, %v8058_v32  ;;  %v2987_v57 = vpop.permute.xlu0 %2986  ;;  %v9592_v27 = vld [vmem:[#allocation4 + $0x60] sm:$0xff]  ;;  %v9626_v11 = vld [vmem:[#allocation4 + $0x8] sm:$0xff] }
 0x4a3   : > { %3015 = vst.msk [vmem:[#allocation4 + $0x39] sm:$0xff] %vm309_vm2, %v2973_v54  ;;  %3022 = vst.msk [vmem:[#allocation4 + $0x91] sm:$0xff] %vm309_vm2, %v2987_v57  ;;  %3434 = vrot.lane.b32.xlu1 %v9592_v27, %s7778_s20  ;;  %v3107_v26 = vcombine.high %v3050_v63, %v3066_v9  ;;  %v3122_v16 = vcombine.low %v3057_v55, %v3073_v35  ;;  %v3123_v6 = vcombine.high %v3057_v55, %v3073_v35  ;;  %v9610_v0 = vld [vmem:[#allocation4 + $0x61] sm:$0xff] }
 0x4a4   : > { %v3106_v1 = vcombine.low %v3050_v63, %v3066_v9  ;;  %v4315_v61 = vcombine.high %v4258_v18, %v4274_v3  ;;  %v4330_v40 = vcombine.low %v4265_v28, %v9589_v7  ;;  %v4314_v39 = vcombine.low %v4258_v18, %v4274_v3 }
 0x4a5   : > { %v4331_v15 = vcombine.high %v4265_v28, %v9589_v7  ;;  %v9631_v38 = vrot.slane %v3107_v26, %v8233_v4  ;;  %v9634_v36 = vrot.slane %v3122_v16, %v8233_v4  ;;  %v9637_v25 = vrot.slane %v3123_v6, %v8233_v4 }
 0x4a6   : > { %v2977_v46 = vpop.permute.xlu1 %2976  ;;  %v2991_v62 = vpop.permute.xlu0 %2990  ;;  %v9602_v20 = vld [vmem:[#allocation4 + $0x78] sm:$0xff]  ;;  %v9649_v24 = vrot.slane %v3106_v1, %v8233_v4  ;;  %v9652_v50 = vrot.slane %v4315_v61, %v8233_v4  ;;  %v9655_v58 = vrot.slane %v4330_v40, %v8233_v4  ;;  %v9661_v44 = vld [vmem:[#allocation4 + $0x20] sm:$0xff]  ;;  %v9675_v22 = vrot.slane %v4314_v39, %v8233_v4 }
 0x4a7   : > { %3017 = vst.msk [vmem:[#allocation4 + $0x51] sm:$0xff] %vm309_vm2, %v2977_v46  ;;  %3024 = vst.msk [vmem:[#allocation4 + $0xa9] sm:$0xff] %vm309_vm2, %v2991_v62  ;;  %3438 = vrot.lane.b32.xlu0 %v9602_v20, %s7778_s20  ;;  %v9642_v17 = vld [vmem:[#allocation4 + $0x79] sm:$0xff]  ;;  %v9690_v7 = vrot.slane %v4331_v15, %v8233_v4  ;;  %v10053_v56 = vld [vmem:[#allocation4 + $0x22] sm:$0xff] }
 0x4a8   : > { %12051 = vst [vmem:[#allocation19_spill] sm:$0xff] %v9649_v24  ;;  %12052 = vst [vmem:[#allocation15_spill] sm:$0xff] %v9652_v50 }
 0x4a9   : > { %12053 = vst [vmem:[#allocation16_spill] sm:$0xff] %v9655_v58  ;;  %12054 = vst [vmem:[#allocation24_spill] sm:$0xff] %v9675_v22 }
 0x4aa   : > { %v2981_v33 = vpop.permute.xlu1 %2980  ;;  %v9608_v13 = vld [vmem:[#allocation4 + $0x90] sm:$0xff]  ;;  %v9616_v37 = vld [vmem:[#allocation4 + $0x38] sm:$0xff]  ;;  %12055 = vst [vmem:[#allocation17_spill] sm:$0xff] %v9690_v7 }
 0x4ab   : > { %3019 = vst.msk [vmem:[#allocation4 + $0x69] sm:$0xff] %vm309_vm2, %v2981_v33  ;;  %v9612_v14 = vld [vmem:[#allocation4 + $0x91] sm:$0xff]  ;;  %3442 = vrot.lane.b32.xlu1 %v9608_v13, %s7778_s20  ;;  %v3074_v12 = vcombine.low %v9592_v27, %v9608_v13  ;;  %v3075_v21 = vcombine.high %v9592_v27, %v9608_v13  ;;  %v3178_v52 = vcombine.low %v9626_v11, %v9616_v37 }
 0x4ac   : > { %v4282_v8 = vcombine.low %v9610_v0, %v9612_v14  ;;  %v4283_v45 = vcombine.high %v9610_v0, %v9612_v14  ;;  %v3179_v35 = vcombine.high %v9626_v11, %v9616_v37 }
 0x4ad   : > { %v3082_v2 = vrot.slane %v3074_v12, %v8058_v32  ;;  %v3089_v63 = vrot.slane %v3075_v21, %v8058_v32  ;;  %v9684_v9 = vrot.slane %v3178_v52, %v8058_v32 }
 0x4ae   : > { %v2985_v31 = vpop.permute.xlu1 %2984  ;;  %v9628_v30 = vld [vmem:[#allocation4 + $0x50] sm:$0xff]  ;;  %v9640_v34 = vld [vmem:[#allocation4 + $0xa8] sm:$0xff]  ;;  %v4290_v6 = vrot.slane %v4282_v8, %v8058_v32  ;;  %v4297_v1 = vrot.slane %v4283_v45, %v8058_v32 }
 0x4af   : > { %3021 = vst.msk [vmem:[#allocation4 + $0x81] sm:$0xff] %vm309_vm2, %v2985_v31  ;;  %v9644_v19 = vld [vmem:[#allocation4 + $0xa9] sm:$0xff]  ;;  %3842 = vrot.lane.b32.xlu1 %v9537_v41, %s7779_s22  ;;  %3446 = vrot.lane.b32.xlu0 %v9640_v34, %s7778_s20  ;;  %v3090_v49 = vcombine.low %v9602_v20, %v9640_v34  ;;  %v3091_v42 = vcombine.high %v9602_v20, %v9640_v34 }
 0x4b0   : > { %v4298_v29 = vcombine.low %v9642_v17, %v9644_v19  ;;  %v3194_v10 = vcombine.low %v9661_v44, %v9628_v30  ;;  %v4299_v41 = vcombine.high %v9642_v17, %v9644_v19  ;;  %v3195_v54 = vcombine.high %v9661_v44, %v9628_v30 }
 0x4b1   : > { %v3098_v59 = vrot.slane %v3090_v49, %v8058_v32  ;;  %v3105_v55 = vrot.slane %v3091_v42, %v8058_v32 }
 0x4b2   : > { %v2989_v48 = vpop.permute.xlu1 %2988  ;;  %v4306_v3 = vrot.slane %v4298_v29, %v8058_v32  ;;  %v9697_v26 = vrot.slane %v3194_v10, %v8058_v32  ;;  %v4313_v62 = vrot.slane %v4299_v41, %v8058_v32  ;;  %v9735_v52 = vld [vmem:[#allocation4 + $0x68] sm:$0xff] }
 0x4b3   : > { %3023 = vst.msk [vmem:[#allocation4 + $0x99] sm:$0xff] %vm309_vm2, %v2989_v48  ;;  %3850 = vrot.lane.b32.xlu1 %v9548_v47, %s7779_s22  ;;  %3846 = vrot.lane.b32.xlu0 %v9542_v23, %s7779_s22  ;;  %v3139_v57 = vcombine.high %v3082_v2, %v3098_v59  ;;  %v3154_v18 = vcombine.low %v3089_v63, %v3105_v55 }
 0x4b4   : > { %v3155_v28 = vcombine.high %v3089_v63, %v3105_v55  ;;  %v3138_v16 = vcombine.low %v3082_v2, %v3098_v59  ;;  %v3209_v23 = vrot.slane %v3195_v54, %v8058_v32  ;;  %v4347_v46 = vcombine.high %v4290_v6, %v4306_v3 }
 0x4b5   : > { %v9702_v40 = vrot.slane %v3139_v57, %v8233_v4  ;;  %v9705_v47 = vrot.slane %v3154_v18, %v8233_v4  ;;  %v4346_v33 = vcombine.low %v4290_v6, %v4306_v3  ;;  %v4362_v42 = vcombine.low %v4297_v1, %v4313_v62 }
 0x4b6   : > { %v2993_v61 = vpop.permute.xlu1 %2992  ;;  %v9709_v39 = vrot.slane %v3155_v28, %v8233_v4  ;;  %v9713_v15 = vrot.slane %v3138_v16, %v8233_v4  ;;  %v9729_v31 = vrot.slane %v4347_v46, %v8233_v4  ;;  %v4363_v10 = vcombine.high %v4297_v1, %v4313_v62  ;;  %v9767_v28 = vld [vmem:[#allocation4 + $0x80] sm:$0xff] }
 0x4b7   : > { %3025 = vst.msk [vmem:[#allocation4 + $0xb1] sm:$0xff] %vm309_vm2, %v2993_v61  ;;  %3858 = vrot.lane.b32.xlu1 %v9592_v27, %s7779_s22  ;;  %3854 = vrot.lane.b32.xlu0 %v9566_v5, %s7779_s22  ;;  %v3172_v12 = vcombine.low %v9631_v38, %v9702_v40  ;;  %v3174_v21 = vcombine.low %v9634_v36, %v9705_v47 }
 0x4b8   : > { %12056 = vst [vmem:[#allocation18_spill] sm:$0xff] %v9713_v15  ;;  %v3176_v8 = vcombine.low %v9637_v25, %v9709_v39  ;;  %v3171_v45 = vcombine.high %v9649_v24, %v9713_v15  ;;  %12057 = vst [vmem:[#allocation23_spill] sm:$0xff] %v9729_v31  ;;  %v3173_v27 = vcombine.high %v9631_v38, %v9702_v40  ;;  %v7633_v40 = vld [vmem:[#allocation4 + $0x22] ss:$48 sps:$4 sm:$0xff]  }
 0x4b9   : > { %v3175_v5 = vcombine.high %v9634_v36, %v9705_v47  ;;  %v3177_v29 = vcombine.high %v9637_v25, %v9709_v39  ;;  %v9742_v2 = vrot.slane %v4346_v33, %v8233_v4  ;;  %v9757_v55 = vrot.slane %v4362_v42, %v8233_v4  ;;  %v7641_v47 = vld [vmem:[#allocation4 + $0x1a] ss:$48 sps:$4 sm:$0xff]   ;;  %v10068_v15 = vld [vmem:[#allocation4 + $0x2] sm:$0xff]  ;;  %v10070_v24 = vld [vmem:[#allocation4 + $0x52] sm:$0xff] }
 0x4ba   : > { %v9737_v49 = vld [vmem:[#allocation4 + $0x98] sm:$0xff]  ;;  %v9762_v3 = vrot.slane %v4363_v10, %v8233_v4  ;;  %v3243_v57 = vcombine.high %v9684_v9, %v9697_v26  ;;  %v3193_v18 = vrot.slane %v3179_v35, %v8058_v32  ;;  %v3242_v33 = vcombine.low %v9684_v9, %v9697_v26 }
 0x4bb   : > { %12058 = vst [vmem:[#allocation31_spill] sm:$0xff] %v9742_v2  ;;  %v3210_v41 = vcombine.low %v9735_v52, %v9737_v49  ;;  %v3211_v48 = vcombine.high %v9735_v52, %v9737_v49  ;;  %3866 = vrot.lane.b32.xlu1 %v9608_v13, %s7779_s22  ;;  %3862 = vrot.lane.b32.xlu0 %v9602_v20, %s7779_s22  ;;  %12059 = vst [vmem:[#allocation28_spill] sm:$0xff] %v9757_v55  ;;  %v7623_v38 = vld [vmem:[#allocation4 + $0x69] ss:$48 sps:$4 sm:$0xff]  }
 0x4bc   : > { %12060 = vst [vmem:[#allocation29_spill] sm:$0xff] %v9762_v3  ;;  %v3258_v46 = vcombine.low %v3193_v18, %v3209_v23  ;;  %v3259_v62 = vcombine.high %v3193_v18, %v3209_v23  ;;  %v3257_v16 = vrot.slane %v3243_v57, %v8233_v4  ;;  %v9801_v26 = vrot.slane %v3242_v33, %v8233_v4  ;;  %v7635_v36 = vld [vmem:[#allocation4 + $0x6a] ss:$48 sps:$4 sm:$0xff]  }
 0x4bd   : > { %v3218_v42 = vrot.slane %v3210_v41, %v8058_v32  ;;  %v3225_v1 = vrot.slane %v3211_v48, %v8058_v32 }
 0x4be   : > { %v9769_v13 = vld [vmem:[#allocation4 + $0xb0] sm:$0xff]  ;;  %v3273_v9 = vrot.slane %v3259_v62, %v8233_v4  ;;  %12061 = vst [vmem:[#allocation27_spill] sm:$0xff] %v9801_v26 }
 0x4bf   : > { %v3226_v61 = vcombine.low %v9767_v28, %v9769_v13  ;;  %v3227_v35 = vcombine.high %v9767_v28, %v9769_v13  ;;  %4626 = vrot.lane.b32.xlu1 %v9550_v60, %s7778_s20  ;;  %3870 = vrot.lane.b32.xlu0 %v9640_v34, %s7779_s22  ;;  %v3266_v34 = vrot.slane %v3258_v46, %v8233_v4  ;;  %v7625_v25 = vld [vmem:[#allocation4 + $0x81] ss:$48 sps:$4 sm:$0xff]  }
 0x4c0   : > { %v7637_v39 = vld [vmem:[#allocation4 + $0x82] ss:$48 sps:$4 sm:$0xff]   ;;  %v9856_v33 = vrot.slane %v7625_v25, %v8058_v32 }
 0x4c1   : > { %v3234_v10 = vrot.slane %v3226_v61, %v8058_v32  ;;  %v3241_v6 = vrot.slane %v3227_v35, %v8058_v32 }
 0x4c2   : > { %12067 = vst [vmem:[#allocation34_spill] sm:$0xff] %v9856_v33 }
 0x4c3   : > { %v3275_v54 = vcombine.high %v3218_v42, %v3234_v10  ;;  %v3290_v20 = vcombine.low %v3225_v1, %v3241_v6  ;;  %v3291_v63 = vcombine.high %v3225_v1, %v3241_v6  ;;  %v3274_v59 = vcombine.low %v3218_v42, %v3234_v10  ;;  %4634 = vrot.lane.b32.xlu1 %v9552_v53, %s7778_s20  ;;  %v7639_v10 = vld [vmem:[#allocation4 + $0x2] ss:$48 sps:$4 sm:$0xff]  }
 0x4c4   : > { %4630 = vrot.lane.b32.xlu0 %v9568_v43, %s7778_s20  ;;  %v9859_v42 = vrot.slane %v7637_v39, %v8058_v32 }
 0x4c5   : > { %v3289_v23 = vrot.slane %v3275_v54, %v8233_v4  ;;  %v3298_v41 = vrot.slane %v3290_v20, %v8233_v4  ;;  %v3305_v48 = vrot.slane %v3291_v63, %v8233_v4  ;;  %v9807_v57 = vrot.slane %v3274_v59, %v8233_v4 }
 0x4c6   : > { %12068 = vst [vmem:[#allocation36_spill] sm:$0xff] %v9859_v42 }
 0x4c7   : > { %12062 = vst [vmem:[#allocation26_spill] sm:$0xff] %v9807_v57  ;;  %v3308_v18 = vcombine.low %v3257_v16, %v3289_v23  ;;  %v3310_v6 = vcombine.low %v3266_v34, %v3298_v41  ;;  %v3312_v1 = vcombine.low %v3273_v9, %v3305_v48  ;;  %v3307_v61 = vcombine.high %v9801_v26, %v9807_v57 }
 0x4c8   : > { %4642 = vrot.lane.b32.xlu1 %v9610_v0, %s7778_s20  ;;  %4638 = vrot.lane.b32.xlu0 %v9570_v51, %s7778_s20  ;;  %v3309_v54 = vcombine.high %v3257_v16, %v3289_v23  ;;  %v3311_v35 = vcombine.high %v3266_v34, %v3298_v41  ;;  %v3313_v20 = vcombine.high %v3273_v9, %v3305_v48 }
 0x4c9   : > { %v9818_v59 = vpack.i.bf16 %v3308_v18, %v3172_v12  ;;  %v9823_v63 = vpack.i.bf16 %v3310_v6, %v3174_v21  ;;  %v9828_v46 = vpack.i.bf16 %v3312_v1, %v3176_v8  ;;  %v9833_v16 = vpack.i.bf16 %v3307_v61, %v3171_v45  ;;  %v7645_v8 = vld [vmem:[#allocation4 + $0x7a] ss:$48 sps:$4 sm:$0xff]   ;;  %v7621_v45 = vld [vmem:[#allocation4 + $0x21] ss:$48 sps:$4 sm:$0xff]  }
 0x4ca   : > { %v9838_v12 = vpack.i.bf16 %v3309_v54, %v3173_v27  ;;  %v9843_v21 = vpack.i.bf16 %v3311_v35, %v3175_v5  ;;  %v9845_v62 = vpack.i.bf16 %v3313_v20, %v3177_v29  ;;  %v7643_v27 = vld [vmem:[#allocation4 + $0x62] ss:$48 sps:$4 sm:$0xff]   ;;  %v7619_v5 = vld [vmem:[#allocation4 + $0x9] ss:$48 sps:$4 sm:$0xff]   ;;  %v9862_v34 = vrot.slane %v7645_v8, %v8058_v32 }
 0x4cb   : > { %12063 = vst [vmem:[#allocation32_spill] sm:$0xff] %v9833_v16  ;;  %v7631_v29 = vld [vmem:[#allocation4 + $0xa] ss:$48 sps:$4 sm:$0xff]   ;;  %v9868_v9 = vrot.slane %v7623_v38, %v8058_v32  ;;  %v9871_v23 = vrot.slane %v7633_v40, %v8058_v32  ;;  %v9878_v41 = vrot.slane %v7635_v36, %v8058_v32  ;;  %v9881_v48 = vrot.slane %v7641_v47, %v8058_v32 }
 0x4cc   : > { %12064 = vst [vmem:[#allocation30_spill] sm:$0xff] %v9838_v12  ;;  %12065 = vst [vmem:[#allocation20_spill] sm:$0xff] %v9843_v21  ;;  %4650 = vrot.lane.b32.xlu1 %v9612_v14, %s7778_s20  ;;  %4646 = vrot.lane.b32.xlu0 %v9642_v17, %s7778_s20  ;;  %v9884_v18 = vrot.slane %v7643_v27, %v8058_v32  ;;  %v9887_v6 = vrot.slane %v7619_v5, %v8058_v32  ;;  %v10051_v47 = vld [vmem:[#allocation4 + $0x9a] sm:$0xff] }
 0x4cd   : > { %12066 = vst [vmem:[#allocation33_spill] sm:$0xff] %v9845_v62  ;;  %12069 = vst [vmem:[#allocation35_spill] sm:$0xff] %v9862_v34  ;;  %v9890_v1 = vrot.slane %v7631_v29, %v8058_v32  ;;  %v9897_v61 = vrot.slane %v7639_v10, %v8058_v32 }
 0x4ce   : > { %12070 = vst [vmem:[#allocation21_spill] sm:$0xff] %v9868_v9  ;;  %12071 = vst [vmem:[#allocation22_spill] sm:$0xff] %v9871_v23  ;;  %v5554_v54 = vcombine.low %v9884_v18, %v9862_v34 }
 0x4cf   : > { %12072 = vst [vmem:[#allocation37_spill] sm:$0xff] %v9878_v41  ;;  %12073 = vst [vmem:[#allocation38_spill] sm:$0xff] %v9881_v48  ;;  %v5658_v20 = vcombine.low %v9890_v1, %v9871_v23  ;;  %v5522_v25 = vcombine.low %v9897_v61, %v9881_v48 }
 0x4d0   : > { %5050 = vrot.lane.b32.xlu1 %v9550_v60, %s7779_s22  ;;  %4654 = vrot.lane.b32.xlu0 %v9644_v19, %s7778_s20  ;;  %v9865_v60 = vrot.slane %v7621_v45, %v8058_v32  ;;  %12074 = vst [vmem:[#allocation39_spill] sm:$0xff] %v9884_v18  ;;  %12075 = vst [vmem:[#allocation40_spill] sm:$0xff] %v9890_v1  ;;  %v10087_v18 = vld [vmem:[#allocation4 + $0x82] sm:$0xff] }
 0x4d1   : > { %12076 = vst [vmem:[#allocation41_spill] sm:$0xff] %v9897_v61  ;;  %v9932_v40 = vrot.slane %v5658_v20, %v8233_v4  ;;  %v9935_v36 = vrot.slane %v5522_v25, %v8233_v4  ;;  %v10011_v20 = vld [vmem:[#allocation4 + $0x3a] sm:$0xff] }
 0x4d2   : > { %v4450_v35 = vcombine.low %v9887_v6, %v9865_v60 }
 0x4d3   : > { %12081 = vst [vmem:[#allocation46_spill] sm:$0xff] %v9932_v40  ;;  %12082 = vst [vmem:[#allocation47_spill] sm:$0xff] %v9935_v36  ;;  %v10101_v36 = vld [vmem:[#allocation4 + $0xb2] sm:$0xff] }
 0x4d4   : > { %5058 = vrot.lane.b32.xlu1 %v9552_v53, %s7779_s22  ;;  %5054 = vrot.lane.b32.xlu0 %v9568_v43, %s7779_s22  ;;  %v4482_v53 = vcombine.low %v9868_v9, %v9856_v33  ;;  %v5690_v43 = vcombine.low %v9878_v41, %v9859_v42  ;;  %v9929_v38 = vrot.slane %v4450_v35, %v8233_v4 }
 0x4d6   : > { %v9912_v39 = vrot.slane %v4482_v53, %v8233_v4  ;;  %v9915_v8 = vrot.slane %v5690_v43, %v8233_v4  ;;  %12080 = vst [vmem:[#allocation45_spill] sm:$0xff] %v9929_v38  ;;  %v10002_v43 = vld [vmem:[#allocation4 + $0xa] sm:$0xff]  ;;  %v10120_v38 = vld [vmem:[#allocation4 + $0x92] sm:$0xff] }
 0x4d8   : > { %5066 = vrot.lane.b32.xlu1 %v9610_v0, %s7779_s22  ;;  %5062 = vrot.lane.b32.xlu0 %v9570_v51, %s7779_s22  ;;  %12077 = vst [vmem:[#allocation42_spill] sm:$0xff] %v9912_v39  ;;  %12078 = vst [vmem:[#allocation43_spill] sm:$0xff] %v9915_v8  ;;  %v9918_v0 = vrot.slane %v5554_v54, %v8233_v4  ;;  %v10099_v8 = vld [vmem:[#allocation4 + $0x62] sm:$0xff]  ;;  %v10122_v39 = vld [vmem:[#allocation4 + $0x1a] sm:$0xff] }
 0x4da   : > { %12079 = vst [vmem:[#allocation44_spill] sm:$0xff] %v9918_v0  ;;  %v10085_v0 = vld [vmem:[#allocation4 + $0x32] sm:$0xff] }
 0x4dc   : > { %5074 = vrot.lane.b32.xlu1 %v9612_v14, %s7779_s22  ;;  %5070 = vrot.lane.b32.xlu0 %v9642_v17, %s7779_s22 }
 0x4e0   : > { %3428 = vrot.lane.b32.xlu1 %v9616_v37, %s7778_s20  ;;  %5078 = vrot.lane.b32.xlu0 %v9644_v19, %s7779_s22  ;;  %v4603_v19 = vld [vmem:[#allocation4 + $0x69] sm:$0xff] }
 0x4e4   : > { %3436 = vrot.lane.b32.xlu1 %v9735_v52, %s7778_s20  ;;  %3420 = vrot.lane.b32.xlu0 %v9626_v11, %s7778_s20 }
 0x4e8   : > { %3444 = vrot.lane.b32.xlu1 %v9737_v49, %s7778_s20  ;;  %3424 = vrot.lane.b32.xlu0 %v9661_v44, %s7778_s20 }
 0x4ec   : > { %3844 = vrot.lane.b32.xlu1 %v9626_v11, %s7779_s22  ;;  %3432 = vrot.lane.b32.xlu0 %v9628_v30, %s7778_s20  ;;  %v4595_v11 = vld [vmem:[#allocation4 + $0x9] sm:$0xff] }
 0x4f0   : > { %3852 = vrot.lane.b32.xlu1 %v9616_v37, %s7779_s22  ;;  %3440 = vrot.lane.b32.xlu0 %v9767_v28, %s7778_s20  ;;  %v4599_v37 = vld [vmem:[#allocation4 + $0x39] sm:$0xff] }
 0x4f4   : > { %3860 = vrot.lane.b32.xlu1 %v9735_v52, %s7779_s22  ;;  %3448 = vrot.lane.b32.xlu0 %v9769_v13, %s7778_s20  ;;  %v4607_v52 = vld [vmem:[#allocation4 + $0x99] sm:$0xff] }
 0x4f8   : > { %3868 = vrot.lane.b32.xlu1 %v9737_v49, %s7779_s22  ;;  %3848 = vrot.lane.b32.xlu0 %v9661_v44, %s7779_s22  ;;  %v4597_v44 = vld [vmem:[#allocation4 + $0x21] sm:$0xff] }
 0x4fc   : > { %4628 = vrot.lane.b32.xlu1 %v4595_v11, %s7778_s20  ;;  %3856 = vrot.lane.b32.xlu0 %v9628_v30, %s7779_s22  ;;  %v4601_v30 = vld [vmem:[#allocation4 + $0x51] sm:$0xff] }
 0x500   : > { %4636 = vrot.lane.b32.xlu1 %v4599_v37, %s7778_s20  ;;  %3864 = vrot.lane.b32.xlu0 %v9767_v28, %s7779_s22  ;;  %v4605_v28 = vld [vmem:[#allocation4 + $0x81] sm:$0xff] }
 0x504   : > { %4644 = vrot.lane.b32.xlu1 %v4603_v19, %s7778_s20  ;;  %3872 = vrot.lane.b32.xlu0 %v9769_v13, %s7779_s22  ;;  %v4609_v13 = vld [vmem:[#allocation4 + $0xb1] sm:$0xff] }
 0x505   : > { %v9984_v49 = vpop.permute.xlu1 %3418 }
 0x508   : > { %4652 = vrot.lane.b32.xlu1 %v4607_v52, %s7778_s20  ;;  %4632 = vrot.lane.b32.xlu0 %v4597_v44, %s7778_s20 }
 0x509   : > { %v9988_v5 = vpop.permute.xlu1 %3422 }
 0x50c   : > { %5052 = vrot.lane.b32.xlu1 %v4595_v11, %s7779_s22  ;;  %4640 = vrot.lane.b32.xlu0 %v4601_v30, %s7778_s20 }
 0x50d   : > { %v9994_v29 = vpop.permute.xlu1 %3426 }
 0x510   : > { %5060 = vrot.lane.b32.xlu1 %v4599_v37, %s7779_s22  ;;  %4648 = vrot.lane.b32.xlu0 %v4605_v28, %s7778_s20  ;;  %v3466_v37 = vcombine.low %v9984_v49, %v9994_v29 }
 0x511   : > { %v9998_v10 = vpop.permute.xlu0 %3430 }
 0x512   : > { %v3482_v25 = vcombine.low %v9988_v5, %v9998_v10  ;;  %v10043_v27 = vrot.slane %v3466_v37, %v8058_v32 }
 0x514   : > { %5068 = vrot.lane.b32.xlu1 %v4603_v19, %s7779_s22  ;;  %4656 = vrot.lane.b32.xlu0 %v4609_v13, %s7778_s20  ;;  %v10031_v17 = vrot.slane %v3482_v25, %v8058_v32 }
 0x515   : > { %v10000_v53 = vpop.permute.xlu1 %3434 }
 0x518   : > { %5076 = vrot.lane.b32.xlu1 %v4607_v52, %s7779_s22  ;;  %5056 = vrot.lane.b32.xlu0 %v4597_v44, %s7779_s22 }
 0x519   : > { %v10007_v54 = vpop.permute.xlu0 %3438 }
 0x51c   : > { %5836 = vrot.lane.b32.xlu1 %v10002_v43, %s7778_s20  ;;  %5064 = vrot.lane.b32.xlu0 %v4601_v30, %s7779_s22  ;;  %v10028_v30 = vld [vmem:[#allocation4 + $0x6a] sm:$0xff] }
 0x51d   : > { %v10009_v35 = vpop.permute.xlu1 %3442 }
 0x51e   : > { %v3498_v11 = vcombine.low %v10000_v53, %v10009_v35 }
 0x520   : > { %5844 = vrot.lane.b32.xlu1 %v10011_v20, %s7778_s20  ;;  %5072 = vrot.lane.b32.xlu0 %v4605_v28, %s7779_s22  ;;  %v10037_v28 = vrot.slane %v3498_v11, %v8058_v32 }
 0x521   : > { %v10022_v19 = vpop.permute.xlu1 %3842  ;;  %v10024_v52 = vpop.permute.xlu0 %3446 }
 0x522   : > { %v3514_v44 = vcombine.low %v10007_v54, %v10024_v52 }
 0x524   : > { %5852 = vrot.lane.b32.xlu1 %v10028_v30, %s7778_s20  ;;  %5080 = vrot.lane.b32.xlu0 %v4609_v13, %s7779_s22  ;;  %v10040_v14 = vrot.slane %v3514_v44, %v8058_v32  ;;  %v3530_v13 = vcombine.low %v10043_v27, %v10031_v17 }
 0x525   : > { %v10045_v51 = vpop.permute.xlu1 %3850  ;;  %v10047_v45 = vpop.permute.xlu0 %3846 }
 0x526   : > { %v3562_v25 = vcombine.low %v10037_v28, %v10040_v14  ;;  %v10073_v57 = vrot.slane %v3530_v13, %v8233_v4  ;;  %v3890_v41 = vcombine.low %v10022_v19, %v10045_v51 }
 0x528   : > { %5860 = vrot.lane.b32.xlu1 %v10051_v47, %s7778_s20  ;;  %5840 = vrot.lane.b32.xlu0 %v10053_v56, %s7778_s20  ;;  %v10062_v11 = vrot.slane %v3562_v25, %v8233_v4  ;;  %12084 = vst [vmem:[#allocation49_spill] sm:$0xff] %v10073_v57  ;;  %v10158_v57 = vld [vmem:[#allocation4 + $0x7a] sm:$0xff] }
 0x529   : > { %v10064_v37 = vpop.permute.xlu1 %3858  ;;  %v10066_v44 = vpop.permute.xlu0 %3854 }
 0x52a   : > { %12083 = vst [vmem:[#allocation48_spill] sm:$0xff] %v10062_v11  ;;  %v3906_v61 = vcombine.low %v10047_v45, %v10066_v44 }
 0x52c   : > { %5834 = vrot.lane.b32.xlu1 %v10068_v15, %s7778_s20  ;;  %5848 = vrot.lane.b32.xlu0 %v10070_v24, %s7778_s20  ;;  %v10125_v3 = vrot.slane %v3906_v61, %v8058_v32  ;;  %v10143_v61 = vld [vmem:[#allocation4 + $0x4a] sm:$0xff] }
 0x52d   : > { %v10079_v26 = vpop.permute.xlu1 %3866  ;;  %v10081_v25 = vpop.permute.xlu0 %3862 }
 0x52e   : > { %v3922_v48 = vcombine.low %v10064_v37, %v10079_v26 }
 0x530   : > { %5842 = vrot.lane.b32.xlu1 %v10085_v0, %s7778_s20  ;;  %5856 = vrot.lane.b32.xlu0 %v10087_v18, %s7778_s20  ;;  %v10128_v7 = vrot.slane %v3922_v48, %v8058_v32 }
 0x531   : > { %v10093_v13 = vpop.permute.xlu1 %4626  ;;  %v10095_v34 = vpop.permute.xlu0 %3870 }
 0x532   : > { %v3938_v40 = vcombine.low %v10081_v25, %v10095_v34 }
 0x534   : > { %5850 = vrot.lane.b32.xlu1 %v10099_v8, %s7778_s20  ;;  %5864 = vrot.lane.b32.xlu0 %v10101_v36, %s7778_s20  ;;  %v10114_v42 = vrot.slane %v3938_v40, %v8058_v32  ;;  %v10135_v40 = vrot.slane %v3890_v41, %v8058_v32 }
 0x535   : > { %v10116_v1 = vpop.permute.xlu1 %4634 }
 0x536   : > { %v10118_v23 = vpop.permute.xlu0 %4630  ;;  %v3986_v9 = vcombine.low %v10128_v7, %v10114_v42  ;;  %v3954_v48 = vcombine.low %v10135_v40, %v10125_v3 }
 0x538   : > { %5858 = vrot.lane.b32.xlu1 %v10120_v38, %s7778_s20  ;;  %5838 = vrot.lane.b32.xlu0 %v10122_v39, %s7778_s20  ;;  %v10152_v41 = vrot.slane %v3986_v9, %v8233_v4  ;;  %v10161_v11 = vrot.slane %v3954_v48, %v8233_v4 }
 0x53a   : > { %v10139_v33 = vpop.permute.xlu1 %4642  ;;  %v10141_v2 = vpop.permute.xlu0 %4638  ;;  %12086 = vst [vmem:[#allocation51_spill] sm:$0xff] %v10152_v41  ;;  %12087 = vst [vmem:[#allocation52_spill] sm:$0xff] %v10161_v11 }
 0x53b   : > { %12085 = vst [vmem:[#allocation50_spill] sm:$0xff] %v10139_v33  ;;  %v4690_v21 = vcombine.low %v10118_v23, %v10141_v2 }
 0x53c   : > { %6260 = vrot.lane.b32.xlu1 %v10002_v43, %s7779_s22  ;;  %5846 = vrot.lane.b32.xlu0 %v10143_v61, %s7778_s20  ;;  %v4674_v43 = vcombine.low %v10093_v13, %v10116_v1 }
 0x53d   : > { %v10184_v16 = vrot.slane %v4690_v21, %v8058_v32 }
 0x53e   : > { %v10154_v22 = vpop.permute.xlu1 %4650  ;;  %v10156_v62 = vpop.permute.xlu0 %4646  ;;  %v10197_v48 = vrot.slane %v4674_v43, %v8058_v32 }
 0x53f   : > { %v4706_v9 = vcombine.low %v10139_v33, %v10154_v22  ;;  %12088 = vst [vmem:[#allocation53_spill] sm:$0xff] %v10184_v16 }
 0x540   : > { %6268 = vrot.lane.b32.xlu1 %v10011_v20, %s7779_s22  ;;  %5854 = vrot.lane.b32.xlu0 %v10158_v57, %s7778_s20  ;;  %v10181_v20 = vld [vmem:[#allocation4 + $0xaa] sm:$0xff]  ;;  %12089 = vst [vmem:[#allocation54_spill] sm:$0xff] %v10197_v48 }
 0x541   : > { %v10191_v31 = vrot.slane %v4706_v9, %v8058_v32 }
 0x542   : > { %v10173_v55 = vpop.permute.xlu1 %5050  ;;  %v10175_v58 = vpop.permute.xlu0 %4654 }
 0x543   : > { %v4722_v12 = vcombine.low %v10156_v62, %v10175_v58 }
 0x544   : > { %6276 = vrot.lane.b32.xlu1 %v10028_v30, %s7779_s22  ;;  %5862 = vrot.lane.b32.xlu0 %v10181_v20, %s7778_s20  ;;  %v4738_v30 = vcombine.low %v10197_v48, %v10184_v16 }
 0x545   : > { %v10194_v50 = vrot.slane %v4722_v12, %v8058_v32 }
 0x546   : > { %v10199_v11 = vpop.permute.xlu1 %5058  ;;  %v10201_v41 = vpop.permute.xlu0 %5054  ;;  %v10219_v33 = vrot.slane %v4738_v30, %v8233_v4 }
 0x547   : > { %v4770_v21 = vcombine.low %v10191_v31, %v10194_v50  ;;  %v5098_v16 = vcombine.low %v10173_v55, %v10199_v11 }
 0x548   : > { %6284 = vrot.lane.b32.xlu1 %v10051_v47, %s7779_s22  ;;  %6264 = vrot.lane.b32.xlu0 %v10053_v56, %s7779_s22  ;;  %12091 = vst [vmem:[#allocation56_spill] sm:$0xff] %v10219_v33 }
 0x549   : > { %v10212_v12 = vrot.slane %v4770_v21, %v8233_v4 }
 0x54a   : > { %v10214_v9 = vpop.permute.xlu1 %5066  ;;  %v10216_v43 = vpop.permute.xlu0 %5062 }
 0x54b   : > { %12090 = vst [vmem:[#allocation55_spill] sm:$0xff] %v10212_v12  ;;  %v5114_v21 = vcombine.low %v10201_v41, %v10216_v43 }
 0x54c   : > { %6258 = vrot.lane.b32.xlu1 %v10068_v15, %s7779_s22  ;;  %6272 = vrot.lane.b32.xlu0 %v10070_v24, %s7779_s22 }
 0x54d   : > { %v10256_v33 = vrot.slane %v5114_v21, %v8058_v32  ;;  %v3923_v21 = vcombine.high %v10064_v37, %v10079_v26 }
 0x54e   : > { %v10225_v47 = vpop.permute.xlu1 %5074  ;;  %v10227_v48 = vpop.permute.xlu0 %5070 }
 0x54f   : > { %v5130_v15 = vcombine.low %v10214_v9, %v10225_v47 }
 0x550   : > { %6266 = vrot.lane.b32.xlu1 %v10085_v0, %s7779_s22  ;;  %6280 = vrot.lane.b32.xlu0 %v10087_v18, %s7779_s22  ;;  %v3483_v0 = vcombine.high %v9988_v5, %v9998_v10  ;;  %v3939_v18 = vcombine.high %v10081_v25, %v10095_v34  ;;  %v3467_v5 = vcombine.high %v9984_v49, %v9994_v29  ;;  %v7627_v34 = vld [vmem:[#allocation4 + $0xd] ss:$48 sps:$4 sm:$0xff]  }
 0x551   : > { %v10259_v12 = vrot.slane %v5130_v15, %v8058_v32  ;;  %v3907_v25 = vcombine.high %v10047_v45, %v10066_v44  ;;  %v3515_v45 = vcombine.high %v10007_v54, %v10024_v52  ;;  %v7629_v44 = vld [vmem:[#allocation4 + $0x6d] ss:$48 sps:$4 sm:$0xff]   ;;  %v7630_v52 = vld [vmem:[#allocation4 + $0x85] ss:$48 sps:$4 sm:$0xff]  }
 0x552   : > { %v10239_v24 = vpop.permute.xlu1 %3428  ;;  %v10241_v30 = vpop.permute.xlu0 %5078  ;;  %v10291_v26 = vrot.slane %v3939_v18, %v8058_v32  ;;  %v10310_v15 = vrot.slane %v3467_v5, %v8058_v32  ;;  %v3499_v18 = vcombine.high %v10000_v53, %v10009_v35  ;;  %v3955_v5 = vcombine.high %v10135_v40, %v10125_v3 }
 0x553   : > { %12092 = vst [vmem:[#allocation57_spill] sm:$0xff] %v10239_v24  ;;  %v5146_v56 = vcombine.low %v10227_v48, %v10241_v30  ;;  %v10313_v54 = vrot.slane %v3907_v25, %v8058_v32  ;;  %v10342_v3 = vrot.slane %v3515_v45, %v8058_v32  ;;  %v3563_v45 = vcombine.high %v10037_v28, %v10040_v14 }
 0x554   : > { %6274 = vrot.lane.b32.xlu1 %v10099_v8, %s7779_s22  ;;  %6288 = vrot.lane.b32.xlu0 %v10101_v36, %s7779_s22  ;;  %v4451_v36 = vcombine.high %v9887_v6, %v9865_v60  ;;  %v10286_v60 = vrot.slane %v3483_v0, %v8058_v32  ;;  %v3891_v6 = vcombine.high %v10022_v19, %v10045_v51  ;;  %v7628_v19 = vld [vmem:[#allocation4 + $0x25] ss:$48 sps:$4 sm:$0xff]  }
 0x555   : > { %v10262_v24 = vrot.slane %v5146_v56, %v8058_v32  ;;  %v10277_v56 = vrot.slane %v5098_v16, %v8058_v32  ;;  %v10307_v51 = vrot.slane %v7627_v34, %v8058_v32  ;;  %v3531_v0 = vcombine.high %v10043_v27, %v10031_v17 }
 0x556   : > { %v10266_v10 = vpop.permute.xlu1 %3436  ;;  %v10268_v8 = vpop.permute.xlu0 %3420  ;;  %v10304_v37 = vrot.slane %v4451_v36, %v8233_v4  ;;  %v3546_v36 = vcombine.low %v10310_v15, %v10286_v60  ;;  %v10334_v34 = vrot.slane %v3891_v6, %v8058_v32  ;;  %v10350_v40 = vrot.slane %v7628_v19, %v8058_v32 }
 0x557   : > { %v5194_v49 = vcombine.low %v10259_v12, %v10262_v24  ;;  %v5162_v16 = vcombine.low %v10277_v56, %v10256_v33  ;;  %v10375_v19 = vrot.slane %v3531_v0, %v8233_v4  ;;  %v5147_v14 = vcombine.high %v10227_v48, %v10241_v30  ;;  %v12098_v30 = vld [vmem:[#allocation50_spill] sm:$0xff] }
 0x558   : > { %6282 = vrot.lane.b32.xlu1 %v10120_v38, %s7779_s22  ;;  %6262 = vrot.lane.b32.xlu0 %v10122_v39, %s7779_s22  ;;  %v3987_v38 = vcombine.high %v10128_v7, %v10114_v42  ;;  %12093 = vst [vmem:[#allocation58_spill] sm:$0xff] %v10304_v37  ;;  %v10316_v7 = vrot.slane %v3923_v21, %v8058_v32 }
 0x559   : > { %v10319_v42 = vrot.slane %v5194_v49, %v8233_v4  ;;  %v10339_v17 = vrot.slane %v5162_v16, %v8233_v4  ;;  %v3970_v21 = vcombine.low %v10334_v34, %v10313_v54  ;;  %v10360_v49 = vrot.slane %v7630_v52, %v8058_v32 }
 0x55a   : > { %v10299_v29 = vpop.permute.xlu1 %3444  ;;  %v10301_v39 = vpop.permute.xlu0 %3424  ;;  %v4002_v27 = vcombine.low %v10316_v7, %v10291_v26  ;;  %v4001_v53 = vrot.slane %v3987_v38, %v8233_v4  ;;  %v10365_v16 = vrot.slane %v3499_v18, %v8058_v32  ;;  %v3969_v38 = vrot.slane %v3955_v5, %v8233_v4 }
 0x55b   : > { %12094 = vst [vmem:[#allocation59_spill] sm:$0xff] %v10319_v42  ;;  %12095 = vst [vmem:[#allocation60_spill] sm:$0xff] %v10339_v17  ;;  %v5115_v48 = vcombine.high %v10201_v41, %v10216_v43  ;;  %v5099_v41 = vcombine.high %v10173_v55, %v10199_v11  ;;  %v12102_v55 = vld [vmem:[#allocation23_spill] sm:$0xff] }
 0x55c   : > { %6270 = vrot.lane.b32.xlu0 %v10143_v61, %s7779_s22  ;;  %7305 = vrot.lane.b32.xlu1 %v9818_v59, %s7781_s23  ;;  %v10353_v61 = vrot.slane %v7629_v44, %v8058_v32  ;;  %12097 = vst [vmem:[#allocation62_spill] sm:$0xff] %v10360_v49  ;;  %v10378_v44 = vrot.slane %v3546_v36, %v8233_v4 }
 0x55d   : > { %v10381_v52 = vrot.slane %v4002_v27, %v8233_v4  ;;  %v4020_v5 = vcombine.low %v3969_v38, %v4001_v53  ;;  %v10398_v27 = vrot.slane %v3970_v21, %v8233_v4  ;;  %v4707_v21 = vcombine.high %v12098_v30, %v10154_v22 }
 0x55e   : > { %v10345_v35 = vpop.permute.xlu1 %3844  ;;  %v10347_v59 = vpop.permute.xlu0 %3432  ;;  %12096 = vst [vmem:[#allocation61_spill] sm:$0xff] %v10353_v61  ;;  %v10459_v30 = vrot.slane %v5099_v41, %v8058_v32 }
 0x55f   : > { %v4022_v43 = vcombine.low %v10398_v27, %v10381_v52 }
 0x560   : > { %6278 = vrot.lane.b32.xlu0 %v10158_v57, %s7779_s22  ;;  %7315 = vrot.lane.b32.xlu1 %v9823_v63, %s7782_s24  ;;  %v4691_v57 = vcombine.high %v10118_v23, %v10141_v2  ;;  %v4723_v63 = vcombine.high %v10156_v62, %v10175_v58  ;;  %v5131_v2 = vcombine.high %v10214_v9, %v10225_v47  ;;  %v12101_v47 = vld [vmem:[#allocation15_spill] sm:$0xff] }
 0x561   : > { %v10405_v23 = vrot.slane %v3563_v45, %v8233_v4  ;;  %v4675_v58 = vcombine.high %v10093_v13, %v10116_v1  ;;  %v4021_v62 = vcombine.high %v3969_v38, %v4001_v53  ;;  %v10418_v9 = vrot.slane %v5147_v14, %v8058_v32 }
 0x562   : > { %v10391_v0 = vpop.permute.xlu1 %3852  ;;  %v10393_v18 = vpop.permute.xlu0 %3440  ;;  %v10423_v1 = vrot.slane %v4691_v57, %v8058_v32  ;;  %v10426_v13 = vrot.slane %v4723_v63, %v8058_v32  ;;  %v12103_v11 = vcombine.low %v12101_v47, %v12102_v55  ;;  %v4771_v45 = vcombine.high %v10191_v31, %v10194_v50  ;;  %v12106_v50 = vld [vmem:[#allocation53_spill] sm:$0xff]  ;;  %v12107_v31 = vld [vmem:[#allocation54_spill] sm:$0xff] }
 0x563   : > { %v10438_v38 = vrot.slane %v5115_v48, %v8058_v32  ;;  %v10441_v14 = vrot.slane %v5131_v2, %v8058_v32  ;;  %v3618_v63 = vcombine.low %v10301_v39, %v10347_v59  ;;  %v4739_v48 = vcombine.high %v12107_v31, %v12106_v50 }
 0x564   : > { %6286 = vrot.lane.b32.xlu0 %v10181_v20, %s7779_s22  ;;  %7325 = vrot.lane.b32.xlu1 %v9828_v46, %s7786_s18  ;;  %12099 = vst [vmem:[#allocation50_spill] sm:$0xff] %v10423_v1  ;;  %12100 = vst [vmem:[#allocation63_spill] sm:$0xff] %v10426_v13  ;;  %v5195_v46 = vcombine.high %v10259_v12, %v10262_v24  ;;  %v7339_v53 = vpack.i.bf16 %v12103_v11, %v4020_v5  ;;  %v12105_v5 = vld [vmem:[#allocation32_spill] sm:$0xff]  ;;  %v12110_v11 = vld [vmem:[#allocation57_spill] sm:$0xff] }
 0x565   : > { %12104 = vst [vmem:[#allocation15_spill] sm:$0xff] %v10438_v38  ;;  %v5163_v12 = vcombine.high %v10277_v56, %v10256_v33  ;;  %v3634_v24 = vcombine.low %v10266_v10, %v10299_v29  ;;  %v10456_v2 = vrot.slane %v4707_v21, %v8058_v32  ;;  %12109 = vst [vmem:[#allocation32_spill] sm:$0xff] %v10459_v30 }
 0x566   : > { %v10430_v20 = vpop.permute.xlu1 %3860  ;;  %v3449_v22 = vpop.permute.xlu0 %3448  ;;  %v5210_v33 = vcombine.low %v10441_v14, %v10418_v9  ;;  %v10464_v56 = vrot.slane %v5195_v46, %v8233_v4  ;;  %v12111_v21 = vcombine.high %v12101_v47, %v12102_v55  ;;  %v10477_v31 = vrot.slane %v4675_v58, %v8058_v32 }
 0x567   : > { %v3650_v57 = vcombine.low %v10393_v18, %v3449_v22  ;;  %12108 = vst [vmem:[#allocation23_spill] sm:$0xff] %v10456_v2  ;;  %v10480_v25 = vrot.slane %v4771_v45, %v8233_v4  ;;  %v4786_v46 = vcombine.low %v10456_v2, %v10426_v13  ;;  %v10487_v36 = vrot.slane %v5163_v12, %v8233_v4  ;;  %v12115_v12 = vld [vmem:[#allocation16_spill] sm:$0xff]  ;;  %v12122_v13 = vld [vmem:[#allocation51_spill] sm:$0xff] }
 0x568   : > { %7300 = vrot.lane.b32.xlu0 %v12105_v5, %s7783_s16  ;;  %7340 = vrot.lane.b32.xlu1 %v7339_v53, %s7781_s23  ;;  %v3602_v5 = vcombine.low %v10268_v8, %v12110_v11  ;;  %v7344_v41 = vpack.i.bf16 %v12111_v21, %v4021_v62  ;;  %12112 = vst [vmem:[#allocation53_spill] sm:$0xff] %v10477_v31  ;;  %v12113_v62 = vld [vmem:[#allocation30_spill] sm:$0xff]  ;;  %v12116_v21 = vld [vmem:[#allocation28_spill] sm:$0xff] }
 0x569   : > { %v3658_v53 = vrot.slane %v3650_v57, %v8058_v32  ;;  %v5178_v57 = vcombine.low %v10459_v30, %v10438_v38  ;;  %v3642_v28 = vrot.slane %v3634_v24, %v8058_v32  ;;  %v3626_v47 = vrot.slane %v3618_v63, %v8058_v32 }
 0x56a   : > { %v10469_v6 = vpop.permute.xlu1 %3868  ;;  %v10471_v50 = vpop.permute.xlu0 %3848  ;;  %v10495_v58 = vrot.slane %v4739_v48, %v8233_v4  ;;  %v4754_v55 = vcombine.low %v10477_v31, %v10423_v1  ;;  %v10500_v45 = vrot.slane %v5210_v33, %v8233_v4  ;;  %v12117_v30 = vcombine.low %v12115_v12, %v12116_v21  ;;  %v12120_v1 = vld [vmem:[#allocation20_spill] sm:$0xff] }
 0x56b   : > { %v3610_v63 = vrot.slane %v3602_v5, %v8058_v32  ;;  %v3651_v38 = vcombine.high %v10393_v18, %v3449_v22  ;;  %v5229_v48 = vcombine.high %v10487_v36, %v10464_v56  ;;  %v12118_v33 = vcombine.low %v10365_v16, %v10342_v3 }
 0x56c   : > { %7310 = vrot.lane.b32.xlu0 %v12113_v62, %s7784_s15  ;;  %7345 = vrot.lane.b32.xlu1 %v7344_v41, %s7784_s15  ;;  %12114 = vst [vmem:[#allocation54_spill] sm:$0xff] %v10500_v45  ;;  %v7349_v24 = vpack.i.bf16 %v12117_v30, %v4022_v43  ;;  %v3698_v62 = vcombine.low %v3642_v28, %v3658_v53 }
 0x56d   : > { %v10517_v31 = vrot.slane %v12118_v33, %v8233_v4  ;;  %v10520_v43 = vrot.slane %v4786_v46, %v8233_v4  ;;  %v10523_v30 = vrot.slane %v5178_v57, %v8233_v4  ;;  %v3619_v18 = vcombine.high %v10301_v39, %v10347_v59  ;;  %v12123_v39 = vld [vmem:[#allocation52_spill] sm:$0xff] }
 0x56e   : > { %v10507_v2 = vpop.permute.xlu1 %4628  ;;  %v10509_v41 = vpop.permute.xlu0 %3856  ;;  %v3635_v22 = vcombine.high %v10266_v10, %v10299_v29  ;;  %v3666_v5 = vcombine.low %v3610_v63, %v3626_v47  ;;  %v4805_v33 = vcombine.high %v10495_v58, %v10480_v25  ;;  %v10535_v46 = vrot.slane %v4754_v55, %v8233_v4 }
 0x56f   : > { %12119 = vst [vmem:[#allocation57_spill] sm:$0xff] %v10523_v30  ;;  %v3603_v57 = vcombine.high %v10268_v8, %v12110_v11  ;;  %v4019_v59 = vcombine.high %v12123_v39, %v12122_v13  ;;  %v5230_v10 = vcombine.low %v10523_v30, %v10500_v45  ;;  %v3665_v29 = vrot.slane %v3651_v38, %v8058_v32  ;;  %v12125_v39 = vld [vmem:[#allocation48_spill] sm:$0xff]  ;;  %v12126_v30 = vld [vmem:[#allocation49_spill] sm:$0xff] }
 0x570   : > { %7320 = vrot.lane.b32.xlu0 %v12120_v1, %s7785_s17  ;;  %7350 = vrot.lane.b32.xlu1 %v7349_v24, %s7782_s24  ;;  %12121 = vst [vmem:[#allocation30_spill] sm:$0xff] %v10535_v46  ;;  %v3699_v1 = vcombine.high %v3642_v28, %v3658_v53  ;;  %v10545_v24 = vrot.slane %v3698_v62, %v8233_v4  ;;  %v12128_v45 = vld [vmem:[#allocation33_spill] sm:$0xff] }
 0x571   : > { %v7379_v55 = vpack.i.bf16 %v5229_v48, %v4805_v33  ;;  %v4003_v8 = vcombine.high %v10316_v7, %v10291_v26  ;;  %v3633_v11 = vrot.slane %v3619_v18, %v8058_v32  ;;  %v4806_v13 = vcombine.low %v10535_v46, %v10520_v43  ;;  %v12129_v7 = vld [vmem:[#allocation24_spill] sm:$0xff]  ;;  %v12130_v48 = vld [vmem:[#allocation31_spill] sm:$0xff] }
 0x572   : > { %12124 = vst [vmem:[#allocation16_spill] sm:$0xff] %v10545_v24  ;;  %v10547_v61 = vpop.permute.xlu1 %4636  ;;  %v10549_v49 = vpop.permute.xlu0 %3864  ;;  %v3595_v38 = vcombine.high %v12126_v30, %v12125_v39  ;;  %v3649_v28 = vrot.slane %v3635_v22, %v8058_v32  ;;  %v3667_v53 = vcombine.high %v3610_v63, %v3626_v47  ;;  %v10560_v62 = vrot.slane %v3666_v5, %v8233_v4 }
 0x573   : > { %v3617_v26 = vrot.slane %v3603_v57, %v8058_v32  ;;  %v12131_v18 = vcombine.high %v12129_v7, %v12130_v48  ;;  %v7384_v46 = vpack.i.bf16 %v5230_v10, %v4806_v13  ;;  %v4023_v39 = vcombine.high %v10398_v27, %v10381_v52  ;;  %v12158_v7 = vld [vmem:[#allocation32_spill] sm:$0xff] }
 0x574   : > { %12127 = vst [vmem:[#allocation28_spill] sm:$0xff] %v10560_v62  ;;  %7330 = vrot.lane.b32.xlu0 %v12128_v45, %s7787_s19  ;;  %7380 = vrot.lane.b32.xlu1 %v7379_v55, %s7784_s15  ;;  %v10572_v47 = vrot.slane %v3699_v1, %v8233_v4  ;;  %v3714_v63 = vcombine.low %v3649_v28, %v3665_v29 }
 0x575   : > { %v7334_v33 = vpack.i.bf16 %v12131_v18, %v4019_v59  ;;  %v3731_v45 = vcombine.high %v10560_v62, %v10545_v24  ;;  %v3971_v13 = vcombine.high %v10334_v34, %v10313_v54  ;;  %v10585_v59 = vrot.slane %v4003_v8, %v8233_v4 }
 0x576   : > { %v10574_v22 = vpop.permute.xlu1 %4644  ;;  %v10576_v5 = vpop.permute.xlu0 %3872  ;;  %v3682_v52 = vcombine.low %v3617_v26, %v3633_v11  ;;  %v10590_v10 = vrot.slane %v3667_v53, %v8233_v4  ;;  %v4058_v1 = vcombine.low %v10430_v20, %v10469_v6  ;;  %v4042_v55 = vcombine.low %v10471_v50, %v10509_v41 }
 0x577   : > { %v4074_v27 = vcombine.low %v10549_v49, %v10576_v5  ;;  %v4026_v54 = vcombine.low %v10345_v35, %v10391_v0  ;;  %v3715_v34 = vcombine.high %v3649_v28, %v3665_v29  ;;  %v12132_v8 = vcombine.high %v12115_v12, %v12116_v21  ;;  %v12134_v21 = vld [vmem:[#allocation55_spill] sm:$0xff] }
 0x578   : > { %7335 = vrot.lane.b32.xlu0 %v7334_v33, %s7783_s16  ;;  %7385 = vrot.lane.b32.xlu1 %v7384_v46, %s7782_s24  ;;  %v5227_v53 = vcombine.high %v10339_v17, %v10319_v42  ;;  %v10606_v57 = vrot.slane %v3714_v63, %v8233_v4  ;;  %v7404_v46 = vpack.i.bf16 %v3595_v38, %v3731_v45 }
 0x579   : > { %v7354_v18 = vpack.i.bf16 %v12132_v8, %v4023_v39  ;;  %v4082_v24 = vrot.slane %v4074_v27, %v8058_v32  ;;  %v3733_v29 = vcombine.high %v10590_v10, %v10572_v47  ;;  %v10616_v28 = vrot.slane %v3971_v13, %v8233_v4  ;;  %v12135_v39 = vld [vmem:[#allocation56_spill] sm:$0xff] }
 0x57a   : > { %v10609_v62 = vpop.permute.xlu1 %4652  ;;  %v10611_v33 = vpop.permute.xlu0 %4632  ;;  %v3683_v12 = vcombine.high %v3617_v26, %v3633_v11  ;;  %v4803_v8 = vcombine.high %v12135_v39, %v12134_v21  ;;  %v3597_v63 = vcombine.high %v10375_v19, %v10405_v23  ;;  %v10623_v27 = vrot.slane %v3682_v52, %v8233_v4 }
 0x57b   : > { %12133 = vst [vmem:[#allocation20_spill] sm:$0xff] %v10611_v33  ;;  %v4066_v30 = vrot.slane %v4058_v1, %v8058_v32  ;;  %v4050_v38 = vrot.slane %v4042_v55, %v8058_v32  ;;  %v4034_v45 = vrot.slane %v4026_v54, %v8058_v32  ;;  %v10631_v11 = vrot.slane %v3715_v34, %v8233_v4 }
 0x57c   : > { %7355 = vrot.lane.b32.xlu0 %v7354_v18, %s7785_s17  ;;  %7405 = vrot.lane.b32.xlu1 %v7404_v46, %s7783_s16  ;;  %v7359_v26 = vpack.i.bf16 %v5227_v53, %v4803_v8  ;;  %v4024_v13 = vcombine.low %v10616_v28, %v10585_v59  ;;  %v7414_v55 = vpack.i.bf16 %v3597_v63, %v3733_v29  ;;  %v12139_v46 = vld [vmem:[#allocation34_spill] sm:$0xff]  ;;  %v12140_v8 = vld [vmem:[#allocation21_spill] sm:$0xff] }
 0x57d   : > { %v4122_v21 = vcombine.low %v4066_v30, %v4082_v24  ;;  %v4123_v52 = vcombine.high %v4066_v30, %v4082_v24  ;;  %v3735_v18 = vcombine.high %v10623_v27, %v10606_v57  ;;  %v12138_v54 = vcombine.high %v10365_v16, %v10342_v3 }
 0x57e   : > { %v10635_v39 = vpop.permute.xlu1 %5052  ;;  %v10637_v1 = vpop.permute.xlu0 %4640  ;;  %v3599_v53 = vcombine.high %v10378_v44, %v10517_v31  ;;  %v4483_v30 = vcombine.high %v12140_v8, %v12139_v46  ;;  %v4467_v24 = vcombine.high %v10307_v51, %v10350_v40  ;;  %v10654_v29 = vrot.slane %v3683_v12, %v8233_v4  ;;  %v12143_v46 = vld [vmem:[#allocation29_spill] sm:$0xff] }
 0x57f   : > { %12136 = vst [vmem:[#allocation33_spill] sm:$0xff] %v10635_v39  ;;  %12137 = vst [vmem:[#allocation64_spill] sm:$0xff] %v10637_v1  ;;  %v10645_v34 = vrot.slane %v12138_v54, %v8233_v4  ;;  %v4090_v63 = vcombine.low %v4034_v45, %v4050_v38  ;;  %v4091_v42 = vcombine.high %v4034_v45, %v4050_v38  ;;  %v12142_v54 = vld [vmem:[#allocation17_spill] sm:$0xff] }
 0x580   : > { %7360 = vrot.lane.b32.xlu0 %v7359_v26, %s7783_s16  ;;  %7415 = vrot.lane.b32.xlu1 %v7414_v55, %s7784_s15  ;;  %v12141_v3 = vcombine.high %v10310_v15, %v10286_v60  ;;  %v12144_v8 = vcombine.low %v12142_v54, %v12143_v46  ;;  %v5228_v12 = vcombine.low %v10487_v36, %v10464_v56 }
 0x581   : > { %v4466_v38 = vcombine.low %v10307_v51, %v10350_v40  ;;  %v10672_v45 = vrot.slane %v4122_v21, %v8233_v4  ;;  %v10675_v26 = vrot.slane %v4123_v52, %v8233_v4  ;;  %v7424_v15 = vpack.i.bf16 %v3599_v53, %v3735_v18 }
 0x582   : > { %v10662_v16 = vrot.slane %v12141_v3, %v8233_v4  ;;  %v7364_v17 = vpack.i.bf16 %v12144_v8, %v4024_v13  ;;  %v10677_v55 = vpop.permute.xlu1 %5060  ;;  %v10679_v60 = vpop.permute.xlu0 %4648  ;;  %v3736_v13 = vcombine.low %v10654_v29, %v10631_v11  ;;  %v4826_v36 = vcombine.low %v10611_v33, %v10637_v1 }
 0x583   : > { %12145 = vst [vmem:[#allocation34_spill] sm:$0xff] %v10672_v45  ;;  %12146 = vst [vmem:[#allocation21_spill] sm:$0xff] %v10675_v26  ;;  %v10688_v40 = vrot.slane %v4483_v30, %v8233_v4  ;;  %v10691_v56 = vrot.slane %v4467_v24, %v8233_v4  ;;  %v10694_v21 = vrot.slane %v4090_v63, %v8233_v4 }
 0x584   : > { %12147 = vst [vmem:[#allocation17_spill] sm:$0xff] %v10677_v55  ;;  %12148 = vst [vmem:[#allocation29_spill] sm:$0xff] %v10679_v60  ;;  %v3600_v51 = vcombine.low %v10662_v16, %v10645_v34  ;;  %v10697_v52 = vrot.slane %v4091_v42, %v8233_v4  ;;  %7365 = vrot.lane.b32.xlu0 %v7364_v17, %s7786_s18  ;;  %7425 = vrot.lane.b32.xlu1 %v7424_v15, %s7785_s17  ;;  %v12154_v15 = vld [vmem:[#allocation61_spill] sm:$0xff] }
 0x585   : > { %12149 = vst [vmem:[#allocation65_spill] sm:$0xff] %v10688_v40  ;;  %12150 = vst [vmem:[#allocation66_spill] sm:$0xff] %v10694_v21  ;;  %v4804_v18 = vcombine.low %v10495_v58, %v10480_v25  ;;  %v5211_v53 = vcombine.high %v10441_v14, %v10418_v9  ;;  %v4810_v30 = vcombine.low %v10507_v2, %v10547_v61  ;;  %v12159_v9 = vld [vmem:[#allocation50_spill] sm:$0xff] }
 0x586   : > { %12151 = vst [vmem:[#allocation67_spill] sm:$0xff] %v10697_v52  ;;  %v4842_v24 = vcombine.low %v10574_v22, %v10609_v62  ;;  %v4025_v42 = vcombine.high %v10616_v28, %v10585_v59  ;;  %v10711_v63 = vpop.permute.xlu1 %5068  ;;  %v10713_v17 = vpop.permute.xlu0 %4656  ;;  %v7434_v8 = vpack.i.bf16 %v3600_v51, %v3736_v13  ;;  %v4156_v25 = vcombine.low %v10697_v52, %v10675_v26  ;;  %v12153_v28 = vld [vmem:[#allocation62_spill] sm:$0xff]  ;;  %v12156_v13 = vld [vmem:[#allocation23_spill] sm:$0xff]  ;;  %v12160_v26 = vld [vmem:[#allocation53_spill] sm:$0xff] }
 0x587   : > { %12152 = vst [vmem:[#allocation68_spill] sm:$0xff] %v10713_v17  ;;  %v7369_v3 = vpack.i.bf16 %v5228_v12, %v4804_v18  ;;  %v10720_v14 = vrot.slane %v4826_v36, %v8058_v32  ;;  %v4858_v58 = vcombine.low %v10679_v60, %v10713_v17  ;;  %v4516_v59 = vcombine.low %v10304_v37, %v10688_v40  ;;  %v12155_v12 = vld [vmem:[#allocation63_spill] sm:$0xff] }
 0x588   : > { %v4499_v48 = vcombine.high %v12154_v15, %v12153_v28  ;;  %v4787_v51 = vcombine.high %v12156_v13, %v12155_v12  ;;  %v12157_v18 = vld [vmem:[#allocation15_spill] sm:$0xff]  ;;  %7435 = vrot.lane.b32.xlu1 %v7434_v8, %s7786_s18  ;;  %v4498_v36 = vcombine.low %v12154_v15, %v12153_v28  ;;  %v4755_v60 = vcombine.high %v12160_v26, %v12159_v9  ;;  %v12163_v15 = vld [vmem:[#allocation57_spill] sm:$0xff] }
 0x589   : > { %v5179_v52 = vcombine.high %v12158_v7, %v12157_v18  ;;  %7370 = vrot.lane.b32.xlu0 %v7369_v3, %s7781_s23  ;;  %v10739_v17 = vrot.slane %v4810_v30, %v8058_v32  ;;  %v10742_v33 = vrot.slane %v4842_v24, %v8058_v32  ;;  %v10745_v12 = vrot.slane %v4858_v58, %v8058_v32  ;;  %v12162_v30 = vld [vmem:[#allocation54_spill] sm:$0xff]  ;;  %v12182_v40 = vld [vmem:[#allocation39_spill] sm:$0xff] }
 0x58a   : > { %v10748_v7 = vrot.slane %v5211_v53, %v8233_v4  ;;  %v10750_v3 = vpop.permute.xlu1 %5076  ;;  %v10752_v8 = vpop.permute.xlu0 %5056  ;;  %v12161_v28 = vcombine.high %v12142_v54, %v12143_v46  ;;  %v7439_v9 = vpack.i.bf16 %v4516_v59, %v4156_v25  ;;  %v5231_v13 = vcombine.high %v12163_v15, %v12162_v30  ;;  %v12165_v46 = vld [vmem:[#allocation30_spill] sm:$0xff] }
 0x58b   : > { %v4874_v24 = vcombine.low %v10739_v17, %v10720_v14  ;;  %v4906_v58 = vcombine.low %v10742_v33, %v10745_v12  ;;  %v10764_v53 = vrot.slane %v4499_v48, %v8233_v4  ;;  %v10767_v18 = vrot.slane %v4466_v38, %v8233_v4  ;;  %v12168_v48 = vld [vmem:[#allocation45_spill] sm:$0xff]  ;;  %v12170_v30 = vld [vmem:[#allocation22_spill] sm:$0xff] }
 0x58c   : > { %v7374_v26 = vpack.i.bf16 %v12161_v28, %v4025_v42  ;;  %v4801_v1 = vrot.slane %v4787_v51, %v8233_v4  ;;  %v5193_v54 = vrot.slane %v5179_v52, %v8233_v4  ;;  %7440 = vrot.lane.b32.xlu1 %v7439_v9, %s7781_s23  ;;  %v4807_v42 = vcombine.high %v12165_v46, %v10520_v43  ;;  %v12171_v51 = vld [vmem:[#allocation40_spill] sm:$0xff] }
 0x58d   : > { %12164 = vst [vmem:[#allocation62_spill] sm:$0xff] %v10767_v18  ;;  %v10776_v25 = vrot.slane %v4906_v58, %v8233_v4  ;;  %v10781_v38 = vrot.slane %v4498_v36, %v8233_v4  ;;  %v5659_v15 = vcombine.high %v12171_v51, %v12170_v30  ;;  %v4769_v52 = vrot.slane %v4755_v60, %v8233_v4  ;;  %v12174_v60 = vld [vmem:[#allocation36_spill] sm:$0xff]  ;;  %v12175_v51 = vld [vmem:[#allocation37_spill] sm:$0xff] }
 0x58e   : > { %7375 = vrot.lane.b32.xlu0 %v7374_v26, %s7787_s19  ;;  %v4075_v26 = vcombine.high %v10549_v49, %v10576_v5  ;;  %v10788_v9 = vpop.permute.xlu1 %5836  ;;  %v10790_v43 = vpop.permute.xlu0 %5064  ;;  %v7389_v58 = vpack.i.bf16 %v5231_v13, %v4807_v42  ;;  %v5232_v46 = vcombine.low %v5193_v54, %v10748_v7  ;;  %v10794_v28 = vrot.slane %v4874_v24, %v8233_v4  ;;  %v7647_v42 = vld [vmem:[#allocation4 + $0xe] ss:$48 sps:$4 sm:$0xff]  }
 0x58f   : > { %12166 = vst [vmem:[#allocation61_spill] sm:$0xff] %v10776_v25  ;;  %12169 = vst [vmem:[#allocation63_spill] sm:$0xff] %v10781_v38  ;;  %v5691_v59 = vcombine.high %v12175_v51, %v12174_v60  ;;  %v4059_v49 = vcombine.high %v10430_v20, %v10469_v6  ;;  %v4043_v5 = vcombine.high %v10471_v50, %v10509_v41  ;;  %v7648_v6 = vld [vmem:[#allocation4 + $0x26] ss:$48 sps:$4 sm:$0xff]  }
 0x590   : > { %12172 = vst [vmem:[#allocation23_spill] sm:$0xff] %v10788_v9  ;;  %12173 = vst [vmem:[#allocation15_spill] sm:$0xff] %v10794_v28  ;;  %v4808_v13 = vcombine.low %v4769_v52, %v4801_v1  ;;  %v5250_v36 = vcombine.low %v10752_v8, %v10790_v43  ;;  %v10814_v60 = vrot.slane %v5659_v15, %v8233_v4  ;;  %v7650_v38 = vld [vmem:[#allocation4 + $0x86] ss:$48 sps:$4 sm:$0xff]  }
 0x591   : > { %v4027_v50 = vcombine.high %v10345_v35, %v10391_v0  ;;  %v10821_v41 = vrot.slane %v4075_v26, %v8058_v32  ;;  %v5233_v30 = vcombine.high %v5193_v54, %v10748_v7  ;;  %v5234_v15 = vcombine.low %v10635_v39, %v10677_v55  ;;  %v12177_v35 = vld [vmem:[#allocation38_spill] sm:$0xff]  ;;  %v12178_v0 = vld [vmem:[#allocation41_spill] sm:$0xff] }
 0x592   : > { %7390 = vrot.lane.b32.xlu0 %v7389_v58, %s7785_s17  ;;  %v10823_v58 = vpop.permute.xlu1 %5844  ;;  %v10825_v51 = vpop.permute.xlu0 %5072  ;;  %v7394_v24 = vpack.i.bf16 %v5232_v46, %v4808_v13  ;;  %v10833_v20 = vrot.slane %v5691_v59, %v8233_v4  ;;  %v5523_v26 = vcombine.high %v12178_v0, %v12177_v35  ;;  %v10838_v37 = vrot.slane %v4059_v49, %v8058_v32  ;;  %v7649_v0 = vld [vmem:[#allocation4 + $0x6e] ss:$48 sps:$4 sm:$0xff]   ;;  %v7651_v39 = vld [vmem:[#allocation4 + $0x6] ss:$48 sps:$4 sm:$0xff]  }
 0x593   : > { %v4057_v9 = vrot.slane %v4043_v5, %v8058_v32  ;;  %v4809_v7 = vcombine.high %v4769_v52, %v4801_v1  ;;  %v10843_v54 = vrot.slane %v7647_v42, %v8058_v32  ;;  %v5266_v46 = vcombine.low %v10711_v63, %v10750_v3  ;;  %v12181_v13 = vld [vmem:[#allocation35_spill] sm:$0xff] }
 0x594   : > { %12176 = vst [vmem:[#allocation32_spill] sm:$0xff] %v10833_v20  ;;  %v10848_v59 = vrot.slane %v5250_v36, %v8058_v32  ;;  %v10853_v49 = vrot.slane %v7648_v6, %v8058_v32  ;;  %v4041_v5 = vrot.slane %v4027_v50, %v8058_v32  ;;  %v4139_v1 = vcombine.high %v10838_v37, %v10821_v41 }
 0x595   : > { %v7399_v42 = vpack.i.bf16 %v5233_v30, %v4809_v7  ;;  %v3732_v36 = vcombine.low %v10590_v10, %v10572_v47  ;;  %v5242_v35 = vrot.slane %v5234_v15, %v8058_v32  ;;  %v5555_v18 = vcombine.high %v12182_v40, %v12181_v13 }
 0x596   : > { %7395 = vrot.lane.b32.xlu0 %v7394_v24, %s7786_s18  ;;  %v10858_v52 = vpop.permute.xlu1 %5852  ;;  %v10860_v24 = vpop.permute.xlu0 %5080  ;;  %v4107_v55 = vcombine.high %v4041_v5, %v4057_v9  ;;  %v3596_v30 = vcombine.low %v10375_v19, %v10405_v23  ;;  %v10877_v10 = vrot.slane %v5523_v26, %v8233_v4  ;;  %v5274_v15 = vrot.slane %v5266_v46, %v8058_v32 }
 0x597   : > { %v5282_v6 = vcombine.low %v10825_v51, %v10860_v24  ;;  %v5298_v7 = vcombine.low %v5242_v35, %v10848_v59  ;;  %v10883_v40 = vrot.slane %v7649_v0, %v8058_v32  ;;  %v10886_v13 = vrot.slane %v4139_v1, %v8233_v4 }
 0x598   : > { %12183 = vst [vmem:[#allocation50_spill] sm:$0xff] %v10877_v10  ;;  %v7409_v23 = vpack.i.bf16 %v3596_v30, %v3732_v36  ;;  %v3734_v26 = vcombine.low %v10623_v27, %v10606_v57  ;;  %v10895_v46 = vrot.slane %v7650_v38, %v8058_v32  ;;  %v10903_v1 = vrot.slane %v7651_v39, %v8058_v32 }
 0x599   : > { %v5290_v50 = vrot.slane %v5282_v6, %v8058_v32  ;;  %v10898_v6 = vrot.slane %v5555_v18, %v8233_v4  ;;  %v4106_v10 = vcombine.low %v4041_v5, %v4057_v9  ;;  %v10906_v20 = vrot.slane %v4107_v55, %v8233_v4  ;;  %v7652_v18 = vld [vmem:[#allocation4 + $0x1e] ss:$48 sps:$4 sm:$0xff]  }
 0x59a   : > { %7400 = vrot.lane.b32.xlu0 %v7399_v42, %s7787_s19  ;;  %v10888_v42 = vpop.permute.xlu1 %5860  ;;  %v10890_v19 = vpop.permute.xlu0 %5840  ;;  %v3598_v57 = vcombine.low %v10378_v44, %v10517_v31  ;;  %v3737_v27 = vcombine.high %v10654_v29, %v10631_v11  ;;  %v10914_v38 = vrot.slane %v5298_v7, %v8233_v4  ;;  %v3601_v55 = vcombine.high %v10662_v16, %v10645_v34 }
 0x59b   : > { %v5330_v47 = vcombine.low %v5274_v15, %v5290_v50  ;;  %v5331_v36 = vcombine.high %v5274_v15, %v5290_v50  ;;  %v4138_v9 = vcombine.low %v10838_v37, %v10821_v41  ;;  %v4155_v11 = vcombine.high %v10694_v21, %v10672_v45 }
 0x59c   : > { %12184 = vst [vmem:[#allocation53_spill] sm:$0xff] %v10914_v38  ;;  %v7419_v31 = vpack.i.bf16 %v3598_v57, %v3734_v26  ;;  %v4160_v29 = vcombine.low %v10906_v20, %v10886_v13  ;;  %v4907_v50 = vcombine.high %v10742_v33, %v10745_v12  ;;  %v5299_v30 = vcombine.high %v5242_v35, %v10848_v59 }
 0x59d   : > { %v10917_v39 = vrot.slane %v5330_v47, %v8233_v4  ;;  %v4939_v34 = vcombine.high %v10794_v28, %v10776_v25  ;;  %v10939_v16 = vrot.slane %v4106_v10, %v8233_v4  ;;  %v4811_v41 = vcombine.high %v10507_v2, %v10547_v61  ;;  %v12186_v61 = vld [vmem:[#allocation64_spill] sm:$0xff] }
 0x59e   : > { %7410 = vrot.lane.b32.xlu0 %v7409_v23, %s7781_s23  ;;  %v10923_v5 = vpop.permute.xlu1 %5834  ;;  %v10925_v44 = vpop.permute.xlu0 %5848  ;;  %v7444_v47 = vpack.i.bf16 %v3601_v55, %v3737_v27  ;;  %v10945_v15 = vrot.slane %v7652_v18, %v8058_v32  ;;  %v4843_v33 = vcombine.high %v10574_v22, %v10609_v62  ;;  %v4875_v12 = vcombine.high %v10739_v17, %v10720_v14  ;;  %v12187_v2 = vld [vmem:[#allocation20_spill] sm:$0xff]  ;;  %v12188_v62 = vld [vmem:[#allocation42_spill] sm:$0xff]  ;;  %v12192_v55 = vld [vmem:[#allocation29_spill] sm:$0xff] }
 0x59f   : > { %12185 = vst [vmem:[#allocation54_spill] sm:$0xff] %v10917_v39  ;;  %v5363_v37 = vcombine.high %v10914_v38, %v10917_v39  ;;  %v10952_v59 = vrot.slane %v5331_v36, %v8233_v4  ;;  %v10955_v10 = vrot.slane %v4138_v9, %v8233_v4  ;;  %v4827_v7 = vcombine.high %v12187_v2, %v12186_v61  ;;  %v12191_v36 = vld [vmem:[#allocation68_spill] sm:$0xff]  ;;  %v12199_v38 = vld [vmem:[#allocation65_spill] sm:$0xff] }
 0x5a0   : > { %v5283_v23 = vcombine.high %v10825_v51, %v10860_v24  ;;  %v12189_v22 = vcombine.high %v12168_v48, %v12188_v62  ;;  %v10969_v14 = vrot.slane %v4907_v50, %v8233_v4  ;;  %v10972_v27 = vrot.slane %v5299_v30, %v8233_v4 }
 0x5a1   : > { %v7464_v35 = vpack.i.bf16 %v5363_v37, %v4939_v34  ;;  %v6034_v18 = vcombine.low %v10890_v19, %v10925_v44  ;;  %v12190_v51 = vcombine.low %v10691_v56, %v10764_v53  ;;  %v4859_v9 = vcombine.high %v12192_v55, %v12191_v36  ;;  %v12193_v34 = vld [vmem:[#allocation23_spill] sm:$0xff] }
 0x5a2   : > { %7420 = vrot.lane.b32.xlu0 %v7419_v31, %s7782_s24  ;;  %v10961_v26 = vpop.permute.xlu1 %5842  ;;  %v10963_v57 = vpop.permute.xlu0 %5856  ;;  %v7429_v17 = vpack.i.bf16 %v12189_v22, %v4155_v11  ;;  %v5267_v31 = vcombine.high %v10711_v63, %v10750_v3  ;;  %v5251_v11 = vcombine.high %v10752_v8, %v10790_v43  ;;  %v10990_v30 = vrot.slane %v4875_v12, %v8233_v4  ;;  %v12194_v8 = vld [vmem:[#allocation17_spill] sm:$0xff] }
 0x5a3   : > { %7465 = vrot.lane.b32.xlu1 %v7464_v35, %s7783_s16  ;;  %v7469_v24 = vpack.i.bf16 %v12190_v51, %v4160_v29  ;;  %v6018_v29 = vcombine.low %v12193_v34, %v10823_v58  ;;  %v6050_v37 = vcombine.low %v10858_v52, %v10888_v42  ;;  %v5364_v63 = vcombine.low %v10972_v27, %v10952_v59  ;;  %v12195_v43 = vld [vmem:[#allocation33_spill] sm:$0xff] }
 0x5a4   : > { %v4857_v3 = vrot.slane %v4843_v33, %v8058_v32  ;;  %v5235_v35 = vcombine.high %v12195_v43, %v12194_v8  ;;  %v5297_v61 = vrot.slane %v5283_v23, %v8058_v32  ;;  %v12196_v22 = vld [vmem:[#allocation21_spill] sm:$0xff]  ;;  %v11009_v36 = vrot.slane %v6034_v18, %v8058_v32 }
 0x5a5   : > { %v4940_v33 = vcombine.low %v10990_v30, %v10969_v14  ;;  %v4161_v23 = vcombine.high %v10906_v20, %v10886_v13  ;;  %v7653_v8 = vld [vmem:[#allocation4 + $0x66] ss:$48 sps:$4 sm:$0xff]   ;;  %v4841_v43 = vrot.slane %v4827_v7, %v8058_v32  ;;  %v4873_v50 = vrot.slane %v4859_v9, %v8058_v32 }
 0x5a6   : > { %7430 = vrot.lane.b32.xlu0 %v7429_v17, %s7783_s16  ;;  %v11002_v2 = vpop.permute.xlu1 %5850  ;;  %v11004_v12 = vpop.permute.xlu0 %5864  ;;  %v12197_v17 = vld [vmem:[#allocation67_spill] sm:$0xff]  ;;  %v5265_v18 = vrot.slane %v5251_v11, %v8058_v32  ;;  %v5249_v20 = vrot.slane %v5235_v35, %v8058_v32  ;;  %v11043_v35 = vrot.slane %v7653_v8, %v8058_v32  ;;  %v4159_v21 = vcombine.high %v10939_v16, %v10955_v10 }
 0x5a7   : > { %v4157_v51 = vcombine.high %v12197_v17, %v12196_v22  ;;  %v6066_v55 = vcombine.low %v10963_v57, %v11004_v12  ;;  %7470 = vrot.lane.b32.xlu1 %v7469_v24, %s7786_s18  ;;  %v5281_v22 = vrot.slane %v5267_v31, %v8058_v32  ;;  %v11024_v17 = vrot.slane %v6018_v29, %v8058_v32  ;;  %v12198_v31 = vld [vmem:[#allocation58_spill] sm:$0xff] }
 0x5a8   : > { %v6058_v24 = vrot.slane %v6050_v37, %v8058_v32  ;;  %v7474_v39 = vpack.i.bf16 %v5364_v63, %v4940_v33  ;;  %v12200_v11 = vcombine.high %v12198_v31, %v12199_v38  ;;  %v4825_v29 = vrot.slane %v4811_v41, %v8058_v32 }
 0x5a9   : > { %v6074_v0 = vrot.slane %v6066_v55, %v8058_v32  ;;  %v5346_v13 = vcombine.low %v5281_v22, %v5297_v61  ;;  %v6082_v37 = vcombine.low %v11024_v17, %v11009_v36  ;;  %v4922_v55 = vcombine.low %v4857_v3, %v4873_v50 }
 0x5aa   : > { %7445 = vrot.lane.b32.xlu0 %v7444_v47, %s7787_s19  ;;  %v11029_v7 = vpop.permute.xlu1 %5858  ;;  %v11031_v9 = vpop.permute.xlu0 %5838  ;;  %v7449_v25 = vpack.i.bf16 %v12200_v11, %v4157_v51  ;;  %v4158_v47 = vcombine.low %v10939_v16, %v10955_v10  ;;  %v4923_v33 = vcombine.high %v4857_v3, %v4873_v50  ;;  %v5314_v28 = vcombine.low %v5249_v20, %v5265_v18 }
 0x5ab   : > { %v6114_v63 = vcombine.low %v6058_v24, %v6074_v0  ;;  %7475 = vrot.lane.b32.xlu1 %v7474_v39, %s7781_s23  ;;  %v5347_v45 = vcombine.high %v5281_v22, %v5297_v61  ;;  %v4890_v38 = vcombine.low %v4825_v29, %v4841_v43  ;;  %v12201_v41 = vcombine.high %v10691_v56, %v10764_v53  ;;  %v12203_v61 = vld [vmem:[#allocation63_spill] sm:$0xff] }
 0x5ac   : > { %v5365_v39 = vcombine.high %v10972_v27, %v10952_v59  ;;  %v5315_v11 = vcombine.high %v5249_v20, %v5265_v18  ;;  %v11055_v8 = vrot.slane %v5346_v13, %v8233_v4  ;;  %v4891_v56 = vcombine.high %v4825_v29, %v4841_v43  ;;  %v12205_v27 = vld [vmem:[#allocation44_spill] sm:$0xff] }
 0x5ad   : > { %v11047_v51 = vrot.slane %v6114_v63, %v8233_v4  ;;  %v7479_v31 = vpack.i.bf16 %v12201_v41, %v4161_v23  ;;  %v11067_v53 = vrot.slane %v6082_v37, %v8233_v4  ;;  %v4941_v59 = vcombine.high %v10990_v30, %v10969_v14  ;;  %v12206_v23 = vld [vmem:[#allocation47_spill] sm:$0xff] }
 0x5ae   : > { %7450 = vrot.lane.b32.xlu0 %v7449_v25, %s7784_s15  ;;  %v11057_v50 = vpop.permute.xlu1 %6260  ;;  %v11059_v3 = vpop.permute.xlu0 %5846  ;;  %v12202_v25 = vld [vmem:[#allocation62_spill] sm:$0xff]  ;;  %v4930_v20 = vrot.slane %v4922_v55, %v8233_v4  ;;  %v11076_v13 = vrot.slane %v4923_v33, %v8233_v4  ;;  %v11080_v16 = vrot.slane %v5347_v45, %v8233_v4  ;;  %v6115_v10 = vcombine.high %v6058_v24, %v6074_v0 }
 0x5af   : > { %v12204_v22 = vcombine.low %v12202_v25, %v12203_v61  ;;  %7480 = vrot.lane.b32.xlu1 %v7479_v31, %s7787_s19  ;;  %v5898_v43 = vcombine.low %v11031_v9, %v11059_v3  ;;  %v7484_v14 = vpack.i.bf16 %v5365_v39, %v4941_v59  ;;  %v6147_v30 = vcombine.high %v11067_v53, %v11047_v51 }
 0x5b0   : > { %v4898_v29 = vrot.slane %v4890_v38, %v8233_v4  ;;  %v11089_v37 = vrot.slane %v5315_v11, %v8233_v4  ;;  %v12207_v45 = vcombine.high %v12202_v25, %v12203_v61  ;;  %v11098_v24 = vrot.slane %v4891_v56, %v8233_v4 }
 0x5b1   : > { %v7454_v63 = vpack.i.bf16 %v12204_v22, %v4158_v47  ;;  %v5322_v47 = vrot.slane %v5314_v28, %v8233_v4  ;;  %v6083_v41 = vcombine.high %v11024_v17, %v11009_v36  ;;  %v5882_v38 = vcombine.low %v10923_v5, %v10961_v26  ;;  %v12209_v22 = vld [vmem:[#allocation46_spill] sm:$0xff] }
 0x5b2   : > { %v11091_v55 = vpop.permute.xlu1 %6268  ;;  %v5855_v28 = vpop.permute.xlu0 %5854  ;;  %v7459_v33 = vpack.i.bf16 %v12207_v45, %v4159_v21  ;;  %v12208_v31 = vcombine.low %v10843_v54, %v10853_v49  ;;  %v5914_v21 = vcombine.low %v11002_v2, %v11029_v7  ;;  %v4942_v11 = vcombine.low %v4898_v29, %v4930_v20 }
 0x5b3   : > { %7455 = vrot.lane.b32.xlu0 %v7454_v63, %s7782_s24  ;;  %v5366_v0 = vcombine.low %v5322_v47, %v11055_v8  ;;  %7485 = vrot.lane.b32.xlu1 %v7484_v14, %s7784_s15  ;;  %v5368_v36 = vcombine.low %v11089_v37, %v11080_v16  ;;  %v11119_v25 = vrot.slane %v6115_v10, %v8233_v4  ;;  %v12210_v63 = vld [vmem:[#allocation43_spill] sm:$0xff] }
 0x5b4   : > { %v11109_v39 = vrot.slane %v12208_v31, %v8233_v4  ;;  %v5906_v61 = vrot.slane %v5898_v43, %v8058_v32  ;;  %v12211_v56 = vcombine.high %v12209_v22, %v12210_v63  ;;  %v4944_v14 = vcombine.low %v11098_v24, %v11076_v13 }
 0x5b5   : > { %v6051_v45 = vcombine.high %v10858_v52, %v10888_v42  ;;  %v7489_v10 = vpack.i.bf16 %v5366_v0, %v4942_v11  ;;  %v5367_v18 = vcombine.high %v5322_v47, %v11055_v8  ;;  %v11135_v43 = vrot.slane %v6083_v41, %v8233_v4 }
 0x5b6   : > { %v7499_v59 = vpack.i.bf16 %v6147_v30, %v12211_v56  ;;  %v11131_v31 = vpop.permute.xlu1 %6276  ;;  %v5863_v17 = vpop.permute.xlu0 %5862  ;;  %v5890_v30 = vrot.slane %v5882_v38, %v8058_v32  ;;  %v5706_v52 = vcombine.low %v10883_v40, %v10895_v46  ;;  %v6035_v42 = vcombine.high %v10890_v19, %v10925_v44 }
 0x5b7   : > { %7460 = vrot.lane.b32.xlu0 %v7459_v33, %s7785_s17  ;;  %v6067_v33 = vcombine.high %v10963_v57, %v11004_v12  ;;  %v5930_v56 = vcombine.low %v5855_v28, %v5863_v17  ;;  %v5922_v57 = vrot.slane %v5914_v21, %v8058_v32  ;;  %v7504_v12 = vpack.i.bf16 %v5368_v36, %v4944_v14 }
 0x5b8   : > { %7500 = vrot.lane.b32.xlu1 %v7499_v59, %s7783_s16  ;;  %v4943_v8 = vcombine.high %v4898_v29, %v4930_v20  ;;  %v5946_v47 = vcombine.low %v5890_v30, %v5906_v61  ;;  %v5931_v0 = vcombine.high %v5855_v28, %v5863_v17  ;;  %v6148_v38 = vcombine.low %v11135_v43, %v11119_v25  ;;  %v7654_v29 = vld [vmem:[#allocation4 + $0x7e] ss:$48 sps:$4 sm:$0xff]  }
 0x5b9   : > { %v5938_v41 = vrot.slane %v5930_v56, %v8058_v32  ;;  %v6019_v11 = vcombine.high %v12193_v34, %v10823_v58  ;;  %v11151_v59 = vrot.slane %v6051_v45, %v8058_v32  ;;  %v11154_v19 = vrot.slane %v6067_v33, %v8058_v32 }
 0x5ba   : > { %v11156_v44 = vpop.permute.xlu1 %6284  ;;  %v11158_v21 = vpop.permute.xlu0 %6264  ;;  %v7494_v20 = vpack.i.bf16 %v5367_v18, %v4943_v8  ;;  %v5915_v28 = vcombine.high %v11002_v2, %v11029_v7  ;;  %v5899_v36 = vcombine.high %v11031_v9, %v11059_v3  ;;  %v11166_v34 = vrot.slane %v6035_v42, %v8058_v32  ;;  %v12212_v3 = vld [vmem:[#allocation32_spill] sm:$0xff] }
 0x5bb   : > { %7490 = vrot.lane.b32.xlu0 %v7489_v10, %s7782_s24  ;;  %v5978_v17 = vcombine.low %v5922_v57, %v5938_v41  ;;  %v5979_v58 = vcombine.high %v5922_v57, %v5938_v41  ;;  %v5883_v14 = vcombine.high %v10923_v5, %v10961_v26  ;;  %v5947_v45 = vcombine.high %v5890_v30, %v5906_v61  ;;  %v12214_v41 = vld [vmem:[#allocation50_spill] sm:$0xff] }
 0x5bc   : > { %7505 = vrot.lane.b32.xlu1 %v7504_v12, %s7786_s18  ;;  %v5369_v18 = vcombine.high %v11089_v37, %v11080_v16  ;;  %v11174_v2 = vrot.slane %v5946_v47, %v8233_v4  ;;  %v11177_v7 = vrot.slane %v5931_v0, %v8058_v32  ;;  %v12213_v33 = vcombine.low %v10814_v60, %v12212_v3 }
 0x5bd   : > { %v11180_v9 = vrot.slane %v5978_v17, %v8233_v4  ;;  %v11186_v5 = vrot.slane %v6019_v11, %v8058_v32  ;;  %v6130_v26 = vcombine.low %v11151_v59, %v11154_v19  ;;  %v5993_v16 = vrot.slane %v5979_v58, %v8233_v4 }
 0x5be   : > { %v7514_v10 = vpack.i.bf16 %v6148_v38, %v12213_v33  ;;  %v11191_v37 = vpop.permute.xlu1 %6258  ;;  %v11193_v61 = vpop.permute.xlu0 %6272  ;;  %v11196_v30 = vrot.slane %v7654_v29, %v8058_v32  ;;  %v11199_v56 = vrot.slane %v5915_v28, %v8058_v32  ;;  %v11202_v42 = vrot.slane %v5899_v36, %v8058_v32 }
 0x5bf   : > { %7495 = vrot.lane.b32.xlu0 %v7494_v20, %s7785_s17  ;;  %v4945_v57 = vcombine.high %v11098_v24, %v11076_v13  ;;  %v6011_v12 = vcombine.high %v11174_v2, %v11180_v9  ;;  %v6098_v8 = vcombine.low %v11186_v5, %v11166_v34  ;;  %v11212_v47 = vrot.slane %v5883_v14, %v8058_v32 }
 0x5c0   : > { %7515 = vrot.lane.b32.xlu1 %v7514_v10, %s7781_s23  ;;  %v5961_v0 = vrot.slane %v5947_v45, %v8233_v4  ;;  %v5588_v38 = vcombine.low %v12214_v41, %v10898_v6  ;;  %v5994_v11 = vcombine.low %v11199_v56, %v11177_v7  ;;  %v12215_v13 = vcombine.high %v12206_v23, %v12205_v27 }
 0x5c1   : > { %v7519_v20 = vpack.i.bf16 %v5369_v18, %v4945_v57  ;;  %v6149_v29 = vcombine.high %v11135_v43, %v11119_v25  ;;  %v11225_v28 = vrot.slane %v6130_v26, %v8233_v4  ;;  %v5589_v14 = vcombine.high %v12214_v41, %v10898_v6 }
 0x5c2   : > { %v7509_v24 = vpack.i.bf16 %v6011_v12, %v12215_v13  ;;  %v11227_v36 = vpop.permute.xlu1 %6266  ;;  %v11229_v17 = vpop.permute.xlu0 %6280  ;;  %v6012_v58 = vcombine.low %v5961_v0, %v5993_v16  ;;  %v5538_v45 = vcombine.low %v10903_v1, %v10945_v15  ;;  %v5962_v18 = vcombine.low %v11212_v47, %v11202_v42 }
 0x5c3   : > { %v5714_v25 = vrot.slane %v5706_v52, %v8233_v4  ;;  %v5570_v43 = vcombine.low %v11043_v35, %v11196_v30  ;;  %v5675_v33 = vcombine.high %v10843_v54, %v10853_v49  ;;  %v6106_v10 = vrot.slane %v6098_v8, %v8233_v4 }
 0x5c4   : > { %7520 = vrot.lane.b32.xlu1 %v7519_v20, %s7787_s19  ;;  %v6458_v6 = vcombine.low %v11158_v21, %v11193_v61  ;;  %7510 = vrot.lane.b32.xlu0 %v7509_v24, %s7783_s16  ;;  %v5707_v26 = vcombine.high %v10883_v40, %v10895_v46  ;;  %v6010_v57 = vcombine.low %v11174_v2, %v11180_v9 }
 0x5c5   : > { %v6002_v52 = vrot.slane %v5994_v11, %v8233_v4  ;;  %v6474_v12 = vcombine.low %v11131_v31, %v11156_v44  ;;  %v12216_v54 = vcombine.high %v10814_v60, %v12212_v3  ;;  %v6013_v8 = vcombine.high %v5961_v0, %v5993_v16 }
 0x5c6   : > { %v6131_v41 = vcombine.high %v11151_v59, %v11154_v19  ;;  %v6442_v20 = vcombine.low %v11057_v50, %v11091_v55  ;;  %v11261_v40 = vpop.permute.xlu1 %6274  ;;  %v11263_v46 = vpop.permute.xlu0 %6288  ;;  %v7524_v13 = vpack.i.bf16 %v6012_v58, %v5588_v38  ;;  %v6150_v11 = vcombine.low %v6106_v10, %v11225_v28 }
 0x5c7   : > { %v7529_v49 = vpack.i.bf16 %v6149_v29, %v12216_v54  ;;  %v5970_v24 = vrot.slane %v5962_v18, %v8233_v4  ;;  %v6490_v60 = vcombine.low %v11229_v17, %v11263_v46  ;;  %v5546_v3 = vrot.slane %v5538_v45, %v8233_v4 }
 0x5c8   : > { %v5578_v59 = vrot.slane %v5570_v43, %v8233_v4  ;;  %v6099_v19 = vcombine.high %v11186_v5, %v11166_v34  ;;  %v5995_v16 = vcombine.high %v11199_v56, %v11177_v7  ;;  %v11277_v0 = vrot.slane %v6458_v6, %v8058_v32  ;;  %7525 = vrot.lane.b32.xlu0 %v7524_v13, %s7781_s23 }
 0x5c9   : > { %7530 = vrot.lane.b32.xlu1 %v7529_v49, %s7784_s15  ;;  %v5726_v38 = vcombine.low %v11109_v39, %v5714_v25  ;;  %v11282_v29 = vrot.slane %v6474_v12, %v8058_v32  ;;  %v11285_v58 = vrot.slane %v6490_v60, %v8058_v32  ;;  %v7534_v45 = vpack.i.bf16 %v6013_v8, %v5589_v14 }
 0x5ca   : > { %v6014_v18 = vcombine.low %v5970_v24, %v6002_v52  ;;  %v6145_v34 = vrot.slane %v6131_v41, %v8233_v4  ;;  %v11289_v5 = vrot.slane %v6442_v20, %v8058_v32  ;;  %v11291_v7 = vpop.permute.xlu1 %6282  ;;  %v11293_v56 = vpop.permute.xlu0 %6262  ;;  %v6151_v6 = vcombine.high %v6106_v10, %v11225_v28 }
 0x5cb   : > { %v7539_v43 = vpack.i.bf16 %v6150_v11, %v5726_v38  ;;  %v5963_v12 = vcombine.high %v11212_v47, %v11202_v42  ;;  %v6538_v54 = vcombine.low %v11282_v29, %v11285_v58  ;;  %v5590_v14 = vcombine.low %v5546_v3, %v5578_v59 }
 0x5cc   : > { %v5571_v49 = vcombine.high %v11043_v35, %v11196_v30  ;;  %v6113_v8 = vrot.slane %v6099_v19, %v8233_v4  ;;  %v6506_v41 = vcombine.low %v11289_v5, %v11277_v0  ;;  %v5727_v28 = vcombine.high %v11109_v39, %v5714_v25 }
 0x5cd   : > { %7535 = vrot.lane.b32.xlu1 %v7534_v45, %s7784_s15  ;;  %7540 = vrot.lane.b32.xlu0 %v7539_v43, %s7782_s24  ;;  %v5721_v42 = vrot.slane %v5707_v26, %v8233_v4  ;;  %v6009_v47 = vrot.slane %v5995_v16, %v8233_v4  ;;  %v7544_v10 = vpack.i.bf16 %v6014_v18, %v5590_v14 }
 0x5ce   : > { %v6015_v20 = vcombine.high %v5970_v24, %v6002_v52  ;;  %v5539_v13 = vcombine.high %v10903_v1, %v10945_v15  ;;  %v11313_v35 = vrot.slane %v6538_v54, %v8233_v4  ;;  %v11315_v30 = vpop.permute.xlu1 %7305  ;;  %v11317_v11 = vpop.permute.xlu0 %6270  ;;  %v7549_v60 = vpack.i.bf16 %v6151_v6, %v5727_v28 }
 0x5cf   : > { %v5689_v19 = vrot.slane %v5675_v33, %v8233_v4  ;;  %v6152_v39 = vcombine.low %v6113_v8, %v6145_v34  ;;  %v5977_v25 = vrot.slane %v5963_v12, %v8233_v4  ;;  %v5591_v26 = vcombine.high %v5546_v3, %v5578_v59 }
 0x5d0   : > { %v5585_v52 = vrot.slane %v5571_v49, %v8233_v4  ;;  %v11325_v15 = vrot.slane %v6506_v41, %v8233_v4  ;;  %v5553_v16 = vrot.slane %v5539_v13, %v8233_v4  ;;  %v6322_v33 = vcombine.low %v11293_v56, %v11317_v11 }
 0x5d1   : > { %7545 = vrot.lane.b32.xlu1 %v7544_v10, %s7782_s24  ;;  %7550 = vrot.lane.b32.xlu0 %v7549_v60, %s7785_s17  ;;  %v5728_v1 = vcombine.low %v5689_v19, %v5721_v42  ;;  %v7554_v24 = vpack.i.bf16 %v6015_v20, %v5591_v26  ;;  %v6016_v38 = vcombine.low %v5977_v25, %v6009_v47 }
 0x5d2   : > { %v11330_v45 = vpop.permute.xlu1 %7315  ;;  %v6279_v18 = vpop.permute.xlu0 %6278  ;;  %v6153_v3 = vcombine.high %v6113_v8, %v6145_v34  ;;  %v6570_v59 = vcombine.low %v11325_v15, %v11313_v35  ;;  %v5592_v6 = vcombine.low %v5553_v16, %v5585_v52  ;;  %v6306_v12 = vcombine.low %v11191_v37, %v11227_v36 }
 0x5d3   : > { %v7559_v43 = vpack.i.bf16 %v6152_v39, %v5728_v1  ;;  %v5729_v54 = vcombine.high %v5689_v19, %v5721_v42  ;;  %v6491_v14 = vcombine.high %v11229_v17, %v11263_v46  ;;  %v6338_v49 = vcombine.low %v11261_v40, %v11291_v7 }
 0x5d4   : > { %v7564_v41 = vpack.i.bf16 %v6016_v38, %v5592_v6  ;;  %v6539_v34 = vcombine.high %v11282_v29, %v11285_v58  ;;  %v6330_v8 = vrot.slane %v6322_v33, %v8058_v32  ;;  %v6017_v13 = vcombine.high %v5977_v25, %v6009_v47 }
 0x5d5   : > { %7555 = vrot.lane.b32.xlu1 %v7554_v24, %s7785_s17  ;;  %7560 = vrot.lane.b32.xlu0 %v7559_v43, %s7786_s18  ;;  %v7569_v20 = vpack.i.bf16 %v6153_v3, %v5729_v54  ;;  %v6475_v42 = vcombine.high %v11131_v31, %v11156_v44  ;;  %v6459_v17 = vcombine.high %v11158_v21, %v11193_v61 }
 0x5d6   : > { %v11345_v28 = vpop.permute.xlu1 %7325  ;;  %v6287_v10 = vpop.permute.xlu0 %6286  ;;  %v6443_v60 = vcombine.high %v11057_v50, %v11091_v55  ;;  %v6507_v29 = vcombine.high %v11289_v5, %v11277_v0  ;;  %v6314_v58 = vrot.slane %v6306_v12, %v8058_v32  ;;  %v5593_v47 = vcombine.high %v5553_v16, %v5585_v52 }
 0x5d7   : > { %v6354_v46 = vcombine.low %v6279_v18, %v6287_v10  ;;  %v6505_v19 = vrot.slane %v6491_v14, %v8058_v32  ;;  %v6346_v31 = vrot.slane %v6338_v49, %v8058_v32  ;;  %v6571_v21 = vcombine.high %v11325_v15, %v11313_v35 }
 0x5d8   : > { %v6553_v61 = vrot.slane %v6539_v34, %v8233_v4  ;;  %v6370_v50 = vcombine.low %v6314_v58, %v6330_v8  ;;  %v7574_v0 = vpack.i.bf16 %v6017_v13, %v5593_v47  ;;  %v6489_v5 = vrot.slane %v6475_v42, %v8058_v32 }
 0x5d9   : > { %7565 = vrot.lane.b32.xlu1 %v7564_v41, %s7786_s18  ;;  %7570 = vrot.lane.b32.xlu0 %v7569_v20, %s7787_s19  ;;  %v6362_v44 = vrot.slane %v6354_v46, %v8058_v32  ;;  %v6473_v39 = vrot.slane %v6459_v17, %v8058_v32  ;;  %v6355_v52 = vcombine.high %v6279_v18, %v6287_v10 }
 0x5da   : > { %v11364_v55 = vpop.permute.xlu0 %7300  ;;  %v11368_v26 = vpop.permute.xlu1 %7340  ;;  %v6521_v24 = vrot.slane %v6507_v29, %v8233_v4  ;;  %v6457_v16 = vrot.slane %v6443_v60, %v8058_v32  ;;  %v6554_v38 = vcombine.low %v6489_v5, %v6505_v19  ;;  %v6339_v33 = vcombine.high %v11261_v40, %v11291_v7 }
 0x5db   : > { %v6402_v25 = vcombine.low %v6346_v31, %v6362_v44  ;;  %v6403_v1 = vcombine.high %v6346_v31, %v6362_v44  ;;  %v6323_v3 = vcombine.high %v11293_v56, %v11317_v11  ;;  %v6371_v6 = vcombine.high %v6314_v58, %v6330_v8 }
 0x5dc   : > { %v11382_v18 = vrot.slane %v6370_v50, %v8233_v4  ;;  %v6572_v54 = vcombine.low %v6521_v24, %v6553_v61  ;;  %v6522_v14 = vcombine.low %v6457_v16, %v6473_v39  ;;  %v6307_v49 = vcombine.high %v11191_v37, %v11227_v36 }
 0x5dd   : > { %6607 = vrot.lane.b32.xlu1 %v6571_v21, %s7783_s16  ;;  %7575 = vrot.lane.b32.xlu0 %v7574_v0, %s7787_s19  ;;  %v11377_v43 = vrot.slane %v6402_v25, %v8233_v4  ;;  %v6369_v41 = vrot.slane %v6355_v52, %v8058_v32  ;;  %v6417_v40 = vrot.slane %v6403_v1, %v8233_v4 }
 0x5de   : > { %v11384_v12 = vpop.permute.xlu0 %7310  ;;  %v6562_v56 = vrot.slane %v6554_v38, %v8233_v4  ;;  %v11394_v11 = vpop.permute.xlu1 %7345  ;;  %v6353_v34 = vrot.slane %v6339_v33, %v8058_v32  ;;  %v6337_v8 = vrot.slane %v6323_v3, %v8058_v32  ;;  %v6385_v10 = vrot.slane %v6371_v6, %v8233_v4 }
 0x5df   : > { %v6435_v7 = vcombine.high %v11382_v18, %v11377_v43  ;;  %v6573_v36 = vcombine.high %v6521_v24, %v6553_v61  ;;  %v6530_v20 = vrot.slane %v6522_v14, %v8233_v4  ;;  %v6321_v13 = vrot.slane %v6307_v49, %v8058_v32  ;;  %v12217_v49 = vld [vmem:[#allocation24_spill] sm:$0xff] }
 0x5e0   : > { %v6418_v42 = vcombine.low %v6353_v34, %v6369_v41  ;;  %v6436_v17 = vcombine.low %v6385_v10, %v6417_v40  ;;  %v6434_v46 = vcombine.low %v11382_v18, %v11377_v43  ;;  %v6555_v60 = vcombine.high %v6489_v5, %v6505_v19  ;;  %v6650_v43 = vld [vmem:[%s11862_s4] sm:$0xff] }
 0x5e1   : > { %6611 = vrot.lane.b32.xlu0 %v6572_v54, %s7781_s23  ;;  %6579 = vrot.lane.b32.xlu1 %v6435_v7, %s7783_s16  ;;  %v6386_v29 = vcombine.low %v6321_v13, %v6337_v8  ;;  %v6574_v47 = vcombine.low %v6530_v20, %v6562_v56  ;;  %v6523_v44 = vcombine.high %v6457_v16, %v6473_v39 }
 0x5e2   : > { %v11400_v37 = vpop.permute.xlu0 %7320  ;;  %v7351_v31 = vpop.permute.xlu1 %7350  ;;  %v6426_v21 = vrot.slane %v6418_v42, %v8233_v4  ;;  %v6437_v61 = vcombine.high %v6385_v10, %v6417_v40  ;;  %v6569_v50 = vrot.slane %v6555_v60, %v8233_v4  ;;  %v6575_v5 = vcombine.high %v6530_v20, %v6562_v56  ;;  %v12220_v56 = vld [vmem:[#allocation52_spill] sm:$0xff] }
 0x5e3   : > { %v6394_v0 = vrot.slane %v6386_v29, %v8233_v4  ;;  %v6419_v25 = vcombine.high %v6353_v34, %v6369_v41  ;;  %v6537_v1 = vrot.slane %v6523_v44, %v8233_v4  ;;  %v6387_v24 = vcombine.high %v6321_v13, %v6337_v8  ;;  %v12218_v41 = vld [vmem:[#allocation31_spill] sm:$0xff]  ;;  %v6669_v44 = vld [vmem:[%s11863_s5] sm:$0xff] }
 0x5e4   : > { %v12219_v40 = vcombine.low %v12217_v49, %v12218_v41  ;;  %v12221_v34 = vld [vmem:[#allocation51_spill] sm:$0xff]  ;;  %v7343_v13 = vunpack.i.h.bf16 %v11368_v26  ;;  %v7342_v42 = vunpack.i.l.bf16 %v11368_v26 }
 0x5e5   : > { %6615 = vrot.lane.b32.xlu0 %v6573_v36, %s7784_s15  ;;  %6583 = vrot.lane.b32.xlu1 %v6436_v17, %s7781_s23  ;;  %v6438_v52 = vcombine.low %v6394_v0, %v6426_v21  ;;  %v6576_v3 = vcombine.low %v6537_v1, %v6569_v50  ;;  %v6433_v6 = vrot.slane %v6419_v25, %v8233_v4  ;;  %v7352_v25 = vunpack.i.l.bf16 %v7351_v31 }
 0x5e6   : > { %v11408_v58 = vpop.permute.xlu0 %7330  ;;  %v11417_v39 = vpop.permute.xlu1 %7380  ;;  %v6439_v54 = vcombine.high %v6394_v0, %v6426_v21  ;;  %v6401_v14 = vrot.slane %v6387_v24, %v8233_v4  ;;  %v12222_v8 = vcombine.low %v12220_v56, %v12221_v34  ;;  %v6577_v20 = vcombine.high %v6537_v1, %v6569_v50 }
 0x5e7   : > { %v7348_v21 = vunpack.i.h.bf16 %v11394_v11 }
 0x5e8   : > { %v6440_v60 = vcombine.low %v6401_v14, %v6433_v6 }
 0x5e9   : > { %6619 = vrot.lane.b32.xlu0 %v6574_v47, %s7782_s24  ;;  %6587 = vrot.lane.b32.xlu1 %v6437_v61, %s7784_s15  ;;  %v7347_v61 = vunpack.i.l.bf16 %v11394_v11 }
 0x5ea   : > { %v7336_v19 = vpop.permute.xlu0 %7335  ;;  %v7386_v17 = vpop.permute.xlu1 %7385 }
 0x5eb   : > { %v7338_v16 = vunpack.i.h.bf16 %v7336_v19  ;;  %v7337_v38 = vunpack.i.l.bf16 %v7336_v19  ;;  %v6441_v19 = vcombine.high %v6401_v14, %v6433_v6 }
 0x5ed   : > { %6623 = vrot.lane.b32.xlu0 %v6575_v5, %s7785_s17  ;;  %6591 = vrot.lane.b32.xlu1 %v6438_v52, %s7782_s24  ;;  %v4578_v7 = vsel %vm518_vm3, %v12219_v40, %v7338_v16  ;;  %v4218_v10 = vsel %vm518_vm3, %v12222_v8, %v7337_v38  ;;  %v7353_v5 = vunpack.i.h.bf16 %v7351_v31 }
 0x5ee   : > { %v7356_v33 = vpop.permute.xlu0 %7355  ;;  %v4579_v29 = vsel %vm520_vm5, %v4578_v7, %v7343_v13  ;;  %v4219_v47 = vsel %vm520_vm5, %v4218_v10, %v7342_v42  ;;  %v11445_v52 = vpop.permute.xlu1 %7405 }
 0x5ef   : > { %v4220_v26 = vsel %vm522_vm4, %v4219_v47, %v7347_v61  ;;  %v4580_v0 = vsel %vm522_vm4, %v4579_v29, %v7348_v21  ;;  %v7358_v1 = vunpack.i.h.bf16 %v7356_v33  ;;  %v7357_v24 = vunpack.i.l.bf16 %v7356_v33  ;;  %v12223_v29 = vld [vmem:[#allocation60_spill] sm:$0xff]  ;;  %v12227_v61 = vld [vmem:[#allocation55_spill] sm:$0xff] }
 0x5f0   : > { %v4221_v11 = vsel %vm524_vm6, %v4220_v26, %v7352_v25  ;;  %v4581_v38 = vsel %vm524_vm6, %v4580_v0, %v7353_v5  ;;  %v12226_v21 = vld [vmem:[#allocation56_spill] sm:$0xff]  ;;  %v7383_v5 = vunpack.i.h.bf16 %v11417_v39  ;;  %v7382_v25 = vunpack.i.l.bf16 %v11417_v39 }
 0x5f1   : > { %6627 = vrot.lane.b32.xlu0 %v6576_v3, %s7786_s18  ;;  %6595 = vrot.lane.b32.xlu1 %v6439_v54, %s7785_s17  ;;  %v4222_v49 = vsel %vm526_vm7, %v4221_v11, %v7357_v24  ;;  %v4582_v41 = vsel %vm526_vm7, %v4581_v38, %v7358_v1 }
 0x5f2   : > { %v7361_v36 = vpop.permute.xlu0 %7360  ;;  %v11452_v14 = vpop.permute.xlu1 %7415 }
 0x5f3   : > { %v7363_v31 = vunpack.i.h.bf16 %v7361_v36  ;;  %v7362_v40 = vunpack.i.l.bf16 %v7361_v36  ;;  %v12224_v36 = vld [vmem:[#allocation59_spill] sm:$0xff] }
 0x5f4   : > { %v12225_v47 = vcombine.low %v12223_v29, %v12224_v36  ;;  %v7408_v36 = vunpack.i.h.bf16 %v11445_v52 }
 0x5f5   : > { %6631 = vrot.lane.b32.xlu0 %v6577_v20, %s7787_s19  ;;  %6599 = vrot.lane.b32.xlu1 %v6440_v60, %s7786_s18 }
 0x5f6   : > { %v7366_v50 = vpop.permute.xlu0 %7365  ;;  %v11476_v1 = vpop.permute.xlu1 %7425 }
 0x5f7   : > { %v7368_v3 = vunpack.i.h.bf16 %v7366_v50  ;;  %v7367_v54 = vunpack.i.l.bf16 %v7366_v50  ;;  %v12228_v50 = vcombine.low %v12226_v21, %v12227_v61 }
 0x5f9   : > { %6672 = vperm.xlu0 %7298, %v6669_v44   ;;  %6603 = vrot.lane.b32.xlu1 %v6441_v19, %s7787_s19  ;;  %v4223_v56 = vsel %vm528_vm8, %v4222_v49, %v7367_v54  ;;  %v4583_v34 = vsel %vm528_vm8, %v4582_v41, %v7368_v3  ;;  %v5426_v44 = vsel %vm518_vm3, %v12225_v47, %v7363_v31  ;;  %v7388_v54 = vunpack.i.h.bf16 %v7386_v17 }
 0x5fa   : > { %v5002_v26 = vsel %vm518_vm3, %v12228_v50, %v7362_v40  ;;  %v7387_v49 = vunpack.i.l.bf16 %v7386_v17  ;;  %v7303_v31 = vunpack.i.h.bf16 %v11364_v55  ;;  %v7302_v40 = vunpack.i.l.bf16 %v11364_v55  ;;  %v12229_v50 = vld [vmem:[#allocation27_spill] sm:$0xff] }
 0x5fb   : > { %v7371_v16 = vpop.permute.xlu0 %7370  ;;  %v7407_v55 = vunpack.i.l.bf16 %v11445_v52 }
 0x5fc   : > { %v7373_v8 = vunpack.i.h.bf16 %v7371_v16  ;;  %v7372_v10 = vunpack.i.l.bf16 %v7371_v16 }
 0x5fe   : > { %v5003_v0 = vsel %vm520_vm5, %v5002_v26, %v7372_v10  ;;  %v5427_v19 = vsel %vm520_vm5, %v5426_v44, %v7373_v8  ;;  %v12230_v26 = vld [vmem:[#allocation26_spill] sm:$0xff] }
 0x5ff   : > { %v5004_v16 = vsel %vm522_vm4, %v5003_v0, %v7382_v25  ;;  %v5428_v11 = vsel %vm522_vm4, %v5427_v19, %v7383_v5  ;;  %v12231_v0 = vcombine.low %v12229_v50, %v12230_v26  ;;  %v12232_v5 = vld [vmem:[#allocation19_spill] sm:$0xff]  ;;  %v12233_v25 = vld [vmem:[#allocation18_spill] sm:$0xff] }
 0x600   : > { %v7376_v6 = vpop.permute.xlu0 %7375  ;;  %v5429_v39 = vsel %vm524_vm6, %v5428_v11, %v7388_v54  ;;  %v7313_v54 = vunpack.i.h.bf16 %v11384_v12 }
 0x601   : > { %v7378_v7 = vunpack.i.h.bf16 %v7376_v6  ;;  %v7377_v33 = vunpack.i.l.bf16 %v7376_v6  ;;  %v3377_v19 = vsel %vm518_vm3, %v12231_v0, %v7303_v31  ;;  %v7323_v0 = vunpack.i.h.bf16 %v11400_v37 }
 0x603   : > { %v11457_v20 = vsel %vm530_vm9, %v4223_v56, %v7377_v33  ;;  %v11460_v13 = vsel %vm530_vm9, %v4583_v34, %v7378_v7  ;;  %v5005_v7 = vsel %vm524_vm6, %v5004_v16, %v7387_v49  ;;  %v11484_v56 = vpop.permute.xlu1 %7435  ;;  %v7312_v49 = vunpack.i.l.bf16 %v11384_v12 }
 0x604   : > { %v7391_v42 = vpop.permute.xlu0 %7390  ;;  %v7223_v60 = vpack.c.bf16 %v11460_v13, %v11457_v20 }
 0x605   : > { %v7393_v38 = vunpack.i.h.bf16 %v7391_v42  ;;  %v7392_v3 = vunpack.i.l.bf16 %v7391_v42 }
 0x607   : > { %v5006_v34 = vsel %vm526_vm7, %v5005_v7, %v7392_v3  ;;  %v5430_v8 = vsel %vm526_vm7, %v5429_v39, %v7393_v38  ;;  %v7308_v38 = vunpack.i.h.bf16 %v11315_v30  ;;  %v7307_v3 = vunpack.i.l.bf16 %v11315_v30  ;;  %v12238_v39 = vld [vmem:[#allocation28_spill] sm:$0xff] }
 0x608   : > { %v7396_v24 = vpop.permute.xlu0 %7395 }
 0x609   : > { %v7398_v41 = vunpack.i.h.bf16 %v7396_v24  ;;  %v7397_v6 = vunpack.i.l.bf16 %v7396_v24  ;;  %v12234_v24 = vcombine.low %v12232_v5, %v12233_v25  ;;  %v3378_v30 = vsel %vm520_vm5, %v3377_v19, %v7308_v38 }
 0x60a   : > { %v7322_v5 = vunpack.i.l.bf16 %v11400_v37  ;;  %v7318_v19 = vunpack.i.h.bf16 %v11330_v45  ;;  %v7317_v25 = vunpack.i.l.bf16 %v11330_v45  ;;  %v7427_v37 = vunpack.i.l.bf16 %v11476_v1 }
 0x60b   : > { %v5007_v17 = vsel %vm528_vm8, %v5006_v34, %v7397_v6  ;;  %v5431_v29 = vsel %vm528_vm8, %v5430_v8, %v7398_v41  ;;  %v3370_v52 = vsel %vm518_vm3, %v12234_v24, %v7302_v40  ;;  %v12235_v41 = vld [vmem:[#allocation49_spill] sm:$0xff]  ;;  %v12236_v6 = vld [vmem:[#allocation48_spill] sm:$0xff]  ;;  %v11520_v8 = vpop.permute.xlu1 %7440 }
 0x60c   : > { %v7401_v33 = vpop.permute.xlu0 %7400  ;;  %v12237_v7 = vcombine.low %v12235_v41, %v12236_v6  ;;  %v7333_v6 = vunpack.i.h.bf16 %v11408_v58 }
 0x60d   : > { %v7403_v10 = vunpack.i.h.bf16 %v7401_v33  ;;  %v7402_v42 = vunpack.i.l.bf16 %v7401_v33  ;;  %v12239_v33 = vld [vmem:[#allocation16_spill] sm:$0xff] }
 0x60e   : > { %v3794_v31 = vsel %vm518_vm3, %v12237_v7, %v7408_v36  ;;  %v12240_v34 = vcombine.low %v12238_v39, %v12239_v33  ;;  %v7417_v36 = vunpack.i.l.bf16 %v11452_v14  ;;  %v7332_v7 = vunpack.i.l.bf16 %v11408_v58 }
 0x60f   : > { %v11493_v47 = vsel %vm530_vm9, %v5007_v17, %v7402_v42  ;;  %v11496_v44 = vsel %vm530_vm9, %v5431_v29, %v7403_v10  ;;  %v3371_v10 = vsel %vm520_vm5, %v3370_v52, %v7307_v3  ;;  %v7418_v29 = vunpack.i.h.bf16 %v11452_v14 }
 0x610   : > { %v7411_v21 = vpop.permute.xlu0 %7410  ;;  %v7227_v61 = vpack.c.bf16 %v11496_v44, %v11493_v47  ;;  %v3801_v40 = vsel %vm518_vm3, %v12240_v34, %v7407_v55  ;;  %v3372_v26 = vsel %vm522_vm4, %v3371_v10, %v7312_v49  ;;  %v3379_v55 = vsel %vm522_vm4, %v3378_v30, %v7313_v54 }
 0x611   : > { %v7413_v16 = vunpack.i.h.bf16 %v7411_v21  ;;  %v7412_v11 = vunpack.i.l.bf16 %v7411_v21  ;;  %v3373_v3 = vsel %vm524_vm6, %v3372_v26, %v7317_v25  ;;  %v7428_v54 = vunpack.i.h.bf16 %v11476_v1 }
 0x612   : > { %v3380_v49 = vsel %vm524_vm6, %v3379_v55, %v7318_v19  ;;  %v3374_v45 = vsel %vm526_vm7, %v3373_v3, %v7322_v5  ;;  %v7328_v34 = vunpack.i.h.bf16 %v11345_v28  ;;  %v7438_v1 = vunpack.i.h.bf16 %v11484_v56  ;;  %v12242_v3 = vld [vmem:[#allocation66_spill] sm:$0xff] }
 0x613   : > { %v3795_v42 = vsel %vm520_vm5, %v3794_v31, %v7413_v16  ;;  %v3802_v12 = vsel %vm520_vm5, %v3801_v40, %v7412_v11  ;;  %v3381_v41 = vsel %vm526_vm7, %v3380_v49, %v7323_v0  ;;  %v7327_v40 = vunpack.i.l.bf16 %v11345_v28 }
 0x614   : > { %v7421_v17 = vpop.permute.xlu0 %7420  ;;  %v3796_v24 = vsel %vm522_vm4, %v3795_v42, %v7418_v29  ;;  %v3803_v52 = vsel %vm522_vm4, %v3802_v12, %v7417_v36  ;;  %v7437_v10 = vunpack.i.l.bf16 %v11484_v56  ;;  %v12251_v47 = vcombine.low %v12209_v22, %v12210_v63 }
 0x615   : > { %v7423_v21 = vunpack.i.h.bf16 %v7421_v17  ;;  %v7422_v50 = vunpack.i.l.bf16 %v7421_v17  ;;  %v11536_v16 = vpop.permute.xlu1 %7465  ;;  %v3382_v17 = vsel %vm528_vm8, %v3381_v41, %v7328_v34  ;;  %v3375_v29 = vsel %vm528_vm8, %v3374_v45, %v7327_v40 }
 0x616   : > { %v3376_v26 = vsel %vm530_vm9, %v3375_v29, %v7332_v7 }
 0x617   : > { %v3797_v14 = vsel %vm524_vm6, %v3796_v24, %v7423_v21  ;;  %v3804_v11 = vsel %vm524_vm6, %v3803_v52, %v7422_v50  ;;  %v3383_v50 = vsel %vm530_vm9, %v3382_v17, %v7333_v6  ;;  %v7443_v6 = vunpack.i.h.bf16 %v11520_v8 }
 0x618   : > { %v7431_v38 = vpop.permute.xlu0 %7430  ;;  %v3805_v39 = vsel %vm526_vm7, %v3804_v11, %v7427_v37  ;;  %v3798_v33 = vsel %vm526_vm7, %v3797_v14, %v7428_v54  ;;  %v12241_v14 = vcombine.low %v12168_v48, %v12188_v62  ;;  %v12243_v54 = vld [vmem:[#allocation34_spill] sm:$0xff] }
 0x619   : > { %v7471_v31 = vpop.permute.xlu1 %7470  ;;  %v3806_v58 = vsel %vm528_vm8, %v3805_v39, %v7437_v10  ;;  %v3799_v36 = vsel %vm528_vm8, %v3798_v33, %v7438_v1  ;;  %v7433_v19 = vunpack.i.h.bf16 %v7431_v38  ;;  %v7432_v25 = vunpack.i.l.bf16 %v7431_v38 }
 0x61a   : > { %v12244_v37 = vcombine.low %v12242_v3, %v12243_v54  ;;  %v7442_v38 = vunpack.i.l.bf16 %v11520_v8 }
 0x61b   : > { %v4585_v11 = vsel %vm518_vm3, %v12241_v14, %v7433_v19  ;;  %v7467_v19 = vunpack.i.l.bf16 %v11536_v16 }
 0x61c   : > { %v7446_v30 = vpop.permute.xlu0 %7445  ;;  %v4225_v49 = vsel %vm518_vm3, %v12244_v37, %v7432_v25  ;;  %v4586_v48 = vsel %vm520_vm5, %v4585_v11, %v7443_v6 }
 0x61d   : > { %v7448_v42 = vunpack.i.h.bf16 %v7446_v30  ;;  %v7447_v12 = vunpack.i.l.bf16 %v7446_v30  ;;  %v11558_v21 = vpop.permute.xlu1 %7475  ;;  %v4226_v34 = vsel %vm520_vm5, %v4225_v49, %v7442_v38  ;;  %v12248_v38 = vld [vmem:[#allocation53_spill] sm:$0xff] }
 0x61f   : > { %v3807_v28 = vsel %vm530_vm9, %v3806_v58, %v7447_v12  ;;  %v3800_v56 = vsel %vm530_vm9, %v3799_v36, %v7448_v42  ;;  %v7473_v42 = vunpack.i.h.bf16 %v7471_v31  ;;  %v7472_v12 = vunpack.i.l.bf16 %v7471_v31 }
 0x620   : > { %v7451_v55 = vpop.permute.xlu0 %7450  ;;  %v7217_v0 = vpack.c.bf16 %v3807_v28, %v3383_v50  ;;  %v7219_v5 = vpack.c.bf16 %v3800_v56, %v3376_v26 }
 0x621   : > { %v7481_v24 = vpop.permute.xlu1 %7480  ;;  %v7453_v45 = vunpack.i.h.bf16 %v7451_v55  ;;  %v7452_v41 = vunpack.i.l.bf16 %v7451_v55 }
 0x622   : > { %7218 = vmatprep.subr.bf16.mxu1 %v7217_v0  ;;  %v7483_v58 = vunpack.i.h.bf16 %v7481_v24  ;;  %v7482_v29 = vunpack.i.l.bf16 %v7481_v24  ;;  %v7478_v24 = vunpack.i.h.bf16 %v11558_v21 }
 0x623   : > { %7220 = vmatpush1.bf16.msra.mxu1 %v7219_v5  ;;  %v4227_v40 = vsel %vm522_vm4, %v4226_v34, %v7452_v41  ;;  %v4587_v1 = vsel %vm522_vm4, %v4586_v48, %v7453_v45  ;;  %v7468_v5 = vunpack.i.h.bf16 %v11536_v16  ;;  %v12245_v45 = vld [vmem:[#allocation15_spill] sm:$0xff]  ;;  %v12246_v41 = vld [vmem:[#allocation61_spill] sm:$0xff] }
 0x624   : > { %v12247_v6 = vcombine.low %v12245_v45, %v12246_v41 }
 0x625   : > { %v7456_v52 = vpop.permute.xlu0 %7455  ;;  %v7486_v33 = vpop.permute.xlu1 %7485 }
 0x626   : > { %v7458_v7 = vunpack.i.h.bf16 %v7456_v52  ;;  %v7457_v39 = vunpack.i.l.bf16 %v7456_v52  ;;  %v7477_v52 = vunpack.i.l.bf16 %v11558_v21  ;;  %v7488_v11 = vunpack.i.h.bf16 %v7486_v33 }
 0x627   : > { %v7487_v3 = vunpack.i.l.bf16 %v7486_v33  ;;  %v5009_v16 = vsel %vm518_vm3, %v12247_v6, %v7467_v19 }
 0x628   : > { %v4228_v17 = vsel %vm524_vm6, %v4227_v40, %v7457_v39  ;;  %v4588_v8 = vsel %vm524_vm6, %v4587_v1, %v7458_v7  ;;  %v12249_v7 = vld [vmem:[#allocation54_spill] sm:$0xff]  ;;  %v5010_v48 = vsel %vm520_vm5, %v5009_v16, %v7477_v52 }
 0x629   : > { %v7461_v62 = vpop.permute.xlu0 %7460  ;;  %v12250_v39 = vcombine.low %v12248_v38, %v12249_v7  ;;  %v5011_v20 = vsel %vm522_vm4, %v5010_v48, %v7487_v3 }
 0x62a   : > { %v7463_v10 = vunpack.i.h.bf16 %v7461_v62  ;;  %v7462_v30 = vunpack.i.l.bf16 %v7461_v62  ;;  %v11582_v28 = vpop.permute.xlu1 %7500 }
 0x62b   : > { %v5433_v21 = vsel %vm518_vm3, %v12250_v39, %v7468_v5 }
 0x62c   : > { %v4229_v36 = vsel %vm526_vm7, %v4228_v17, %v7462_v30  ;;  %v4589_v50 = vsel %vm526_vm7, %v4588_v8, %v7463_v10  ;;  %v5434_v62 = vsel %vm520_vm5, %v5433_v21, %v7478_v24  ;;  %v7502_v24 = vunpack.i.l.bf16 %v11582_v28 }
 0x62d   : > { %v7491_v26 = vpop.permute.xlu0 %7490  ;;  %v4230_v56 = vsel %vm528_vm8, %v4229_v36, %v7472_v12  ;;  %v4590_v55 = vsel %vm528_vm8, %v4589_v50, %v7473_v42  ;;  %v5435_v13 = vsel %vm522_vm4, %v5434_v62, %v7488_v11 }
 0x62e   : > { %v4231_v0 = vsel %vm530_vm9, %v4230_v56, %v7482_v29  ;;  %v4591_v31 = vsel %vm530_vm9, %v4590_v55, %v7483_v58  ;;  %v7506_v14 = vpop.permute.xlu1 %7505  ;;  %v7493_v37 = vunpack.i.h.bf16 %v7491_v26  ;;  %v7492_v49 = vunpack.i.l.bf16 %v7491_v26 }
 0x62f   : > { %v7221_v25 = vpack.c.bf16 %v4591_v31, %v4231_v0  ;;  %v7508_v42 = vunpack.i.h.bf16 %v7506_v14  ;;  %v7507_v12 = vunpack.i.l.bf16 %v7506_v14  ;;  %v5793_v44 = vsel %vm518_vm3, %v12251_v47, %v7502_v24 }
 0x630   : > { %v5012_v1 = vsel %vm524_vm6, %v5011_v20, %v7492_v49 }
 0x631   : > { %v7496_v54 = vpop.permute.xlu0 %7495  ;;  %7222 = vmatprep.subr.bf16.mxu1 %v7221_v25  ;;  %v7503_v25 = vunpack.i.h.bf16 %v11582_v28 }
 0x632   : > { %7224 = vmatpush1.bf16.msra.mxu1 %v7223_v60  ;;  %v7498_v34 = vunpack.i.h.bf16 %v7496_v54  ;;  %v7497_v33 = vunpack.i.l.bf16 %v7496_v54  ;;  %v7516_v40 = vpop.permute.xlu1 %7515  ;;  %v5436_v60 = vsel %vm524_vm6, %v5435_v13, %v7493_v37 }
 0x633   : > { %v7518_v14 = vunpack.i.h.bf16 %v7516_v40  ;;  %v7517_v11 = vunpack.i.l.bf16 %v7516_v40 }
 0x634   : > { %v5013_v10 = vsel %vm526_vm7, %v5012_v1, %v7497_v33  ;;  %v5437_v30 = vsel %vm526_vm7, %v5436_v60, %v7498_v34 }
 0x635   : > { %v5014_v36 = vsel %vm528_vm8, %v5013_v10, %v7507_v12  ;;  %v5438_v50 = vsel %vm528_vm8, %v5437_v30, %v7508_v42  ;;  %v5794_v39 = vsel %vm520_vm5, %v5793_v44, %v7517_v11 }
 0x636   : > { %v7521_v17 = vpop.permute.xlu1 %7520  ;;  %v7511_v29 = vpop.permute.xlu0 %7510 }
 0x637   : > { %v7523_v8 = vunpack.i.h.bf16 %v7521_v17  ;;  %v7522_v58 = vunpack.i.l.bf16 %v7521_v17  ;;  %v7513_v54 = vunpack.i.h.bf16 %v7511_v29  ;;  %v7512_v37 = vunpack.i.l.bf16 %v7511_v29 }
 0x639   : > { %v5015_v26 = vsel %vm530_vm9, %v5014_v36, %v7522_v58  ;;  %v5439_v56 = vsel %vm530_vm9, %v5438_v50, %v7523_v8  ;;  %v6210_v22 = vsel %vm518_vm3, %v6010_v57, %v7513_v54 }
 0x63a   : > { %v7225_v0 = vpack.c.bf16 %v5439_v56, %v5015_v26  ;;  %v7526_v31 = vpop.permute.xlu0 %7525 }
 0x63b   : > { %v7531_v55 = vpop.permute.xlu1 %7530  ;;  %v7528_v41 = vunpack.i.h.bf16 %v7526_v31  ;;  %v7527_v6 = vunpack.i.l.bf16 %v7526_v31 }
 0x63c   : > { %7226 = vmatprep.subr.bf16.mxu1 %v7225_v0  ;;  %v7533_v49 = vunpack.i.h.bf16 %v7531_v55  ;;  %v7532_v45 = vunpack.i.l.bf16 %v7531_v55 }
 0x63d   : > { %7228 = vmatpush1.bf16.msra.mxu1 %v7227_v61  ;;  %v12252_v61 = vcombine.low %v11067_v53, %v11047_v51  ;;  %v12253_v51 = vcombine.low %v12206_v23, %v12205_v27  ;;  %v6211_v20 = vsel %vm520_vm5, %v6210_v22, %v7528_v41 }
 0x63e   : > { %v5795_v63 = vsel %vm522_vm4, %v5794_v39, %v7532_v45 }
 0x63f   : > { %v7536_v5 = vpop.permute.xlu1 %7535  ;;  %v7541_v19 = vpop.permute.xlu0 %7540  ;;  %v6217_v28 = vsel %vm518_vm3, %v12252_v61, %v7503_v25  ;;  %v5786_v53 = vsel %vm518_vm3, %v12253_v51, %v7512_v37 }
 0x640   : > { %v7543_v16 = vunpack.i.h.bf16 %v7541_v19  ;;  %v7542_v38 = vunpack.i.l.bf16 %v7541_v19  ;;  %v6218_v21 = vsel %vm520_vm5, %v6217_v28, %v7518_v14  ;;  %v5787_v40 = vsel %vm520_vm5, %v5786_v53, %v7527_v6 }
 0x641   : > { %v6219_v62 = vsel %vm522_vm4, %v6218_v21, %v7533_v49  ;;  %v7538_v1 = vunpack.i.h.bf16 %v7536_v5  ;;  %v7537_v10 = vunpack.i.l.bf16 %v7536_v5 }
 0x642   : > { %v6220_v2 = vsel %vm524_vm6, %v6219_v62, %v7543_v16  ;;  %v5796_v9 = vsel %vm524_vm6, %v5795_v63, %v7542_v38 }
 0x643   : > { %v7546_v52 = vpop.permute.xlu1 %7545  ;;  %v7551_v3 = vpop.permute.xlu0 %7550  ;;  %v5788_v55 = vsel %vm522_vm4, %v5787_v40, %v7537_v10  ;;  %v6212_v0 = vsel %vm522_vm4, %v6211_v20, %v7538_v1 }
 0x644   : > { %v7553_v34 = vunpack.i.h.bf16 %v7551_v3  ;;  %v7552_v33 = vunpack.i.l.bf16 %v7551_v3  ;;  %v7548_v27 = vunpack.i.h.bf16 %v7546_v52  ;;  %v7547_v23 = vunpack.i.l.bf16 %v7546_v52 }
 0x646   : > { %v5797_v30 = vsel %vm526_vm7, %v5796_v9, %v7552_v33  ;;  %v6221_v42 = vsel %vm526_vm7, %v6220_v2, %v7553_v34  ;;  %v5789_v19 = vsel %vm524_vm6, %v5788_v55, %v7547_v23  ;;  %v6213_v25 = vsel %vm524_vm6, %v6212_v0, %v7548_v27 }
 0x647   : > { %v7556_v7 = vpop.permute.xlu1 %7555  ;;  %v7561_v48 = vpop.permute.xlu0 %7560 }
 0x648   : > { %v7563_v13 = vunpack.i.h.bf16 %v7561_v48  ;;  %v7562_v60 = vunpack.i.l.bf16 %v7561_v48  ;;  %v7558_v17 = vunpack.i.h.bf16 %v7556_v7  ;;  %v7557_v8 = vunpack.i.l.bf16 %v7556_v7 }
 0x64a   : > { %v5798_v36 = vsel %vm528_vm8, %v5797_v30, %v7562_v60  ;;  %v6222_v50 = vsel %vm528_vm8, %v6221_v42, %v7563_v13  ;;  %v5790_v14 = vsel %vm526_vm7, %v5789_v19, %v7557_v8  ;;  %v6214_v11 = vsel %vm526_vm7, %v6213_v25, %v7558_v17 }
 0x64b   : > { %v7566_v57 = vpop.permute.xlu1 %7565  ;;  %v7571_v12 = vpop.permute.xlu0 %7570 }
 0x64c   : > { %v7573_v58 = vunpack.i.h.bf16 %v7571_v12  ;;  %v7572_v29 = vunpack.i.l.bf16 %v7571_v12  ;;  %v7568_v26 = vunpack.i.h.bf16 %v7566_v57  ;;  %v7567_v56 = vunpack.i.l.bf16 %v7566_v57 }
 0x64e   : > { %v5799_v31 = vsel %vm530_vm9, %v5798_v36, %v7572_v29  ;;  %v6223_v5 = vsel %vm530_vm9, %v6222_v50, %v7573_v58  ;;  %v5791_v37 = vsel %vm528_vm8, %v5790_v14, %v7567_v56  ;;  %v6215_v49 = vsel %vm528_vm8, %v6214_v11, %v7568_v26 }
 0x64f   : > { %v7576_v24 = vpop.permute.xlu0 %7575  ;;  %v7229_v52 = vpack.c.bf16 %v6223_v5, %v5799_v31  ;;  %v6608_v45 = vpop.permute.xlu1 %6607 }
 0x650   : > { %v7578_v3 = vunpack.i.h.bf16 %v7576_v24  ;;  %v7577_v54 = vunpack.i.l.bf16 %v7576_v24  ;;  %v6641_v34 = vsel %vm518_vm3, %v6570_v59, %v6608_v45 }
 0x651   : > { %7230 = vmatprep.subr.bf16.mxu1 %v7229_v52 }
 0x652   : > { %v5792_v41 = vsel %vm530_vm9, %v5791_v37, %v7577_v54  ;;  %v6216_v6 = vsel %vm530_vm9, %v6215_v49, %v7578_v3 }
 0x653   : > { %v6612_v47 = vpop.permute.xlu0 %6611  ;;  %v7231_v44 = vpack.c.bf16 %v6216_v6, %v5792_v41  ;;  %v6580_v61 = vpop.permute.xlu1 %6579 }
 0x654   : > { %v6642_v33 = vsel %vm520_vm5, %v6641_v34, %v6612_v47  ;;  %v6634_v35 = vsel %vm518_vm3, %v6434_v46, %v6580_v61 }
 0x655   : > { %7232 = vmatpush1.bf16.msra.mxu1 %v7231_v44 }
 0x657   : > { %v6616_v28 = vpop.permute.xlu0 %6615  ;;  %v6584_v16 = vpop.permute.xlu1 %6583 }
 0x658   : > { %v6643_v22 = vsel %vm522_vm4, %v6642_v33, %v6616_v28  ;;  %v6635_v59 = vsel %vm520_vm5, %v6634_v35, %v6584_v16 }
 0x65b   : > { %v6620_v38 = vpop.permute.xlu0 %6619  ;;  %v6588_v7 = vpop.permute.xlu1 %6587 }
 0x65c   : > { %v6644_v51 = vsel %vm524_vm6, %v6643_v22, %v6620_v38  ;;  %v6636_v13 = vsel %vm522_vm4, %v6635_v59, %v6588_v7 }
 0x65f   : > { %v6624_v39 = vpop.permute.xlu0 %6623  ;;  %v6592_v21 = vpop.permute.xlu1 %6591 }
 0x660   : > { %v6645_v63 = vsel %vm526_vm7, %v6644_v51, %v6624_v39  ;;  %v6637_v60 = vsel %vm524_vm6, %v6636_v13, %v6592_v21 }
 0x663   : > { %v6628_v48 = vpop.permute.xlu0 %6627  ;;  %v6596_v53 = vpop.permute.xlu1 %6595 }
 0x664   : > { %v6646_v62 = vsel %vm528_vm8, %v6645_v63, %v6628_v48  ;;  %v6638_v1 = vsel %vm526_vm7, %v6637_v60, %v6596_v53 }
 0x667   : > { %v6632_v40 = vpop.permute.xlu0 %6631  ;;  %v6600_v20 = vpop.permute.xlu1 %6599 }
 0x668   : > { %v6647_v15 = vsel %vm530_vm9, %v6646_v62, %v6632_v40  ;;  %v6639_v10 = vsel %vm528_vm8, %v6638_v1, %v6600_v20 }
 0x669   : > { %6695 = vmatprep.subr.mxu1 %v6647_v15 }
 0x66b   : > { %v6604_v2 = vpop.permute.xlu1 %6603 }
 0x66c   : > { %v6640_v18 = vsel %vm530_vm9, %v6639_v10, %v6604_v2 }
 0x66d   : > { %6696 = vmatpush1.msra.mxu1 %v6640_v18 }
 0x66e   : > { %7201 = vmatmul.mubr.msk.f32.vlgmr.msra.gmra.mrb[0].mxu1 %vm6675_vm13, %v6650_v43 }
 0x678   : > { %v6673_v46 = vpop.permute.xlu0 %6672 }
 0x741   : > { %v6745_v9 = vpop.f32.mrb[0].mxu1 }
 0x742   : > { %v6746_v57 = vadd.f32 %v6745_v9, %v6673_v46  ;;  %v6747_v27 = vpop.f32.mrb[1].mxu1 }
 0x743   : > { %v6748_v42 = vadd.f32 %v6747_v27, %v6673_v46 }
 0x744   : > { %v6750_v23 = vmax.f32 %v6746_v57, 0.0 }
 0x745   : > { %v6751_v12 = vmax.f32 %v6748_v42, 0.0 }
 0x746   : > { %v6752_v30 = vmin.f32 %v6750_v23, 20.0 }
 0x747   : > { %v11689_v17 = vmin.f32 %v6751_v12, 20.0 }
 0x748   : > { %6758 = vrot.lane.b32.xlu0 %v6752_v30, %s7786_s18  ;;  %6755 = vrot.lane.b32.xlu1 %v6752_v30, %s7787_s19 }
 0x74c   : > { %6764 = vrot.lane.b32.xlu0 %v6752_v30, %s7782_s24  ;;  %6761 = vrot.lane.b32.xlu1 %v6752_v30, %s7785_s17 }
 0x750   : > { %6770 = vrot.lane.b32.xlu0 %v6752_v30, %s7781_s23  ;;  %6767 = vrot.lane.b32.xlu1 %v6752_v30, %s7784_s15 }
 0x754   : > { %6777 = vrot.lane.b32.xlu0 %v11689_v17, %s7787_s19  ;;  %6773 = vrot.lane.b32.xlu1 %v6752_v30, %s7783_s16  ;;  %s7103_s19 = scalar_lea.sflag [#allocation10], %s7934_s30 }
 0x758   : > { %6783 = vrot.lane.b32.xlu0 %v11689_v17, %s7785_s17  ;;  %6780 = vrot.lane.b32.xlu1 %v11689_v17, %s7786_s18 }
 0x75c   : > { %6789 = vrot.lane.b32.xlu0 %v11689_v17, %s7784_s15  ;;  %6786 = vrot.lane.b32.xlu1 %v11689_v17, %s7782_s24 }
 0x760   : > { %6795 = vrot.lane.b32.xlu0 %v11689_v17, %s7783_s16  ;;  %6792 = vrot.lane.b32.xlu1 %v11689_v17, %s7781_s23  ;;  %s7197_s23 = sshll.u32 %s7934_s30, 7  ;;  %s7208_s16 = sshll.u32 %s7851_s29, 11 }
 0x761   : > { %s11743_s24 = scalar_lea.vmem [#allocation11], %s7197_s23  ;;  %s11780_s18 = scalar_lea.hbm %s11864_s6, %s7208_s16 }
 0x762   : > { %s7116_s15 = sshll.u32 %s11743_s24, 4  ;;  %s11782_s15 = int_to_ptr.vmem [resolvable:$true] %s7116_s15 }
 0x763   : > { %s7701_s25 = scalar_lea.vmem %s11782_s15, 2048  ;;  %p7708_p13 = scmp.lt.s32.totalorder %s11782_s15, %s7706_s9 }
 0x764   : > { %p7702_p11 = scmp.ne.s32.totalorder %s11782_s15, %s7701_s25  ;;  %p7709_p1 = scmp.lt.s32.totalorder %s7707_s11, %s7701_s25 }
 0x766   : > { %p7703_p3 = pnand %p7702_p11, %p12255_p2  ;;  %p7710_p5 = por %p7709_p1, %p7708_p13 }
 0x768   : > { %p7704_p4 = pneg %p7703_p3 }
 0x76a   : > { %p7711_p7 = pnand %p7710_p5, %p7704_p4 }
 0x7ba   : > { %v6759_v8 = vpop.permute.xlu0 %6758  ;;  %v6756_v58 = vpop.permute.xlu1 %6755 }
 0x7bb   : > { %v6798_v26 = vcombine.low %v6752_v30, %v6759_v8  ;;  %v6799_v55 = vcombine.high %v6752_v30, %v6759_v8 }
 0x7bd   : > { %v6806_v19 = vrot.slane %v6798_v26, %v8058_v32  ;;  %v6813_v14 = vrot.slane %v6799_v55, %v8058_v32 }
 0x7be   : > { %v6765_v29 = vpop.permute.xlu0 %6764  ;;  %v6762_v36 = vpop.permute.xlu1 %6761 }
 0x7bf   : > { %v6814_v50 = vcombine.low %v6756_v58, %v6762_v36  ;;  %v6815_v56 = vcombine.high %v6756_v58, %v6762_v36 }
 0x7c1   : > { %v6822_v0 = vrot.slane %v6814_v50, %v8058_v32  ;;  %v6829_v25 = vrot.slane %v6815_v56, %v8058_v32 }
 0x7c2   : > { %v6771_v31 = vpop.permute.xlu0 %6770  ;;  %v6768_v5 = vpop.permute.xlu1 %6767 }
 0x7c3   : > { %v6830_v24 = vcombine.low %v6765_v29, %v6771_v31  ;;  %v6831_v52 = vcombine.high %v6765_v29, %v6771_v31  ;;  %v6862_v11 = vcombine.low %v6806_v19, %v6822_v0  ;;  %v6863_v3 = vcombine.high %v6806_v19, %v6822_v0 }
 0x7c4   : > { %v6878_v41 = vcombine.low %v6813_v14, %v6829_v25  ;;  %v6879_v6 = vcombine.high %v6813_v14, %v6829_v25 }
 0x7c5   : > { %v6838_v47 = vrot.slane %v6830_v24, %v8058_v32  ;;  %v6845_v44 = vrot.slane %v6831_v52, %v8058_v32  ;;  %v6870_v16 = vrot.slane %v6862_v11, %v8233_v4  ;;  %v6877_v38 = vrot.slane %v6863_v3, %v8233_v4 }
 0x7c6   : > { %v6778_v54 = vpop.permute.xlu0 %6777  ;;  %v6774_v37 = vpop.permute.xlu1 %6773  ;;  %v6886_v22 = vrot.slane %v6878_v41, %v8233_v4  ;;  %v6893_v51 = vrot.slane %v6879_v6, %v8233_v4 }
 0x7c7   : > { %v6846_v49 = vcombine.low %v6768_v5, %v6774_v37  ;;  %v6847_v45 = vcombine.high %v6768_v5, %v6774_v37 }
 0x7c9   : > { %v6854_v61 = vrot.slane %v6846_v49, %v8058_v32  ;;  %v6861_v28 = vrot.slane %v6847_v45, %v8058_v32 }
 0x7ca   : > { %v6784_v7 = vpop.permute.xlu0 %6783  ;;  %v6781_v39 = vpop.permute.xlu1 %6780 }
 0x7cb   : > { %v6894_v21 = vcombine.low %v6838_v47, %v6854_v61  ;;  %v6895_v34 = vcombine.high %v6838_v47, %v6854_v61  ;;  %v6910_v33 = vcombine.low %v6845_v44, %v6861_v28  ;;  %v6911_v48 = vcombine.high %v6845_v44, %v6861_v28 }
 0x7cc   : > { %v6950_v53 = vcombine.low %v6778_v54, %v6784_v7  ;;  %v6934_v63 = vcombine.low %v11689_v17, %v6781_v39  ;;  %v6951_v59 = vcombine.high %v6778_v54, %v6784_v7  ;;  %v6935_v13 = vcombine.high %v11689_v17, %v6781_v39 }
 0x7cd   : > { %v6902_v62 = vrot.slane %v6894_v21, %v8233_v4  ;;  %v6909_v40 = vrot.slane %v6895_v34, %v8233_v4  ;;  %v6918_v35 = vrot.slane %v6910_v33, %v8233_v4  ;;  %v6925_v15 = vrot.slane %v6911_v48, %v8233_v4 }
 0x7ce   : > { %v6958_v20 = vrot.slane %v6950_v53, %v8058_v32  ;;  %v6942_v60 = vrot.slane %v6934_v63, %v8058_v32  ;;  %v6790_v1 = vpop.permute.xlu0 %6789  ;;  %v6787_v10 = vpop.permute.xlu1 %6786  ;;  %v6965_v55 = vrot.slane %v6951_v59, %v8058_v32  ;;  %v6949_v0 = vrot.slane %v6935_v13, %v8058_v32 }
 0x7cf   : > { %v6926_v2 = vcombine.low %v6870_v16, %v6902_v62  ;;  %v6927_v43 = vcombine.high %v6870_v16, %v6902_v62  ;;  %v6928_v18 = vcombine.low %v6877_v38, %v6909_v40  ;;  %v6929_v46 = vcombine.high %v6877_v38, %v6909_v40 }
 0x7d0   : > { %v6930_v9 = vcombine.low %v6886_v22, %v6918_v35  ;;  %v6931_v57 = vcombine.high %v6886_v22, %v6918_v35  ;;  %v6932_v27 = vcombine.low %v6893_v51, %v6925_v15  ;;  %v6933_v23 = vcombine.high %v6893_v51, %v6925_v15 }
 0x7d1   : > { %v7070_v42 = vsel %vm9447_vm12, %v6926_v2, 0.0  ;;  %v7072_v12 = vsel %vm9447_vm12, %v6927_v43, 0.0  ;;  %v7074_v17 = vsel %vm9447_vm12, %v6928_v18, 0.0  ;;  %v7076_v8 = vsel %vm9447_vm12, %v6929_v46, 0.0 }
 0x7d2   : > { %v7078_v58 = vsel %vm9447_vm12, %v6930_v9, 0.0  ;;  %v7080_v29 = vsel %vm9447_vm12, %v6931_v57, 0.0  ;;  %v7082_v36 = vsel %vm9447_vm12, %v6932_v27, 0.0  ;;  %v7084_v50 = vsel %vm9447_vm12, %v6933_v23, 0.0  ;;  %7086 = vst.msk [vmem:[%s11743_s24] sm:$0xff] %vm518_vm3, %v7070_v42  ;;  %7088 = vst.msk [vmem:[%s11743_s24 + $0x10] sm:$0xff] %vm518_vm3, %v7072_v12  ;;  %v6796_v26 = vpop.permute.xlu0 %6795  ;;  %v6793_v56 = vpop.permute.xlu1 %6792 }
 0x7d3   : > { %7090 = vst.msk [vmem:[%s11743_s24 + $0x20] sm:$0xff] %vm518_vm3, %v7074_v17  ;;  %7092 = vst.msk [vmem:[%s11743_s24 + $0x30] sm:$0xff] %vm518_vm3, %v7076_v8  ;;  %v6982_v31 = vcombine.low %v6790_v1, %v6796_v26  ;;  %v6983_v5 = vcombine.high %v6790_v1, %v6796_v26  ;;  %v6966_v19 = vcombine.low %v6787_v10, %v6793_v56 }
 0x7d4   : > { %7094 = vst.msk [vmem:[%s11743_s24 + $0x40] sm:$0xff] %vm518_vm3, %v7078_v58  ;;  %7096 = vst.msk [vmem:[%s11743_s24 + $0x50] sm:$0xff] %vm518_vm3, %v7080_v29  ;;  %v6967_v25 = vcombine.high %v6787_v10, %v6793_v56  ;;  %v6998_v24 = vcombine.low %v6942_v60, %v6958_v20  ;;  %v6999_v52 = vcombine.high %v6942_v60, %v6958_v20 }
 0x7d5   : > { %7098 = vst.msk [vmem:[%s11743_s24 + $0x60] sm:$0xff] %vm518_vm3, %v7082_v36  ;;  %7100 = vst.msk [vmem:[%s11743_s24 + $0x70] sm:$0xff] %vm518_vm3, %v7084_v50  ;;  %v6990_v14 = vrot.slane %v6982_v31, %v8058_v32  ;;  %v6997_v11 = vrot.slane %v6983_v5, %v8058_v32  ;;  %v6974_v3 = vrot.slane %v6966_v19, %v8058_v32 }
 0x7d6   : > { %v6981_v54 = vrot.slane %v6967_v25, %v8058_v32  ;;  %v7014_v37 = vcombine.low %v6949_v0, %v6965_v55  ;;  %v7015_v49 = vcombine.high %v6949_v0, %v6965_v55  ;;  %v7006_v44 = vrot.slane %v6998_v24, %v8233_v4 }
 0x7d7   : > { %v7030_v45 = vcombine.low %v6974_v3, %v6990_v14  ;;  %v7031_v41 = vcombine.high %v6974_v3, %v6990_v14  ;;  %v7013_v61 = vrot.slane %v6999_v52, %v8233_v4 }
 0x7d8   : > { %v7046_v6 = vcombine.low %v6981_v54, %v6997_v11  ;;  %v7047_v47 = vcombine.high %v6981_v54, %v6997_v11  ;;  %v7022_v32 = vrot.slane %v7014_v37, %v8233_v4  ;;  %v7029_v39 = vrot.slane %v7015_v49, %v8233_v4 }
 0x7d9   : > { %v7038_v28 = vrot.slane %v7030_v45, %v8233_v4  ;;  %v7045_v16 = vrot.slane %v7031_v41, %v8233_v4 }
 0x7da   : > { %v7054_v38 = vrot.slane %v7046_v6, %v8233_v4  ;;  %v7061_v7 = vrot.slane %v7047_v47, %v8233_v4 }
 0x7db   : > { %v7062_v21 = vcombine.low %v7006_v44, %v7038_v28  ;;  %v7063_v34 = vcombine.high %v7006_v44, %v7038_v28  ;;  %v7064_v33 = vcombine.low %v7013_v61, %v7045_v16  ;;  %v7065_v48 = vcombine.high %v7013_v61, %v7045_v16 }
 0x7dc   : > { %v7066_v22 = vcombine.low %v7022_v32, %v7054_v38  ;;  %v7067_v51 = vcombine.high %v7022_v32, %v7054_v38  ;;  %v7068_v53 = vcombine.low %v7029_v39, %v7061_v7  ;;  %v7069_v63 = vcombine.high %v7029_v39, %v7061_v7 }
 0x7dd   : > { %v7071_v4 = vsel %vm9447_vm12, %v7062_v21, 0.0  ;;  %v7073_v62 = vsel %vm9447_vm12, %v7063_v34, 0.0  ;;  %v7075_v40 = vsel %vm9447_vm12, %v7064_v33, 0.0  ;;  %v7077_v35 = vsel %vm9447_vm12, %v7065_v48, 0.0 }
 0x7de   : > { %v7079_v15 = vsel %vm9447_vm12, %v7066_v22, 0.0  ;;  %v7081_v59 = vsel %vm9447_vm12, %v7067_v51, 0.0  ;;  %v7083_v20 = vsel %vm9447_vm12, %v7068_v53, 0.0  ;;  %v7085_v13 = vsel %vm9447_vm12, %v7069_v63, 0.0  ;;  %7087 = vst.msk [vmem:[%s11743_s24 + $0x8] sm:$0xff] %vm518_vm3, %v7071_v4  ;;  %7089 = vst.msk [vmem:[%s11743_s24 + $0x18] sm:$0xff] %vm518_vm3, %v7073_v62 }
 0x7df   : > { %7091 = vst.msk [vmem:[%s11743_s24 + $0x28] sm:$0xff] %vm518_vm3, %v7075_v40  ;;  %7093 = vst.msk [vmem:[%s11743_s24 + $0x38] sm:$0xff] %vm518_vm3, %v7077_v35 }
 0x7e0   : > { %7095 = vst.msk [vmem:[%s11743_s24 + $0x48] sm:$0xff] %vm518_vm3, %v7079_v15  ;;  %7097 = vst.msk [vmem:[%s11743_s24 + $0x58] sm:$0xff] %vm518_vm3, %v7081_v59 }
 0x7e1   : > { %7099 = vst.msk [vmem:[%s11743_s24 + $0x68] sm:$0xff] %vm518_vm3, %v7083_v20  ;;  %7101 = vst.msk [vmem:[%s11743_s24 + $0x78] sm:$0xff] %vm518_vm3, %v7085_v13 }
 0x7e2   : > { %7714 = shalt.err (!%p7711_p7)
}
 0x7e3   : > { %s7715_s12 = scalar_lea.hbm %s11780_s18, 2048  ;;  %s7719_s21 = scalar_lea.hbm %s11864_s6, 4096 }
 0x7e4   : > { %p7716_p9 = scmp.ne.s32.totalorder %s11780_s18, %s7715_s12  ;;  %p7720_p0 = scmp.lt.u32.totalorder %s11780_s18, %s11864_s6 }
 0x7e5   : > { %p7721_p6 = scmp.lt.u32.totalorder %s7719_s21, %s7715_s12  ;;  %p7723_p11 = scmp.lt.u32.totalorder %s7715_s12, %s11780_s18 }
 0x7e6   : > { %p7717_p10 = pnand %p7716_p9, %p12255_p2 }
 0x7e7   : > { %p7722_p8 = por %p7721_p6, %p7720_p0 }
 0x7e8   : > { %p7718_p12 = pneg %p7717_p10 }
 0x7e9   : > { %p7724_p3 = por %p7723_p11, %p7722_p8 }
 0x7eb   : > { %p7725_p4 = pnand %p7724_p3, %p7718_p12 }
 0x7ed   : > { %7728 = shalt.err (!%p7725_p4)
}
 0x7ee   : > { %s7790_s16 = smov 128   ;;  %s7791_s17 = smov 8  }
 0x7ef   : > { %7235 = dma.vmem_to_hbm [thread:$0]  (%p12255_p2), %s11782_s15, 2048, %s11780_s18, %s7103_s19, %s7790_s16, %s7790_s16, %s7791_s17  }
 0x7f0 PF: > { %s7131_s29 = sand.u32 1, %s7757_s26   ;;  %p12256_p13 = scmp.ne.s32.totalorder %s11995_s14, 0 }
 0x7f1   : > { %p12257_p1 = scmp.ge.s32.totalorder %s7769_s28, 2  ;;  %s7132_s25 = scalar_lea.sflag [#allocation10], %s7131_s29 }
 0x7f3   : > { %p7242_p5 = pnand %p12257_p1, %p12256_p13 }
 0x7f5   : > { %7752 = dma.done.wait (!%p7242_p5), %s7132_s25, 2048  }
 0x7f6   : > { %7754 = vsyncadd (!%p7242_p5), %s7132_s25, 4294965248  ;;  %p25_p7 = scmp.ge.s32.totalorder %s7855_s7, 4   ;;  %s12258_s26 = smov %s7761_s0 }
 0x7f7   : > { %s12259_s0 = smov %s7765_s27  ;;  %s12260_s27 = smov %s7867_s10 }
 0x7f8   : > { %s12261_s28 = smov %s7855_s7  ;;  %27 = sbr.rel (!%p25_p7) target bundleno = 20 (0x14), region = 85 }
 0x7ff   :  { %7137 = vsyncpa [#allocation9], 1 }
 0x800   :  { %7139 = vsyncpa [#allocation9 + $0x1], 1 }
 0x801   :  { %7140 = vsyncpa [#allocation10], 1 }
 0x802   :  { %7142 = vsyncpa [#allocation10 + $0x1], 1 }

</bundles_post_ra>
